<compile_context>
chip_gen: v7x
topology: tpu7x:2x2x1
jax: 0.10.0
libtpu: 0.0.40
codegen_flags: <defaults>
</compile_context>

<pallas_src>
import functools

import jax
import jax.numpy as jnp
from jax.experimental import pallas as pl
from jax.experimental.pallas import tpu as pltpu


# ----------------------------------------------------------------------------
# Fused kernel: conv1 + relu + pool + conv2 + relu + pool + fc1 + fc2
# ----------------------------------------------------------------------------
def _cnn_fused_kernel(x_ref, w1_ref, b1_ref, w2_ref, b2_ref,
                      fc1w_ref, fc1b_ref, fc2w_ref, fc2b_ref,
                      o_ref, xp2_ref, flat_ref, *, Nb, H, W):
    """One batch chunk (Nb images) of the full forward pass.

    x_ref   : (Nb, H+2, W+2, C1)  zero-padded input, channel-replicated (Cin=1)
    w1_ref  : (3, 3, 1, C1)       conv1 HWIO weights
    b1_ref  : (1, C1)
    w2_ref  : (9*C1, C2)          conv2 weights, im2col layout (dy, dx, cin)
    b2_ref  : (1, C2)
    fc1w_ref: (H2*W2*C2, hidden)  fc1 weights, NHWC-flatten row order
    fc2w_ref: (hidden, num_classes)
    o_ref   : (1, Nb, num_classes)
    xp2_ref : VMEM scratch (Nb, H/2+2, W/2+2, C1) -- padded conv2 input
    flat_ref: VMEM scratch (Nb, H2*W2*C2)         -- flattened fc1 operand
    """
    C1 = w1_ref.shape[-1]
    C2 = w2_ref.shape[-1]
    H1, W1 = H // 2, W // 2
    H2, W2 = H1 // 2, W1 // 2

    # ---- conv1 (Cin=1) + bias + ReLU: 9 shifted VPU multiply-adds ----
    xv = x_ref[...]                                           # (Nb, H+2, W+2, C1)
    acc1 = jnp.zeros((Nb, H, W, C1), jnp.float32)
    for dy in range(3):
        for dx in range(3):
            acc1 = acc1 + xv[:, dy:dy + H, dx:dx + W, :] * w1_ref[dy, dx]
    h1 = jnp.maximum(acc1 + b1_ref[...], 0.0)                 # (Nb, H, W, C1)

    # ---- 2x2/2 max pool: pairwise column reduce + VPU max of the row slices ----
    m1 = jnp.max(h1.reshape(Nb, H1, 2, W1, 2, C1), axis=4)    # (Nb, H1, 2, W1, C1)
    p1 = jnp.maximum(m1[:, :, 0], m1[:, :, 1])                # (Nb, H1, W1, C1)

    # ---- conv2 + bias + ReLU: one im2col matmul, K = 9*C1 = 288 ----
    xp2_ref[...] = jnp.zeros(xp2_ref.shape, jnp.float32)
    xp2_ref[:, 1:H1 + 1, 1:W1 + 1, :] = p1
    xp2 = xp2_ref[...]                                        # (Nb, H1+2, W1+2, C1)
    pat = jnp.concatenate(
        [xp2[:, dy:dy + H1, dx:dx + W1, :].reshape(Nb * H1 * W1, C1)
         for dy in range(3) for dx in range(3)], axis=-1)     # (Nb*H1*W1, 9*C1)
    h2 = jnp.dot(pat, w2_ref[...], preferred_element_type=jnp.float32) + b2_ref[...]
    h2 = jnp.maximum(h2, 0.0)                                 # (Nb*H1*W1, C2)
    m2 = jnp.max(h2.reshape(Nb, H2, 2, W2, 2, C2), axis=4)
    p2 = jnp.maximum(m2[:, :, 0], m2[:, :, 1])                # (Nb, H2, W2, C2)

    # ---- flatten in NHWC order (NCHW permutation folded into fc1 weights) ----
    for iy in range(H2):
        for ix in range(W2):
            k = iy * W2 + ix
            flat_ref[:, k * C2:(k + 1) * C2] = p2[:, iy, ix, :]
    flat = flat_ref[...]                                      # (Nb, H2*W2*C2)

    # ---- fc1 -> fc2 (no activation in between, as in the reference) ----
    hfc = jnp.dot(flat, fc1w_ref[...], preferred_element_type=jnp.float32) + fc1b_ref[...]
    out = jnp.dot(hfc, fc2w_ref[...], preferred_element_type=jnp.float32) + fc2b_ref[...]
    o_ref[0] = out.astype(o_ref.dtype)


# ----------------------------------------------------------------------------
# Wrapper
# ----------------------------------------------------------------------------
def cnn_forward(x_nchw, kp):
    """x_nchw: (N, 1, H, W) float32 -- PyTorch input layout."""
    N, Cin, H, W = x_nchw.shape
    assert Cin == 1 and H % 4 == 0 and W % 4 == 0
    C1 = kp["b1"].shape[-1]
    C2 = kp["b2"].shape[-1]
    hidden = kp["fc1_b"].shape[-1]
    nc = kp["fc2_b"].shape[-1]
    H1, W1, H2, W2 = H // 2, W // 2, H // 4, W // 4

    # 2-way "parallel" batch grid so v7x's second TensorCore gets work.
    G = 2 if N % 2 == 0 else 1
    Nb = N // G

    # Pad once and broadcast the single input channel across the C1 lanes
    # (tiny, one XLA fusion): keeps the kernel's conv1 DMA lane-dense and the
    # VPU taps relayout-free.
    xpad = jnp.pad(x_nchw.reshape(N, H, W), ((0, 0), (1, 1), (1, 1)))
    xrep = jnp.broadcast_to(xpad[:, :, :, None], (N, H + 2, W + 2, C1))

    kernel = functools.partial(_cnn_fused_kernel, Nb=Nb, H=H, W=W)
    out = pl.pallas_call(
        kernel,
        out_shape=jax.ShapeDtypeStruct((G, Nb, nc), jnp.float32),
        grid=(G,),
        in_specs=[
            pl.BlockSpec((Nb, H + 2, W + 2, C1), lambda g: (g, 0, 0, 0)),
            pl.BlockSpec((3, 3, 1, C1), lambda g: (0, 0, 0, 0)),
            pl.BlockSpec((1, C1), lambda g: (0, 0)),
            pl.BlockSpec((9 * C1, C2), lambda g: (0, 0)),
            pl.BlockSpec((1, C2), lambda g: (0, 0)),
            pl.BlockSpec((H2 * W2 * C2, hidden), lambda g: (0, 0)),
            pl.BlockSpec((1, hidden), lambda g: (0, 0)),
            pl.BlockSpec((hidden, nc), lambda g: (0, 0)),
            pl.BlockSpec((1, nc), lambda g: (0, 0)),
        ],
        out_specs=pl.BlockSpec((1, Nb, nc), lambda g: (g, 0, 0)),
        scratch_shapes=[
            pltpu.VMEM((Nb, H1 + 2, W1 + 2, C1), jnp.float32),
            pltpu.VMEM((Nb, H2 * W2 * C2), jnp.float32),
        ],
        compiler_params=pltpu.CompilerParams(dimension_semantics=("parallel",)),
    )(xrep, kp["w1"], kp["b1"], kp["w2col"], kp["b2"],
      kp["fc1_wk"], kp["fc1_b"], kp["fc2_wk"], kp["fc2_b"])
    return out.reshape(N, nc)


# ----------------------------------------------------------------------------
# Parameters: PyTorch layouts, converted once to kernel layouts
# ----------------------------------------------------------------------------
def init_params(key, image_size=16, num_classes=256, filter_size=32, hidden=128):
    f = filter_size
    s = image_size // 4
    ks = jax.random.split(key, 8)
    return {
        "conv1_w": jax.random.normal(ks[0], (f, 1, 3, 3), jnp.float32) * 0.10,        # OIHW
        "conv1_b": jax.random.normal(ks[1], (f,), jnp.float32) * 0.10,
        "conv2_w": jax.random.normal(ks[2], (2 * f, f, 3, 3), jnp.float32) * 0.05,    # OIHW
        "conv2_b": jax.random.normal(ks[3], (2 * f,), jnp.float32) * 0.05,
        "fc1_w": jax.random.normal(ks[4], (hidden, 2 * f * s * s), jnp.float32) * 0.02,
        "fc1_b": jax.random.normal(ks[5], (hidden,), jnp.float32) * 0.02,
        "fc2_w": jax.random.normal(ks[6], (num_classes, hidden), jnp.float32) * 0.02,
        "fc2_b": jax.random.normal(ks[7], (num_classes,), jnp.float32) * 0.02,
    }


def to_kernel_params(p, image_size):
    # NOTE: for production sizes fc1_wk / fc2_wk could be stored as bf16 to
    # halve weight HBM traffic; kept f32 here to preserve the tight f32 check.
    C1 = p["conv1_b"].shape[0]
    C2 = p["conv2_b"].shape[0]
    H2 = W2 = image_size // 4
    hidden = p["fc1_b"].shape[0]
    nc = p["fc2_b"].shape[0]
    w1 = jnp.transpose(p["conv1_w"], (2, 3, 1, 0))                      # OIHW -> HWIO (3,3,1,C1)
    w2col = jnp.transpose(p["conv2_w"], (2, 3, 1, 0)).reshape(9 * C1, C2)
    # Fold the PyTorch (C,H,W) flatten order into fc1's rows so the kernel can
    # flatten its NHWC activations directly (no runtime transpose).
    fc1_wk = (p["fc1_w"].T.reshape(C2, H2, W2, hidden)
              .transpose(1, 2, 0, 3).reshape(H2 * W2 * C2, hidden))
    return {
        "w1": w1, "b1": p["conv1_b"].reshape(1, C1),
        "w2col": w2col, "b2": p["conv2_b"].reshape(1, C2),
        "fc1_wk": fc1_wk, "fc1_b": p["fc1_b"].reshape(1, hidden),
        "fc2_wk": p["fc2_w"].T, "fc2_b": p["fc2_b"].reshape(1, nc),
    }


# ----------------------------------------------------------------------------
# Pure-JAX reference (PyTorch semantics) for a correctness spot-check
# ----------------------------------------------------------------------------
def cnn_ref(x_nchw, p):
    def block(x, w, b):
        y = jax.lax.conv_general_dilated(
            x, w, window_strides=(1, 1), padding="SAME",
            dimension_numbers=("NCHW", "OIHW", "NCHW"))
        y = jax.nn.relu(y + b[None, :, None, None])
        return jax.lax.reduce_window(y, -jnp.inf, jax.lax.max,
                                     (1, 1, 2, 2), (1, 1, 2, 2), "VALID")

    h = block(x_nchw, p["conv1_w"], p["conv1_b"])
    h = block(h, p["conv2_w"], p["conv2_b"])
    # TODO(synk): the reference forward feeds a 4-D NCHW tensor straight into
    # fc1 (a shape error in PyTorch); we implement the (C,H,W) flatten that
    # fc1's in_features (= 2*filter*(H/4)*(W/4)) clearly implies.
    h = h.reshape(h.shape[0], -1)
    h = h @ p["fc1_w"].T + p["fc1_b"]
    return h @ p["fc2_w"].T + p["fc2_b"]


if __name__ == "__main__":
    image_size = 16      # small variant of the module default (32)
    num_classes = 256    # small variant of the default (2168); lane-dense output
    batch = 2

    key = jax.random.PRNGKey(0)
    kx, kw = jax.random.split(key)
    x = jax.random.normal(kx, (batch, 1, image_size, image_size), jnp.float32)
    params = init_params(kw, image_size=image_size, num_classes=num_classes)
    kparams = to_kernel_params(params, image_size)

    out = jax.block_until_ready(jax.jit(cnn_forward)(x, kparams))
    assert out.shape == (batch, num_classes), out.shape

    ref = jax.block_until_ready(cnn_ref(x, params))
    assert jnp.allclose(out, ref, rtol=1e-3, atol=1e-3), float(jnp.abs(out - ref).max())

    print("KERNEL_OK")
</pallas_src>

<mosaic_0001>
module attributes {stable_mosaic.version = 11 : i64} {
  func.func @_cnn_fused_kernel(%arg0: i32, %arg1: memref<1x18x18x32xf32, #tpu.memory_space<vmem>>, %arg2: memref<3x3x1x32xf32, #tpu.memory_space<vmem>>, %arg3: memref<1x32xf32, #tpu.memory_space<vmem>>, %arg4: memref<288x64xf32, #tpu.memory_space<vmem>>, %arg5: memref<1x64xf32, #tpu.memory_space<vmem>>, %arg6: memref<1024x128xf32, #tpu.memory_space<vmem>>, %arg7: memref<1x128xf32, #tpu.memory_space<vmem>>, %arg8: memref<128x256xf32, #tpu.memory_space<vmem>>, %arg9: memref<1x256xf32, #tpu.memory_space<vmem>>, %arg10: memref<1x1x256xf32, #tpu.memory_space<vmem>>, %arg11: memref<1x10x10x32xf32, #tpu.memory_space<vmem>>, %arg12: memref<1x1024xf32, #tpu.memory_space<vmem>>) attributes {dimension_semantics = [#tpu.dimension_semantics<parallel>], iteration_bounds = array<i64: 2>, scalar_prefetch = 0 : i64, scratch_operands = 2 : i64, tpu.core_type = #tpu.core_type<tc>, window_params = [{transform_indices = @transform_0, window_bounds = array<i64: 1, 18, 18, 32>}, {pipeline_mode = #tpu.pipeline_mode<synchronous>, transform_indices = @transform_1, window_bounds = array<i64: 3, 3, 1, 32>}, {pipeline_mode = #tpu.pipeline_mode<synchronous>, transform_indices = @transform_2, window_bounds = array<i64: 1, 32>}, {pipeline_mode = #tpu.pipeline_mode<synchronous>, transform_indices = @transform_3, window_bounds = array<i64: 288, 64>}, {pipeline_mode = #tpu.pipeline_mode<synchronous>, transform_indices = @transform_4, window_bounds = array<i64: 1, 64>}, {pipeline_mode = #tpu.pipeline_mode<synchronous>, transform_indices = @transform_5, window_bounds = array<i64: 1024, 128>}, {pipeline_mode = #tpu.pipeline_mode<synchronous>, transform_indices = @transform_6, window_bounds = array<i64: 1, 128>}, {pipeline_mode = #tpu.pipeline_mode<synchronous>, transform_indices = @transform_7, window_bounds = array<i64: 128, 256>}, {pipeline_mode = #tpu.pipeline_mode<synchronous>, transform_indices = @transform_8, window_bounds = array<i64: 1, 256>}, {transform_indices = @transform_9, window_bounds = array<i64: 1, 1, 256>}]} {
    %c0 = arith.constant 0 : index
    %c0_0 = arith.constant 0 : index
    %c0_1 = arith.constant 0 : index
    %c0_2 = arith.constant 0 : index
    %0 = vector.load %arg1[%c0, %c0_0, %c0_1, %c0_2] : memref<1x18x18x32xf32, #tpu.memory_space<vmem>>, vector<1x18x18x32xf32>
    %cst = arith.constant 0.000000e+00 : f32
    %1 = vector.broadcast %cst : f32 to vector<1x16x16x32xf32>
    %2 = vector.extract_strided_slice %0 {offsets = [0, 0, 0, 0], sizes = [1, 16, 16, 32], strides = [1, 1, 1, 1]} : vector<1x18x18x32xf32> to vector<1x16x16x32xf32>
    %c0_3 = arith.constant 0 : index
    %c0_4 = arith.constant 0 : index
    %c0_5 = arith.constant 0 : index
    %c0_6 = arith.constant 0 : index
    %3 = vector.load %arg2[%c0_3, %c0_4, %c0_5, %c0_6] : memref<3x3x1x32xf32, #tpu.memory_space<vmem>>, vector<1x1x1x32xf32>
    %4 = vector.shape_cast %3 : vector<1x1x1x32xf32> to vector<1x32xf32>
    %5 = vector.shape_cast %4 : vector<1x32xf32> to vector<1x1x1x32xf32>
    %6 = vector.broadcast %5 : vector<1x1x1x32xf32> to vector<1x16x16x32xf32>
    %7 = arith.mulf %2, %6 : vector<1x16x16x32xf32>
    %8 = arith.addf %1, %7 : vector<1x16x16x32xf32>
    %9 = vector.extract_strided_slice %0 {offsets = [0, 0, 1, 0], sizes = [1, 16, 16, 32], strides = [1, 1, 1, 1]} : vector<1x18x18x32xf32> to vector<1x16x16x32xf32>
    %c0_7 = arith.constant 0 : index
    %c1 = arith.constant 1 : index
    %c0_8 = arith.constant 0 : index
    %c0_9 = arith.constant 0 : index
    %10 = vector.load %arg2[%c0_7, %c1, %c0_8, %c0_9] : memref<3x3x1x32xf32, #tpu.memory_space<vmem>>, vector<1x1x1x32xf32>
    %11 = vector.shape_cast %10 : vector<1x1x1x32xf32> to vector<1x32xf32>
    %12 = vector.shape_cast %11 : vector<1x32xf32> to vector<1x1x1x32xf32>
    %13 = vector.broadcast %12 : vector<1x1x1x32xf32> to vector<1x16x16x32xf32>
    %14 = arith.mulf %9, %13 : vector<1x16x16x32xf32>
    %15 = arith.addf %8, %14 : vector<1x16x16x32xf32>
    %16 = vector.extract_strided_slice %0 {offsets = [0, 0, 2, 0], sizes = [1, 16, 16, 32], strides = [1, 1, 1, 1]} : vector<1x18x18x32xf32> to vector<1x16x16x32xf32>
    %c0_10 = arith.constant 0 : index
    %c2 = arith.constant 2 : index
    %c0_11 = arith.constant 0 : index
    %c0_12 = arith.constant 0 : index
    %17 = vector.load %arg2[%c0_10, %c2, %c0_11, %c0_12] : memref<3x3x1x32xf32, #tpu.memory_space<vmem>>, vector<1x1x1x32xf32>
    %18 = vector.shape_cast %17 : vector<1x1x1x32xf32> to vector<1x32xf32>
    %19 = vector.shape_cast %18 : vector<1x32xf32> to vector<1x1x1x32xf32>
    %20 = vector.broadcast %19 : vector<1x1x1x32xf32> to vector<1x16x16x32xf32>
    %21 = arith.mulf %16, %20 : vector<1x16x16x32xf32>
    %22 = arith.addf %15, %21 : vector<1x16x16x32xf32>
    %23 = vector.extract_strided_slice %0 {offsets = [0, 1, 0, 0], sizes = [1, 16, 16, 32], strides = [1, 1, 1, 1]} : vector<1x18x18x32xf32> to vector<1x16x16x32xf32>
    %c1_13 = arith.constant 1 : index
    %c0_14 = arith.constant 0 : index
    %c0_15 = arith.constant 0 : index
    %c0_16 = arith.constant 0 : index
    %24 = vector.load %arg2[%c1_13, %c0_14, %c0_15, %c0_16] : memref<3x3x1x32xf32, #tpu.memory_space<vmem>>, vector<1x1x1x32xf32>
    %25 = vector.shape_cast %24 : vector<1x1x1x32xf32> to vector<1x32xf32>
    %26 = vector.shape_cast %25 : vector<1x32xf32> to vector<1x1x1x32xf32>
    %27 = vector.broadcast %26 : vector<1x1x1x32xf32> to vector<1x16x16x32xf32>
    %28 = arith.mulf %23, %27 : vector<1x16x16x32xf32>
    %29 = arith.addf %22, %28 : vector<1x16x16x32xf32>
    %30 = vector.extract_strided_slice %0 {offsets = [0, 1, 1, 0], sizes = [1, 16, 16, 32], strides = [1, 1, 1, 1]} : vector<1x18x18x32xf32> to vector<1x16x16x32xf32>
    %c1_17 = arith.constant 1 : index
    %c1_18 = arith.constant 1 : index
    %c0_19 = arith.constant 0 : index
    %c0_20 = arith.constant 0 : index
    %31 = vector.load %arg2[%c1_17, %c1_18, %c0_19, %c0_20] : memref<3x3x1x32xf32, #tpu.memory_space<vmem>>, vector<1x1x1x32xf32>
    %32 = vector.shape_cast %31 : vector<1x1x1x32xf32> to vector<1x32xf32>
    %33 = vector.shape_cast %32 : vector<1x32xf32> to vector<1x1x1x32xf32>
    %34 = vector.broadcast %33 : vector<1x1x1x32xf32> to vector<1x16x16x32xf32>
    %35 = arith.mulf %30, %34 : vector<1x16x16x32xf32>
    %36 = arith.addf %29, %35 : vector<1x16x16x32xf32>
    %37 = vector.extract_strided_slice %0 {offsets = [0, 1, 2, 0], sizes = [1, 16, 16, 32], strides = [1, 1, 1, 1]} : vector<1x18x18x32xf32> to vector<1x16x16x32xf32>
    %c1_21 = arith.constant 1 : index
    %c2_22 = arith.constant 2 : index
    %c0_23 = arith.constant 0 : index
    %c0_24 = arith.constant 0 : index
    %38 = vector.load %arg2[%c1_21, %c2_22, %c0_23, %c0_24] : memref<3x3x1x32xf32, #tpu.memory_space<vmem>>, vector<1x1x1x32xf32>
    %39 = vector.shape_cast %38 : vector<1x1x1x32xf32> to vector<1x32xf32>
    %40 = vector.shape_cast %39 : vector<1x32xf32> to vector<1x1x1x32xf32>
    %41 = vector.broadcast %40 : vector<1x1x1x32xf32> to vector<1x16x16x32xf32>
    %42 = arith.mulf %37, %41 : vector<1x16x16x32xf32>
    %43 = arith.addf %36, %42 : vector<1x16x16x32xf32>
    %44 = vector.extract_strided_slice %0 {offsets = [0, 2, 0, 0], sizes = [1, 16, 16, 32], strides = [1, 1, 1, 1]} : vector<1x18x18x32xf32> to vector<1x16x16x32xf32>
    %c2_25 = arith.constant 2 : index
    %c0_26 = arith.constant 0 : index
    %c0_27 = arith.constant 0 : index
    %c0_28 = arith.constant 0 : index
    %45 = vector.load %arg2[%c2_25, %c0_26, %c0_27, %c0_28] : memref<3x3x1x32xf32, #tpu.memory_space<vmem>>, vector<1x1x1x32xf32>
    %46 = vector.shape_cast %45 : vector<1x1x1x32xf32> to vector<1x32xf32>
    %47 = vector.shape_cast %46 : vector<1x32xf32> to vector<1x1x1x32xf32>
    %48 = vector.broadcast %47 : vector<1x1x1x32xf32> to vector<1x16x16x32xf32>
    %49 = arith.mulf %44, %48 : vector<1x16x16x32xf32>
    %50 = arith.addf %43, %49 : vector<1x16x16x32xf32>
    %51 = vector.extract_strided_slice %0 {offsets = [0, 2, 1, 0], sizes = [1, 16, 16, 32], strides = [1, 1, 1, 1]} : vector<1x18x18x32xf32> to vector<1x16x16x32xf32>
    %c2_29 = arith.constant 2 : index
    %c1_30 = arith.constant 1 : index
    %c0_31 = arith.constant 0 : index
    %c0_32 = arith.constant 0 : index
    %52 = vector.load %arg2[%c2_29, %c1_30, %c0_31, %c0_32] : memref<3x3x1x32xf32, #tpu.memory_space<vmem>>, vector<1x1x1x32xf32>
    %53 = vector.shape_cast %52 : vector<1x1x1x32xf32> to vector<1x32xf32>
    %54 = vector.shape_cast %53 : vector<1x32xf32> to vector<1x1x1x32xf32>
    %55 = vector.broadcast %54 : vector<1x1x1x32xf32> to vector<1x16x16x32xf32>
    %56 = arith.mulf %51, %55 : vector<1x16x16x32xf32>
    %57 = arith.addf %50, %56 : vector<1x16x16x32xf32>
    %58 = vector.extract_strided_slice %0 {offsets = [0, 2, 2, 0], sizes = [1, 16, 16, 32], strides = [1, 1, 1, 1]} : vector<1x18x18x32xf32> to vector<1x16x16x32xf32>
    %c2_33 = arith.constant 2 : index
    %c2_34 = arith.constant 2 : index
    %c0_35 = arith.constant 0 : index
    %c0_36 = arith.constant 0 : index
    %59 = vector.load %arg2[%c2_33, %c2_34, %c0_35, %c0_36] : memref<3x3x1x32xf32, #tpu.memory_space<vmem>>, vector<1x1x1x32xf32>
    %60 = vector.shape_cast %59 : vector<1x1x1x32xf32> to vector<1x32xf32>
    %61 = vector.shape_cast %60 : vector<1x32xf32> to vector<1x1x1x32xf32>
    %62 = vector.broadcast %61 : vector<1x1x1x32xf32> to vector<1x16x16x32xf32>
    %63 = arith.mulf %58, %62 : vector<1x16x16x32xf32>
    %64 = arith.addf %57, %63 : vector<1x16x16x32xf32>
    %c0_37 = arith.constant 0 : index
    %c0_38 = arith.constant 0 : index
    %65 = vector.load %arg3[%c0_37, %c0_38] : memref<1x32xf32, #tpu.memory_space<vmem>>, vector<1x32xf32>
    %66 = vector.shape_cast %65 : vector<1x32xf32> to vector<1x1x1x32xf32>
    %67 = vector.broadcast %66 : vector<1x1x1x32xf32> to vector<1x16x16x32xf32>
    %68 = arith.addf %64, %67 : vector<1x16x16x32xf32>
    %cst_39 = arith.constant 0.000000e+00 : f32
    %69 = vector.broadcast %cst_39 : f32 to vector<1x16x16x32xf32>
    %70 = arith.maximumf %68, %69 : vector<1x16x16x32xf32>
    %71 = vector.shape_cast %70 : vector<1x16x16x32xf32> to vector<1x8x2x8x2x32xf32>
    %cst_40 = arith.constant dense<0xFF800000> : vector<1x8x2x8x32xf32>
    %72 = vector.multi_reduction <maximumf>, %71, %cst_40 [4] : vector<1x8x2x8x2x32xf32> to vector<1x8x2x8x32xf32>
    %73 = vector.extract_strided_slice %72 {offsets = [0, 0, 0, 0, 0], sizes = [1, 8, 1, 8, 32], strides = [1, 1, 1, 1, 1]} : vector<1x8x2x8x32xf32> to vector<1x8x1x8x32xf32>
    %74 = vector.shape_cast %73 : vector<1x8x1x8x32xf32> to vector<1x8x8x32xf32>
    %75 = vector.extract_strided_slice %72 {offsets = [0, 0, 1, 0, 0], sizes = [1, 8, 1, 8, 32], strides = [1, 1, 1, 1, 1]} : vector<1x8x2x8x32xf32> to vector<1x8x1x8x32xf32>
    %76 = vector.shape_cast %75 : vector<1x8x1x8x32xf32> to vector<1x8x8x32xf32>
    %77 = arith.maximumf %74, %76 : vector<1x8x8x32xf32>
    %cst_41 = arith.constant 0.000000e+00 : f32
    %78 = vector.broadcast %cst_41 : f32 to vector<1x10x10x32xf32>
    %c0_42 = arith.constant 0 : index
    %c0_43 = arith.constant 0 : index
    %c0_44 = arith.constant 0 : index
    %c0_45 = arith.constant 0 : index
    %79 = vector.load %arg11[%c0_42, %c0_43, %c0_44, %c0_45] : memref<1x10x10x32xf32, #tpu.memory_space<vmem>>, vector<1x10x10x32xf32>
    tpu.vector_store %arg11[%c0_42, %c0_43, %c0_44, %c0_45], %78 {strides = array<i32>} : memref<1x10x10x32xf32, #tpu.memory_space<vmem>>, vector<1x10x10x32xf32>,
    %c0_46 = arith.constant 0 : index
    %c1_47 = arith.constant 1 : index
    %c1_48 = arith.constant 1 : index
    %c0_49 = arith.constant 0 : index
    %80 = vector.load %arg11[%c0_46, %c1_47, %c1_48, %c0_49] : memref<1x10x10x32xf32, #tpu.memory_space<vmem>>, vector<1x8x8x32xf32>
    tpu.vector_store %arg11[%c0_46, %c1_47, %c1_48, %c0_49], %77 {strides = array<i32>} : memref<1x10x10x32xf32, #tpu.memory_space<vmem>>, vector<1x8x8x32xf32>,
    %c0_50 = arith.constant 0 : index
    %c0_51 = arith.constant 0 : index
    %c0_52 = arith.constant 0 : index
    %c0_53 = arith.constant 0 : index
    %81 = vector.load %arg11[%c0_50, %c0_51, %c0_52, %c0_53] : memref<1x10x10x32xf32, #tpu.memory_space<vmem>>, vector<1x10x10x32xf32>
    %82 = vector.extract_strided_slice %81 {offsets = [0, 0, 0, 0], sizes = [1, 8, 8, 32], strides = [1, 1, 1, 1]} : vector<1x10x10x32xf32> to vector<1x8x8x32xf32>
    %83 = vector.shape_cast %82 : vector<1x8x8x32xf32> to vector<64x32xf32>
    %84 = vector.extract_strided_slice %81 {offsets = [0, 0, 1, 0], sizes = [1, 8, 8, 32], strides = [1, 1, 1, 1]} : vector<1x10x10x32xf32> to vector<1x8x8x32xf32>
    %85 = vector.shape_cast %84 : vector<1x8x8x32xf32> to vector<64x32xf32>
    %86 = vector.extract_strided_slice %81 {offsets = [0, 0, 2, 0], sizes = [1, 8, 8, 32], strides = [1, 1, 1, 1]} : vector<1x10x10x32xf32> to vector<1x8x8x32xf32>
    %87 = vector.shape_cast %86 : vector<1x8x8x32xf32> to vector<64x32xf32>
    %88 = vector.extract_strided_slice %81 {offsets = [0, 1, 0, 0], sizes = [1, 8, 8, 32], strides = [1, 1, 1, 1]} : vector<1x10x10x32xf32> to vector<1x8x8x32xf32>
    %89 = vector.shape_cast %88 : vector<1x8x8x32xf32> to vector<64x32xf32>
    %90 = vector.extract_strided_slice %81 {offsets = [0, 1, 1, 0], sizes = [1, 8, 8, 32], strides = [1, 1, 1, 1]} : vector<1x10x10x32xf32> to vector<1x8x8x32xf32>
    %91 = vector.shape_cast %90 : vector<1x8x8x32xf32> to vector<64x32xf32>
    %92 = vector.extract_strided_slice %81 {offsets = [0, 1, 2, 0], sizes = [1, 8, 8, 32], strides = [1, 1, 1, 1]} : vector<1x10x10x32xf32> to vector<1x8x8x32xf32>
    %93 = vector.shape_cast %92 : vector<1x8x8x32xf32> to vector<64x32xf32>
    %94 = vector.extract_strided_slice %81 {offsets = [0, 2, 0, 0], sizes = [1, 8, 8, 32], strides = [1, 1, 1, 1]} : vector<1x10x10x32xf32> to vector<1x8x8x32xf32>
    %95 = vector.shape_cast %94 : vector<1x8x8x32xf32> to vector<64x32xf32>
    %96 = vector.extract_strided_slice %81 {offsets = [0, 2, 1, 0], sizes = [1, 8, 8, 32], strides = [1, 1, 1, 1]} : vector<1x10x10x32xf32> to vector<1x8x8x32xf32>
    %97 = vector.shape_cast %96 : vector<1x8x8x32xf32> to vector<64x32xf32>
    %98 = vector.extract_strided_slice %81 {offsets = [0, 2, 2, 0], sizes = [1, 8, 8, 32], strides = [1, 1, 1, 1]} : vector<1x10x10x32xf32> to vector<1x8x8x32xf32>
    %99 = vector.shape_cast %98 : vector<1x8x8x32xf32> to vector<64x32xf32>
    %100 = tpu.concatenate %83, %85, %87, %89, %91, %93, %95, %97, %99 in 1 : vector<64x32xf32>, vector<64x32xf32>, vector<64x32xf32>, vector<64x32xf32>, vector<64x32xf32>, vector<64x32xf32>, vector<64x32xf32>, vector<64x32xf32>, vector<64x32xf32> -> vector<64x288xf32>
    %c0_54 = arith.constant 0 : index
    %c0_55 = arith.constant 0 : index
    %101 = vector.load %arg4[%c0_54, %c0_55] : memref<288x64xf32, #tpu.memory_space<vmem>>, vector<288x64xf32>
    %cst_56 = arith.constant dense<0.000000e+00> : vector<64x64xf32>
    %102 = tpu.matmul %100, %101, %cst_56 {dimension_numbers = #tpu.dot_dimension_numbers<[1], [0], [0], [1], [0, 0, 1, 1], [], []>} : vector<64x288xf32>, vector<288x64xf32>, vector<64x64xf32> -> vector<64x64xf32>
    %c0_57 = arith.constant 0 : index
    %c0_58 = arith.constant 0 : index
    %103 = vector.load %arg5[%c0_57, %c0_58] : memref<1x64xf32, #tpu.memory_space<vmem>>, vector<1x64xf32>
    %104 = vector.broadcast %103 : vector<1x64xf32> to vector<64x64xf32>
    %105 = arith.addf %102, %104 : vector<64x64xf32>
    %cst_59 = arith.constant 0.000000e+00 : f32
    %106 = vector.broadcast %cst_59 : f32 to vector<64x64xf32>
    %107 = arith.maximumf %105, %106 : vector<64x64xf32>
    %108 = vector.shape_cast %107 : vector<64x64xf32> to vector<1x4x2x4x2x64xf32>
    %cst_60 = arith.constant dense<0xFF800000> : vector<1x4x2x4x64xf32>
    %109 = vector.multi_reduction <maximumf>, %108, %cst_60 [4] : vector<1x4x2x4x2x64xf32> to vector<1x4x2x4x64xf32>
    %110 = vector.extract_strided_slice %109 {offsets = [0, 0, 0, 0, 0], sizes = [1, 4, 1, 4, 64], strides = [1, 1, 1, 1, 1]} : vector<1x4x2x4x64xf32> to vector<1x4x1x4x64xf32>
    %111 = vector.shape_cast %110 : vector<1x4x1x4x64xf32> to vector<1x4x4x64xf32>
    %112 = vector.extract_strided_slice %109 {offsets = [0, 0, 1, 0, 0], sizes = [1, 4, 1, 4, 64], strides = [1, 1, 1, 1, 1]} : vector<1x4x2x4x64xf32> to vector<1x4x1x4x64xf32>
    %113 = vector.shape_cast %112 : vector<1x4x1x4x64xf32> to vector<1x4x4x64xf32>
    %114 = arith.maximumf %111, %113 : vector<1x4x4x64xf32>
    %115 = vector.extract_strided_slice %114 {offsets = [0, 0, 0, 0], sizes = [1, 1, 1, 64], strides = [1, 1, 1, 1]} : vector<1x4x4x64xf32> to vector<1x1x1x64xf32>
    %116 = vector.shape_cast %115 : vector<1x1x1x64xf32> to vector<1x64xf32>
    %c0_61 = arith.constant 0 : index
    %c0_62 = arith.constant 0 : index
    %117 = vector.load %arg12[%c0_61, %c0_62] : memref<1x1024xf32, #tpu.memory_space<vmem>>, vector<1x64xf32>
    tpu.vector_store %arg12[%c0_61, %c0_62], %116 {strides = array<i32>} : memref<1x1024xf32, #tpu.memory_space<vmem>>, vector<1x64xf32>,
    %118 = vector.extract_strided_slice %114 {offsets = [0, 0, 1, 0], sizes = [1, 1, 1, 64], strides = [1, 1, 1, 1]} : vector<1x4x4x64xf32> to vector<1x1x1x64xf32>
    %119 = vector.shape_cast %118 : vector<1x1x1x64xf32> to vector<1x64xf32>
    %c0_63 = arith.constant 0 : index
    %c64 = arith.constant 64 : index
    %120 = vector.load %arg12[%c0_63, %c64] : memref<1x1024xf32, #tpu.memory_space<vmem>>, vector<1x64xf32>
    tpu.vector_store %arg12[%c0_63, %c64], %119 {strides = array<i32>} : memref<1x1024xf32, #tpu.memory_space<vmem>>, vector<1x64xf32>,
    %121 = vector.extract_strided_slice %114 {offsets = [0, 0, 2, 0], sizes = [1, 1, 1, 64], strides = [1, 1, 1, 1]} : vector<1x4x4x64xf32> to vector<1x1x1x64xf32>
    %122 = vector.shape_cast %121 : vector<1x1x1x64xf32> to vector<1x64xf32>
    %c0_64 = arith.constant 0 : index
    %c128 = arith.constant 128 : index
    %123 = vector.load %arg12[%c0_64, %c128] : memref<1x1024xf32, #tpu.memory_space<vmem>>, vector<1x64xf32>
    tpu.vector_store %arg12[%c0_64, %c128], %122 {strides = array<i32>} : memref<1x1024xf32, #tpu.memory_space<vmem>>, vector<1x64xf32>,
    %124 = vector.extract_strided_slice %114 {offsets = [0, 0, 3, 0], sizes = [1, 1, 1, 64], strides = [1, 1, 1, 1]} : vector<1x4x4x64xf32> to vector<1x1x1x64xf32>
    %125 = vector.shape_cast %124 : vector<1x1x1x64xf32> to vector<1x64xf32>
    %c0_65 = arith.constant 0 : index
    %c192 = arith.constant 192 : index
    %126 = vector.load %arg12[%c0_65, %c192] : memref<1x1024xf32, #tpu.memory_space<vmem>>, vector<1x64xf32>
    tpu.vector_store %arg12[%c0_65, %c192], %125 {strides = array<i32>} : memref<1x1024xf32, #tpu.memory_space<vmem>>, vector<1x64xf32>,
    %127 = vector.extract_strided_slice %114 {offsets = [0, 1, 0, 0], sizes = [1, 1, 1, 64], strides = [1, 1, 1, 1]} : vector<1x4x4x64xf32> to vector<1x1x1x64xf32>
    %128 = vector.shape_cast %127 : vector<1x1x1x64xf32> to vector<1x64xf32>
    %c0_66 = arith.constant 0 : index
    %c256 = arith.constant 256 : index
    %129 = vector.load %arg12[%c0_66, %c256] : memref<1x1024xf32, #tpu.memory_space<vmem>>, vector<1x64xf32>
    tpu.vector_store %arg12[%c0_66, %c256], %128 {strides = array<i32>} : memref<1x1024xf32, #tpu.memory_space<vmem>>, vector<1x64xf32>,
    %130 = vector.extract_strided_slice %114 {offsets = [0, 1, 1, 0], sizes = [1, 1, 1, 64], strides = [1, 1, 1, 1]} : vector<1x4x4x64xf32> to vector<1x1x1x64xf32>
    %131 = vector.shape_cast %130 : vector<1x1x1x64xf32> to vector<1x64xf32>
    %c0_67 = arith.constant 0 : index
    %c320 = arith.constant 320 : index
    %132 = vector.load %arg12[%c0_67, %c320] : memref<1x1024xf32, #tpu.memory_space<vmem>>, vector<1x64xf32>
    tpu.vector_store %arg12[%c0_67, %c320], %131 {strides = array<i32>} : memref<1x1024xf32, #tpu.memory_space<vmem>>, vector<1x64xf32>,
    %133 = vector.extract_strided_slice %114 {offsets = [0, 1, 2, 0], sizes = [1, 1, 1, 64], strides = [1, 1, 1, 1]} : vector<1x4x4x64xf32> to vector<1x1x1x64xf32>
    %134 = vector.shape_cast %133 : vector<1x1x1x64xf32> to vector<1x64xf32>
    %c0_68 = arith.constant 0 : index
    %c384 = arith.constant 384 : index
    %135 = vector.load %arg12[%c0_68, %c384] : memref<1x1024xf32, #tpu.memory_space<vmem>>, vector<1x64xf32>
    tpu.vector_store %arg12[%c0_68, %c384], %134 {strides = array<i32>} : memref<1x1024xf32, #tpu.memory_space<vmem>>, vector<1x64xf32>,
    %136 = vector.extract_strided_slice %114 {offsets = [0, 1, 3, 0], sizes = [1, 1, 1, 64], strides = [1, 1, 1, 1]} : vector<1x4x4x64xf32> to vector<1x1x1x64xf32>
    %137 = vector.shape_cast %136 : vector<1x1x1x64xf32> to vector<1x64xf32>
    %c0_69 = arith.constant 0 : index
    %c448 = arith.constant 448 : index
    %138 = vector.load %arg12[%c0_69, %c448] : memref<1x1024xf32, #tpu.memory_space<vmem>>, vector<1x64xf32>
    tpu.vector_store %arg12[%c0_69, %c448], %137 {strides = array<i32>} : memref<1x1024xf32, #tpu.memory_space<vmem>>, vector<1x64xf32>,
    %139 = vector.extract_strided_slice %114 {offsets = [0, 2, 0, 0], sizes = [1, 1, 1, 64], strides = [1, 1, 1, 1]} : vector<1x4x4x64xf32> to vector<1x1x1x64xf32>
    %140 = vector.shape_cast %139 : vector<1x1x1x64xf32> to vector<1x64xf32>
    %c0_70 = arith.constant 0 : index
    %c512 = arith.constant 512 : index
    %141 = vector.load %arg12[%c0_70, %c512] : memref<1x1024xf32, #tpu.memory_space<vmem>>, vector<1x64xf32>
    tpu.vector_store %arg12[%c0_70, %c512], %140 {strides = array<i32>} : memref<1x1024xf32, #tpu.memory_space<vmem>>, vector<1x64xf32>,
    %142 = vector.extract_strided_slice %114 {offsets = [0, 2, 1, 0], sizes = [1, 1, 1, 64], strides = [1, 1, 1, 1]} : vector<1x4x4x64xf32> to vector<1x1x1x64xf32>
    %143 = vector.shape_cast %142 : vector<1x1x1x64xf32> to vector<1x64xf32>
    %c0_71 = arith.constant 0 : index
    %c576 = arith.constant 576 : index
    %144 = vector.load %arg12[%c0_71, %c576] : memref<1x1024xf32, #tpu.memory_space<vmem>>, vector<1x64xf32>
    tpu.vector_store %arg12[%c0_71, %c576], %143 {strides = array<i32>} : memref<1x1024xf32, #tpu.memory_space<vmem>>, vector<1x64xf32>,
    %145 = vector.extract_strided_slice %114 {offsets = [0, 2, 2, 0], sizes = [1, 1, 1, 64], strides = [1, 1, 1, 1]} : vector<1x4x4x64xf32> to vector<1x1x1x64xf32>
    %146 = vector.shape_cast %145 : vector<1x1x1x64xf32> to vector<1x64xf32>
    %c0_72 = arith.constant 0 : index
    %c640 = arith.constant 640 : index
    %147 = vector.load %arg12[%c0_72, %c640] : memref<1x1024xf32, #tpu.memory_space<vmem>>, vector<1x64xf32>
    tpu.vector_store %arg12[%c0_72, %c640], %146 {strides = array<i32>} : memref<1x1024xf32, #tpu.memory_space<vmem>>, vector<1x64xf32>,
    %148 = vector.extract_strided_slice %114 {offsets = [0, 2, 3, 0], sizes = [1, 1, 1, 64], strides = [1, 1, 1, 1]} : vector<1x4x4x64xf32> to vector<1x1x1x64xf32>
    %149 = vector.shape_cast %148 : vector<1x1x1x64xf32> to vector<1x64xf32>
    %c0_73 = arith.constant 0 : index
    %c704 = arith.constant 704 : index
    %150 = vector.load %arg12[%c0_73, %c704] : memref<1x1024xf32, #tpu.memory_space<vmem>>, vector<1x64xf32>
    tpu.vector_store %arg12[%c0_73, %c704], %149 {strides = array<i32>} : memref<1x1024xf32, #tpu.memory_space<vmem>>, vector<1x64xf32>,
    %151 = vector.extract_strided_slice %114 {offsets = [0, 3, 0, 0], sizes = [1, 1, 1, 64], strides = [1, 1, 1, 1]} : vector<1x4x4x64xf32> to vector<1x1x1x64xf32>
    %152 = vector.shape_cast %151 : vector<1x1x1x64xf32> to vector<1x64xf32>
    %c0_74 = arith.constant 0 : index
    %c768 = arith.constant 768 : index
    %153 = vector.load %arg12[%c0_74, %c768] : memref<1x1024xf32, #tpu.memory_space<vmem>>, vector<1x64xf32>
    tpu.vector_store %arg12[%c0_74, %c768], %152 {strides = array<i32>} : memref<1x1024xf32, #tpu.memory_space<vmem>>, vector<1x64xf32>,
    %154 = vector.extract_strided_slice %114 {offsets = [0, 3, 1, 0], sizes = [1, 1, 1, 64], strides = [1, 1, 1, 1]} : vector<1x4x4x64xf32> to vector<1x1x1x64xf32>
    %155 = vector.shape_cast %154 : vector<1x1x1x64xf32> to vector<1x64xf32>
    %c0_75 = arith.constant 0 : index
    %c832 = arith.constant 832 : index
    %156 = vector.load %arg12[%c0_75, %c832] : memref<1x1024xf32, #tpu.memory_space<vmem>>, vector<1x64xf32>
    tpu.vector_store %arg12[%c0_75, %c832], %155 {strides = array<i32>} : memref<1x1024xf32, #tpu.memory_space<vmem>>, vector<1x64xf32>,
    %157 = vector.extract_strided_slice %114 {offsets = [0, 3, 2, 0], sizes = [1, 1, 1, 64], strides = [1, 1, 1, 1]} : vector<1x4x4x64xf32> to vector<1x1x1x64xf32>
    %158 = vector.shape_cast %157 : vector<1x1x1x64xf32> to vector<1x64xf32>
    %c0_76 = arith.constant 0 : index
    %c896 = arith.constant 896 : index
    %159 = vector.load %arg12[%c0_76, %c896] : memref<1x1024xf32, #tpu.memory_space<vmem>>, vector<1x64xf32>
    tpu.vector_store %arg12[%c0_76, %c896], %158 {strides = array<i32>} : memref<1x1024xf32, #tpu.memory_space<vmem>>, vector<1x64xf32>,
    %160 = vector.extract_strided_slice %114 {offsets = [0, 3, 3, 0], sizes = [1, 1, 1, 64], strides = [1, 1, 1, 1]} : vector<1x4x4x64xf32> to vector<1x1x1x64xf32>
    %161 = vector.shape_cast %160 : vector<1x1x1x64xf32> to vector<1x64xf32>
    %c0_77 = arith.constant 0 : index
    %c960 = arith.constant 960 : index
    %162 = vector.load %arg12[%c0_77, %c960] : memref<1x1024xf32, #tpu.memory_space<vmem>>, vector<1x64xf32>
    tpu.vector_store %arg12[%c0_77, %c960], %161 {strides = array<i32>} : memref<1x1024xf32, #tpu.memory_space<vmem>>, vector<1x64xf32>,
    %c0_78 = arith.constant 0 : index
    %c0_79 = arith.constant 0 : index
    %163 = vector.load %arg12[%c0_78, %c0_79] : memref<1x1024xf32, #tpu.memory_space<vmem>>, vector<1x1024xf32>
    %c0_80 = arith.constant 0 : index
    %c0_81 = arith.constant 0 : index
    %164 = vector.load %arg6[%c0_80, %c0_81] : memref<1024x128xf32, #tpu.memory_space<vmem>>, vector<1024x128xf32>
    %cst_82 = arith.constant dense<0.000000e+00> : vector<1x128xf32>
    %165 = tpu.matmul %163, %164, %cst_82 {dimension_numbers = #tpu.dot_dimension_numbers<[1], [0], [0], [1], [0, 0, 1, 1], [], []>} : vector<1x1024xf32>, vector<1024x128xf32>, vector<1x128xf32> -> vector<1x128xf32>
    %c0_83 = arith.constant 0 : index
    %c0_84 = arith.constant 0 : index
    %166 = vector.load %arg7[%c0_83, %c0_84] : memref<1x128xf32, #tpu.memory_space<vmem>>, vector<1x128xf32>
    %167 = arith.addf %165, %166 : vector<1x128xf32>
    %c0_85 = arith.constant 0 : index
    %c0_86 = arith.constant 0 : index
    %168 = vector.load %arg8[%c0_85, %c0_86] : memref<128x256xf32, #tpu.memory_space<vmem>>, vector<128x256xf32>
    %cst_87 = arith.constant dense<0.000000e+00> : vector<1x256xf32>
    %169 = tpu.matmul %167, %168, %cst_87 {dimension_numbers = #tpu.dot_dimension_numbers<[1], [0], [0], [1], [0, 0, 1, 1], [], []>} : vector<1x128xf32>, vector<128x256xf32>, vector<1x256xf32> -> vector<1x256xf32>
    %c0_88 = arith.constant 0 : index
    %c0_89 = arith.constant 0 : index
    %170 = vector.load %arg9[%c0_88, %c0_89] : memref<1x256xf32, #tpu.memory_space<vmem>>, vector<1x256xf32>
    %171 = arith.addf %169, %170 : vector<1x256xf32>
    %c0_90 = arith.constant 0 : index
    %c0_91 = arith.constant 0 : index
    %c0_92 = arith.constant 0 : index
    %172 = vector.load %arg10[%c0_90, %c0_91, %c0_92] : memref<1x1x256xf32, #tpu.memory_space<vmem>>, vector<1x1x256xf32>
    %173 = vector.shape_cast %172 : vector<1x1x256xf32> to vector<1x256xf32>
    %174 = vector.shape_cast %171 : vector<1x256xf32> to vector<1x1x256xf32>
    tpu.vector_store %arg10[%c0_90, %c0_91, %c0_92], %174 {strides = array<i32>} : memref<1x1x256xf32, #tpu.memory_space<vmem>>, vector<1x1x256xf32>,
    return
  }
  func.func @transform_0(%arg0: i32) -> (i32, i32, i32, i32) {
    %c0_i32 = arith.constant 0 : i32
    %c0_i32_0 = arith.constant 0 : i32
    %c0_i32_1 = arith.constant 0 : i32
    %c0_i32_2 = arith.constant 0 : i32
    return %arg0, %c0_i32, %c0_i32_0, %c0_i32_1 : i32, i32, i32, i32
  }
  func.func @transform_1(%arg0: i32) -> (i32, i32, i32, i32) {
    %c0_i32 = arith.constant 0 : i32
    %c0_i32_0 = arith.constant 0 : i32
    %c0_i32_1 = arith.constant 0 : i32
    %c0_i32_2 = arith.constant 0 : i32
    %c0_i32_3 = arith.constant 0 : i32
    return %c0_i32, %c0_i32_0, %c0_i32_1, %c0_i32_2 : i32, i32, i32, i32
  }
  func.func @transform_2(%arg0: i32) -> (i32, i32) {
    %c0_i32 = arith.constant 0 : i32
    %c0_i32_0 = arith.constant 0 : i32
    %c0_i32_1 = arith.constant 0 : i32
    return %c0_i32, %c0_i32_0 : i32, i32
  }
  func.func @transform_3(%arg0: i32) -> (i32, i32) {
    %c0_i32 = arith.constant 0 : i32
    %c0_i32_0 = arith.constant 0 : i32
    %c0_i32_1 = arith.constant 0 : i32
    return %c0_i32, %c0_i32_0 : i32, i32
  }
  func.func @transform_4(%arg0: i32) -> (i32, i32) {
    %c0_i32 = arith.constant 0 : i32
    %c0_i32_0 = arith.constant 0 : i32
    %c0_i32_1 = arith.constant 0 : i32
    return %c0_i32, %c0_i32_0 : i32, i32
  }
  func.func @transform_5(%arg0: i32) -> (i32, i32) {
    %c0_i32 = arith.constant 0 : i32
    %c0_i32_0 = arith.constant 0 : i32
    %c0_i32_1 = arith.constant 0 : i32
    return %c0_i32, %c0_i32_0 : i32, i32
  }
  func.func @transform_6(%arg0: i32) -> (i32, i32) {
    %c0_i32 = arith.constant 0 : i32
    %c0_i32_0 = arith.constant 0 : i32
    %c0_i32_1 = arith.constant 0 : i32
    return %c0_i32, %c0_i32_0 : i32, i32
  }
  func.func @transform_7(%arg0: i32) -> (i32, i32) {
    %c0_i32 = arith.constant 0 : i32
    %c0_i32_0 = arith.constant 0 : i32
    %c0_i32_1 = arith.constant 0 : i32
    return %c0_i32, %c0_i32_0 : i32, i32
  }
  func.func @transform_8(%arg0: i32) -> (i32, i32) {
    %c0_i32 = arith.constant 0 : i32
    %c0_i32_0 = arith.constant 0 : i32
    %c0_i32_1 = arith.constant 0 : i32
    return %c0_i32, %c0_i32_0 : i32, i32
  }
  func.func @transform_9(%arg0: i32) -> (i32, i32, i32) {
    %c0_i32 = arith.constant 0 : i32
    %c0_i32_0 = arith.constant 0 : i32
    %c0_i32_1 = arith.constant 0 : i32
    return %arg0, %c0_i32, %c0_i32_0 : i32, i32, i32
  }
}

</mosaic_0001>

<bundles_post_ra>
// kernel: cnn_forward.1
= control target key start
LH: loop header
LB: loop body
LE: loop exit
PB: predicated region body
PF: predicated region fallthrough
CT: control target
= control target key end

     0   :  { %14 = vsyncpa [#allocation5], 0  ;;  %s10137_s0 = inlined_call_operand.vmem [shape: f32[2,18,18,32], index: 0, kind: input, shape index: {}]   ;;  %s10138_s1 = inlined_call_operand.hbm [shape: f32[3,3,1,32], index: 1, kind: input, shape index: {}]   ;;  %s10139_s2 = inlined_call_operand.vmem [shape: f32[1,32], index: 2, kind: input, shape index: {}]   ;;  %s10140_s3 = inlined_call_operand.vmem [shape: f32[288,64], index: 3, kind: input, shape index: {}]   ;;  %s10141_s4 = inlined_call_operand.hbm [shape: f32[1,64], index: 4, kind: input, shape index: {}]   ;;  %s10142_s5 = inlined_call_operand.vmem [shape: f32[1024,128], index: 5, kind: input, shape index: {}]   ;;  %s10143_s6 = inlined_call_operand.hbm [shape: f32[1,128], index: 6, kind: input, shape index: {}]   ;;  %s10144_s7 = inlined_call_operand.vmem [shape: f32[128,256], index: 7, kind: input, shape index: {}]   ;;  %s10145_s8 = inlined_call_operand.vmem [shape: f32[1,256], index: 8, kind: input, shape index: {}]   ;;  %s10146_s9 = inlined_call_operand.vmem [shape: f32[2,1,256], index: 9, kind: output, shape index: {}]  }
   0x1   :  { %15 = vsyncpa [#allocation7], 0  ;;  %s6700_s30 = smov 0  }
   0x2 LB: > { %s6639_s10 = smov [#allocation6]   ;;  %s6706_s12 = sadd.s32 4294967295, %s6637_s30   ;;  %s6637_s30 = sphi %s6700_s30, %s21_s30  }
   0x3   : > { %s278_s11 = sshll.u32 %s6639_s10, 4  ;;  %p5867_p0 = scmp.ge.s32.totalorder %s6637_s30, 1  ;;  %s279_s11 = int_to_ptr.vmem [resolvable:$true] %s278_s11 }
   0x4   : > { %p246_p1 = scmp.lt.s32.totalorder %s6637_s30, 3  ;;  %p10147_p2 = scmp.eq.s32.totalorder %s6706_s12, 0 }
   0x5   : > { %s6640_s14 = smov [#allocation4]   ;;  %s6641_s17 = smov [#allocation8]  }
   0x6   : > { %p6711_p3 = pnand %p5867_p0, %p246_p1  ;;  %s258_s15 = sshll.u32 %s6640_s14, 4  ;;  %s6723_s15 = int_to_ptr.vmem [resolvable:$true] %s258_s15 }
   0x7   : > { %s292_s18 = sshll.u32 %s6641_s17, 4  ;;  %s6539_s21 = scalar_lea.hbm %s10141_s4, 16  ;;  %s6725_s18 = int_to_ptr.vmem [resolvable:$true] %s292_s18 }
   0x8   : > { %s10218_s13 = scalar_select %p6711_p3, 1, 0 }
   0x9   : > { %p6340_p4 = pneg %p6711_p3  ;;  %p6540_p6 = scmp.ne.s32.totalorder %s10141_s4, %s6539_s21 }
   0xa   : > { %p6546_p10 = scmp.lt.u32.totalorder %s6539_s21, %s10141_s4 }
   0xb   : > { %p6719_p5 = pnand %p10147_p2, %p6340_p4 }
   0xd   : > { %p6735_p7 = pneg %p6719_p5 }
   0xf   : > { %p6542_p8 = pnand %p6735_p7, %p6540_p6 }
  0x11   : > { %p6543_p9 = pneg %p6542_p8 }
  0x13   : > { %p6548_p11 = pnand %p6546_p10, %p6543_p9 }
  0x15   : > { %6551 = shalt.err (!%p6548_p11)
}
  0x16   : > { %s6552_s27 = scalar_lea.vmem %s279_s11, 16  ;;  %s6559_s28 = scalar_lea.vmem %s279_s11, 32 }
  0x17   : > { %p6553_p12 = scmp.ne.s32.totalorder %s279_s11, %s6552_s27  ;;  %p6560_p1 = scmp.lt.s32.totalorder %s279_s11, %s279_s11 }
  0x18   : > { %p6561_p4 = scmp.lt.s32.totalorder %s6559_s28, %s6552_s27 }
  0x19   : > { %p6555_p13 = pnand %p6553_p12, %p6735_p7 }
  0x1a   : > { %p6562_p2 = por %p6561_p4, %p6560_p1 }
  0x1b   : > { %p6556_p0 = pneg %p6555_p13 }
  0x1d   : > { %p6563_p3 = pnand %p6562_p2, %p6556_p0 }
  0x1f   : > { %6566 = shalt.err (!%p6563_p3)
}
  0x20   : > { %6346 = dma.hbm_to_vmem [thread:$0]  (!%p6719_p5), %s10141_s4, 16, %s279_s11, [#allocation7]  }
  0x21   : > { %s6567_s19 = scalar_lea.hbm %s10138_s1, 144 }
  0x22   : > { %p6568_p6 = scmp.ne.s32.totalorder %s10138_s1, %s6567_s19  ;;  %p6574_p2 = scmp.lt.u32.totalorder %s6567_s19, %s10138_s1 }
  0x24   : > { %p6570_p8 = pnand %p6568_p6, %p6735_p7 }
  0x26   : > { %p6571_p9 = pneg %p6570_p8 }
  0x28   : > { %p6576_p3 = pnand %p6574_p2, %p6571_p9 }
  0x2a   : > { %6579 = shalt.err (!%p6576_p3)
}
  0x2b   : > { %s6580_s11 = scalar_lea.vmem %s6723_s15, 144  ;;  %s6587_s25 = scalar_lea.vmem %s6723_s15, 160 }
  0x2c   : > { %p6581_p10 = scmp.ne.s32.totalorder %s6723_s15, %s6580_s11  ;;  %p6588_p13 = scmp.lt.s32.totalorder %s6723_s15, %s6723_s15 }
  0x2d   : > { %p6589_p0 = scmp.lt.s32.totalorder %s6587_s25, %s6580_s11 }
  0x2e   : > { %p6583_p11 = pnand %p6581_p10, %p6735_p7 }
  0x2f   : > { %p6590_p1 = por %p6589_p0, %p6588_p13 }
  0x30   : > { %p6584_p12 = pneg %p6583_p11 }
  0x32   : > { %p6591_p4 = pnand %p6590_p1, %p6584_p12 }
  0x34   : > { %6594 = shalt.err (!%p6591_p4)
}
  0x35   : > { %s6642_s26 = smov 16   ;;  %s6643_s27 = smov 1  }
  0x36   : > { %6343 = dma.hbm_to_vmem [thread:$0]  (!%p6719_p5), %s10138_s1, 144, %s6723_s15, [#allocation5], %s6642_s26, %s6642_s26, %s6643_s27  }
  0x37   : > { %s6595_s17 = scalar_lea.hbm %s10143_s6, 16 }
  0x38   : > { %p6596_p6 = scmp.ne.s32.totalorder %s10143_s6, %s6595_s17  ;;  %p6602_p2 = scmp.lt.u32.totalorder %s6595_s17, %s10143_s6 }
  0x3a   : > { %p6598_p8 = pnand %p6596_p6, %p6735_p7 }
  0x3c   : > { %p6599_p9 = pneg %p6598_p8 }
  0x3e   : > { %p6604_p3 = pnand %p6602_p2, %p6599_p9 }
  0x40   : > { %6607 = shalt.err (!%p6604_p3)
}
  0x41   : > { %s6608_s15 = scalar_lea.vmem %s6725_s18, 16  ;;  %s6615_s23 = scalar_lea.vmem %s6725_s18, 32 }
  0x42   : > { %p6609_p10 = scmp.ne.s32.totalorder %s6725_s18, %s6608_s15  ;;  %p6616_p13 = scmp.lt.s32.totalorder %s6725_s18, %s6725_s18 }
  0x43   : > { %p6617_p0 = scmp.lt.s32.totalorder %s6615_s23, %s6608_s15 }
  0x44   : > { %p6611_p11 = pnand %p6609_p10, %p6735_p7 }
  0x45   : > { %p6618_p1 = por %p6617_p0, %p6616_p13 }
  0x46   : > { %p6612_p12 = pneg %p6611_p11 }
  0x48   : > { %p6619_p4 = pnand %p6618_p1, %p6612_p12 }
  0x4a   : > { %6622 = shalt.err (!%p6619_p4)
}
  0x4b   : > { %6349 = dma.hbm_to_vmem [thread:$0]  (!%p6719_p5), %s10143_s6, 16, %s6725_s18, [#allocation7]  }
  0x4c   : > { %p10221_p6 = scmp.ne.s32.totalorder %s10218_s13, 0 }
  0x4e   : > { %319 = sbr.rel (%p10221_p6) target bundleno = 1702 (0x6a6), region = 56 }
  0x55   : > { %p10222_p7 = scmp.eq.s32.totalorder %s6706_s12, 0 }
  0x57   : > { %6628 = dma.done.wait (%p10222_p7), [#allocation5], 144   ;;  %p10223_p8 = pmov %p10222_p7 }
  0x58   : > { %p10224_p9 = pmov %p10222_p7 }
  0x59   : > { %6630 = vsyncadd (%p10223_p8), [#allocation5], 4294967152 }
  0x5a   : > { %6632 = dma.done.wait (%p10224_p9), [#allocation7], 32   ;;  %p10225_p2 = pmov %p10222_p7 }
  0x5b   : > { %p362_p3 = scmp.lt.s32.totalorder %s6706_s12, 1  ;;  %vm2905_vm0 = vcmask 254976   ;;  %vm3866_vm1 = vcmask 261120   ;;  %v10149_v0 = vmov 0.0   ;;  %v6645_v1 = vmov 1983009808  }
  0x5c   : > { %6634 = vsyncadd (%p10225_p2), [#allocation7], 4294967264  ;;  %3867 = vst.msk [vmem:[#allocation2] sm:$0xff] %vm3866_vm1, %v10149_v0  ;;  %v2235_v2 = vunpack.c.l.s4 %v6645_v1  ;;  %v10150_v3 = vlaneseq  ;;  %vm600_vm2 = vcmask 1046528   ;;  %vm849_vm3 = vcmask 1045504   ;;  %s6646_s28 = smov 64  }
  0x5d   : > { %s10336_s12 = smov (!%p362_p3, %s6706_s12), 1  ;;  %3868 = vst.msk [vmem:[#allocation2 + $0x8] sm:$0x3] %vm2905_vm0, %v10149_v0  ;;  %3872 = vst.msk [vmem:[#allocation2 + $0x28] sm:$0x3] %vm2905_vm0, %v10149_v0  ;;  %vm3951_vm4 = vcmask 1041409  }
  0x5e   : > { %3871 = vst.msk [vmem:[#allocation2 + $0x20] sm:$0xff] %vm3866_vm1, %v10149_v0  ;;  %3869 = vst.msk [vmem:[#allocation2 + $0x10] sm:$0xff] %vm3866_vm1, %v10149_v0  ;;  %s6327_s13 = smul.u32 432, %s10336_s12  ;;  %v2236_v4 = vunpack.c.0.s8 %v2235_v2  ;;  %v6860_v5 = vshrl.u32 %v10150_v3, 7  ;;  %v6880_v12 = vld [vmem:[#allocation4] ss:$0 sm:$0xff] }
  0x5f   : > { %3870 = vst.msk [vmem:[#allocation2 + $0x18] sm:$0x3] %vm2905_vm0, %v10149_v0  ;;  %3874 = vst.msk [vmem:[#allocation2 + $0x38] sm:$0x3] %vm2905_vm0, %v10149_v0  ;;  %v6882_v13 = vld [vmem:[#allocation4 + $0x1] ss:$0 sm:$0xff] }
  0x60   : > { %3873 = vst.msk [vmem:[#allocation2 + $0x30] sm:$0xff] %vm3866_vm1, %v10149_v0  ;;  %3875 = vst.msk [vmem:[#allocation2 + $0x40] sm:$0xff] %vm3866_vm1, %v10149_v0  ;;  %s6857_s24 = scalar_lea.vmem %s10137_s0, %s6327_s13  ;;  %v6884_v14 = vld [vmem:[#allocation4 + $0x2] ss:$0 sm:$0xff]  ;;  %v6887_v15 = vsub.s32 %v2236_v4, %v6860_v5  ;;  %v6928_v45 = vld [vmem:[#allocation4 + $0x3] ss:$0 sm:$0xff] }
  0x61   : > { %3876 = vst.msk [vmem:[#allocation2 + $0x48] sm:$0x3] %vm2905_vm0, %v10149_v0  ;;  %3878 = vst.msk [vmem:[#allocation2 + $0x58] sm:$0x3] %vm2905_vm0, %v10149_v0  ;;  %v6863_v6 = vld [vmem:[%s6857_s24 + $0x30] sm:$0xff]  ;;  %v6866_v7 = vld [vmem:[%s6857_s24 + $0x38] sm:$0xff] }
  0x62   : > { %3877 = vst.msk [vmem:[#allocation2 + $0x50] sm:$0xff] %vm3866_vm1, %v10149_v0  ;;  %3879 = vst.msk [vmem:[#allocation2 + $0x60] sm:$0xff] %vm3866_vm1, %v10149_v0  ;;  %v6869_v8 = vld [vmem:[%s6857_s24 + $0x40] sm:$0x3]  ;;  %v6872_v9 = vld [vmem:[%s6857_s24 + $0x48] sm:$0xff]  ;;  %v436_v16 = vmul.f32 %v6880_v12, %v6863_v6  ;;  %v437_v17 = vmul.f32 %v6880_v12, %v6866_v7  ;;  %v510_v20 = vmul.f32 %v6882_v13, %v6863_v6  ;;  %vm3953_vm5 = vcmask 1042434  }
  0x63   : > { %3880 = vst.msk [vmem:[#allocation2 + $0x68] sm:$0x3] %vm2905_vm0, %v10149_v0  ;;  %3882 = vst.msk [vmem:[#allocation2 + $0x78] sm:$0x3] %vm2905_vm0, %v10149_v0  ;;  %v6875_v10 = vld [vmem:[%s6857_s24 + $0x50] sm:$0xff]  ;;  %v438_v18 = vmul.f32 %v6880_v12, %v6872_v9  ;;  %v511_v21 = vmul.f32 %v6882_v13, %v6866_v7  ;;  %v512_v22 = vmul.f32 %v6882_v13, %v6869_v8  ;;  %v6924_v40 = vld [vmem:[%s6857_s24 + $0x60] sm:$0xff] }
  0x64   : > { %3881 = vst.msk [vmem:[#allocation2 + $0x70] sm:$0xff] %vm3866_vm1, %v10149_v0  ;;  %3883 = vst.msk [vmem:[#allocation2 + $0x80] sm:$0xff] %vm3866_vm1, %v10149_v0  ;;  %v6878_v11 = vld [vmem:[%s6857_s24 + $0x58] sm:$0x3]  ;;  %v439_v19 = vmul.f32 %v6880_v12, %v6875_v10  ;;  %v513_v23 = vmul.f32 %v6882_v13, %v6872_v9  ;;  %v514_v24 = vmul.f32 %v6882_v13, %v6875_v10  ;;  %v611_v28 = vrot.slane %v510_v20, 1  ;;  %v6940_v59 = vld [vmem:[%s6857_s24 + $0x68] sm:$0xff] }
  0x65   : > { %3884 = vst.msk [vmem:[#allocation2 + $0x88] sm:$0x3] %vm2905_vm0, %v10149_v0  ;;  %3886 = vst.msk [vmem:[#allocation2 + $0x98] sm:$0x3] %vm2905_vm0, %v10149_v0  ;;  %v515_v25 = vmul.f32 %v6882_v13, %v6878_v11  ;;  %v759_v26 = vmul.f32 %v6884_v14, %v6863_v6  ;;  %v760_v27 = vmul.f32 %v6884_v14, %v6866_v7  ;;  %v612_v29 = vrot.slane %v511_v21, 1  ;;  %s6647_s29 = smov 96  }
  0x66   : > { %3885 = vst.msk [vmem:[#allocation2 + $0x90] sm:$0xff] %vm3866_vm1, %v10149_v0  ;;  %10226 = vst [vmem:[#allocation11_spill] sm:$0xff] %v6860_v5  ;;  %v614_v30 = vrot.slane %v512_v22, 1  ;;  %v616_v31 = vrot.slane %v513_v23, 1  ;;  %v617_v32 = vrot.slane %v514_v24, 1  ;;  %v761_v34 = vmul.f32 %v6884_v14, %v6869_v8  ;;  %s6648_s10 = smov 32  }
  0x67   : > { %10227 = vst [vmem:[#allocation12_spill] sm:$0xff] %v6875_v10  ;;  %10228 = vst [vmem:[#allocation13_spill] sm:$0xff] %v6878_v11  ;;  %v619_v33 = vrot.slane %v515_v25, 1  ;;  %v762_v35 = vmul.f32 %v6884_v14, %v6872_v9  ;;  %v613_v36 = vsel %vm600_vm2, %v611_v28, %v612_v29  ;;  %v763_v38 = vmul.f32 %v6884_v14, %v6875_v10  ;;  %v6937_v58 = vld [vmem:[#allocation4 + $0x4] ss:$0 sm:$0xff]  ;;  %s5877_s19 = sshll.u32 %s10336_s12, 1 }
  0x68   : > { %10229 = vst [vmem:[#allocation14_spill] sm:$0xff] %v6880_v12  ;;  %10230 = vst [vmem:[#allocation15_spill] sm:$0xff] %v6882_v13  ;;  %v615_v37 = vsel %vm600_vm2, %v612_v29, %v614_v30  ;;  %v764_v39 = vmul.f32 %v6884_v14, %v6878_v11  ;;  %v618_v41 = vsel %vm600_vm2, %v616_v31, %v617_v32  ;;  %v860_v48 = vrot.slane %v759_v26, 2  ;;  %v6946_v1 = vld [vmem:[%s6857_s24 + $0x70] sm:$0x3]  ;;  %s370_s22 = scalar_lea.vmem %s10146_s9, %s5877_s19 }
  0x69   : > { %10231 = vst [vmem:[#allocation16_spill] sm:$0xff] %v6887_v15  ;;  %10232 = vst [vmem:[#allocation17_spill] sm:$0xff] %v6924_v40  ;;  %v620_v42 = vsel %vm600_vm2, %v617_v32, %v619_v33  ;;  %v717_v43 = vadd.f32 %v613_v36, %v436_v16  ;;  %v718_v44 = vadd.f32 %v615_v37, %v437_v17  ;;  %v861_v49 = vrot.slane %v760_v27, 2  ;;  %v6956_v22 = vld [vmem:[#allocation4 + $0x5] ss:$0 sm:$0xff] }
  0x6a   : > { %v719_v46 = vadd.f32 %v618_v41, %v438_v18  ;;  %v720_v47 = vadd.f32 %v620_v42, %v439_v19  ;;  %v863_v50 = vrot.slane %v761_v34, 2  ;;  %v865_v51 = vrot.slane %v762_v35, 2  ;;  %10233 = vst [vmem:[#allocation18_spill] sm:$0xff] %v6940_v59  ;;  %10234 = vst [vmem:[#allocation19_spill] sm:$0xff] %v6946_v1 }
  0x6b   : > { %v866_v52 = vrot.slane %v763_v38, 2  ;;  %v868_v53 = vrot.slane %v764_v39, 2  ;;  %v862_v54 = vsel %vm849_vm3, %v860_v48, %v861_v49  ;;  %v1006_v55 = vmul.f32 %v6928_v45, %v6872_v9 }
  0x6c   : > { %v1007_v56 = vmul.f32 %v6928_v45, %v6875_v10  ;;  %v1008_v57 = vmul.f32 %v6928_v45, %v6924_v40  ;;  %v864_v60 = vsel %vm849_vm3, %v861_v49, %v863_v50  ;;  %v966_v63 = vadd.f32 %v862_v54, %v717_v43  ;;  %v6980_v49 = vld [vmem:[#allocation4 + $0x6] ss:$0 sm:$0xff]  ;;  %v6983_v54 = vld [vmem:[%s6857_s24 + $0x78] sm:$0xff] }
  0x6d   : > { %v867_v61 = vsel %vm849_vm3, %v865_v51, %v866_v52  ;;  %v869_v62 = vsel %vm849_vm3, %v866_v52, %v868_v53  ;;  %v967_v2 = vadd.f32 %v864_v60, %v718_v44  ;;  %v1009_v17 = vmul.f32 %v6928_v45, %v6940_v59  ;;  %10235 = vst [vmem:[#allocation20_spill] sm:$0xff] %v6983_v54 }
  0x6e   : > { %v968_v4 = vadd.f32 %v867_v61, %v719_v46  ;;  %v969_v16 = vadd.f32 %v869_v62, %v720_v47  ;;  %v1038_v18 = vadd.f32 %v1006_v55, %v966_v63  ;;  %v1080_v19 = vmul.f32 %v6937_v58, %v6872_v9 }
  0x6f   : > { %v1081_v20 = vmul.f32 %v6937_v58, %v6875_v10  ;;  %v1082_v21 = vmul.f32 %v6937_v58, %v6878_v11  ;;  %v1039_v23 = vadd.f32 %v1007_v56, %v967_v2  ;;  %v1083_v26 = vmul.f32 %v6937_v58, %v6924_v40 }
  0x70   : > { %v1040_v24 = vadd.f32 %v1008_v57, %v968_v4  ;;  %v1041_v25 = vadd.f32 %v1009_v17, %v969_v16  ;;  %v1084_v27 = vmul.f32 %v6937_v58, %v6940_v59  ;;  %v1085_v28 = vmul.f32 %v6937_v58, %v6946_v1  ;;  %v6992_v4 = vld [vmem:[#allocation4 + $0x7] ss:$0 sm:$0xff]  ;;  %v6995_v16 = vld [vmem:[%s6857_s24 + $0x80] sm:$0xff] }
  0x71   : > { %v1180_v29 = vrot.slane %v1080_v19, 1  ;;  %v1181_v30 = vrot.slane %v1081_v20, 1  ;;  %v1183_v31 = vrot.slane %v1082_v21, 1  ;;  %v1185_v32 = vrot.slane %v1083_v26, 1  ;;  %10236 = vst [vmem:[#allocation21_spill] sm:$0xff] %v6992_v4  ;;  %10237 = vst [vmem:[#allocation22_spill] sm:$0xff] %v6995_v16 }
  0x72   : > { %v1328_v33 = vmul.f32 %v6956_v22, %v6872_v9  ;;  %v1329_v34 = vmul.f32 %v6956_v22, %v6875_v10  ;;  %v1186_v36 = vrot.slane %v1084_v27, 1  ;;  %v1188_v37 = vrot.slane %v1085_v28, 1 }
  0x73   : > { %v1182_v35 = vsel %vm600_vm2, %v1180_v29, %v1181_v30  ;;  %v1330_v38 = vmul.f32 %v6956_v22, %v6878_v11  ;;  %v1184_v39 = vsel %vm600_vm2, %v1181_v30, %v1183_v31  ;;  %v1331_v42 = vmul.f32 %v6956_v22, %v6924_v40  ;;  %v7008_v30 = vld [vmem:[#allocation4 + $0x8] ss:$0 sm:$0xff]  ;;  %v388_v31 = vld [vmem:[%s6857_s24 + $0x88] sm:$0x3] }
  0x74   : > { %v1286_v41 = vadd.f32 %v1182_v35, %v1038_v18  ;;  %v1332_v43 = vmul.f32 %v6956_v22, %v6940_v59  ;;  %v1187_v44 = vsel %vm600_vm2, %v1185_v32, %v1186_v36  ;;  %v1189_v46 = vsel %vm600_vm2, %v1186_v36, %v1188_v37  ;;  %10238 = vst [vmem:[#allocation23_spill] sm:$0xff] %v7008_v30 }
  0x75   : > { %v1287_v47 = vadd.f32 %v1184_v39, %v1039_v23  ;;  %v1333_v48 = vmul.f32 %v6956_v22, %v6946_v1  ;;  %v1288_v50 = vadd.f32 %v1187_v44, %v1040_v24  ;;  %v1289_v51 = vadd.f32 %v1189_v46, %v1041_v25 }
  0x76   : > { %v1428_v52 = vrot.slane %v1328_v33, 2  ;;  %v1429_v53 = vrot.slane %v1329_v34, 2  ;;  %v1431_v55 = vrot.slane %v1330_v38, 2  ;;  %v1433_v56 = vrot.slane %v1331_v42, 2 }
  0x77   : > { %v1434_v57 = vrot.slane %v1332_v43, 2  ;;  %v1436_v60 = vrot.slane %v1333_v48, 2  ;;  %v1574_v62 = vmul.f32 %v6980_v49, %v6924_v40  ;;  %v1575_v63 = vmul.f32 %v6980_v49, %v6940_v59 }
  0x78   : > { %v1430_v61 = vsel %vm849_vm3, %v1428_v52, %v1429_v53  ;;  %v1576_v2 = vmul.f32 %v6980_v49, %v6983_v54  ;;  %v1432_v17 = vsel %vm849_vm3, %v1429_v53, %v1431_v55  ;;  %v1577_v25 = vmul.f32 %v6980_v49, %v6995_v16 }
  0x79   : > { %v1435_v18 = vsel %vm849_vm3, %v1433_v56, %v1434_v57  ;;  %v1437_v19 = vsel %vm849_vm3, %v1434_v57, %v1436_v60  ;;  %v1534_v20 = vadd.f32 %v1430_v61, %v1286_v41  ;;  %v1535_v21 = vadd.f32 %v1432_v17, %v1287_v47 }
  0x7a   : > { %v1536_v23 = vadd.f32 %v1435_v18, %v1288_v50  ;;  %v1537_v24 = vadd.f32 %v1437_v19, %v1289_v51  ;;  %v1648_v27 = vmul.f32 %v6992_v4, %v6924_v40  ;;  %v1649_v28 = vmul.f32 %v6992_v4, %v6940_v59 }
  0x7b   : > { %v1606_v26 = vadd.f32 %v1574_v62, %v1534_v20  ;;  %v1650_v29 = vmul.f32 %v6992_v4, %v6946_v1  ;;  %v1607_v32 = vadd.f32 %v1575_v63, %v1535_v21  ;;  %v1651_v35 = vmul.f32 %v6992_v4, %v6983_v54  ;;  %v7031_v62 = vld [vmem:[#allocation2] sm:$0xff]  ;;  %v7033_v63 = vld [vmem:[#allocation2 + $0x8] sm:$0x3] }
  0x7c   : > { %v1608_v33 = vadd.f32 %v1576_v2, %v1536_v23  ;;  %v1609_v34 = vadd.f32 %v1577_v25, %v1537_v24  ;;  %v1652_v36 = vmul.f32 %v6992_v4, %v6995_v16  ;;  %v1653_v37 = vmul.f32 %v6992_v4, %v388_v31  ;;  %10239 = vst [vmem:[#allocation24_spill] sm:$0xff] %v7031_v62 }
  0x7d   : > { %v1748_v38 = vrot.slane %v1648_v27, 1  ;;  %v1749_v39 = vrot.slane %v1649_v28, 1  ;;  %v1751_v41 = vrot.slane %v1650_v29, 1  ;;  %v1753_v42 = vrot.slane %v1651_v35, 1  ;;  %10240 = vst [vmem:[#allocation25_spill] sm:$0xff] %v7033_v63  ;;  %v7048_v35 = vld [vmem:[%s6857_s24] sm:$0xff] }
  0x7e   : > { %v1896_v43 = vmul.f32 %v7008_v30, %v6924_v40  ;;  %v1897_v44 = vmul.f32 %v7008_v30, %v6940_v59  ;;  %v1754_v47 = vrot.slane %v1652_v36, 1  ;;  %v1756_v48 = vrot.slane %v1653_v37, 1 }
  0x7f   : > { %v1750_v46 = vsel %vm600_vm2, %v1748_v38, %v1749_v39  ;;  %v1898_v50 = vmul.f32 %v7008_v30, %v6946_v1  ;;  %v1752_v51 = vsel %vm600_vm2, %v1749_v39, %v1751_v41  ;;  %v1899_v53 = vmul.f32 %v7008_v30, %v6983_v54  ;;  %v7054_v41 = vld [vmem:[%s6857_s24 + $0x8] sm:$0xff] }
  0x80   : > { %v1854_v52 = vadd.f32 %v1750_v46, %v1606_v26  ;;  %v1900_v55 = vmul.f32 %v7008_v30, %v6995_v16  ;;  %v1755_v56 = vsel %vm600_vm2, %v1753_v42, %v1754_v47  ;;  %v1757_v57 = vsel %vm600_vm2, %v1754_v47, %v1756_v48  ;;  %v7039_v26 = vld [vmem:[%s10139_s2] ss:$0 sm:$0xff]  ;;  %v7057_v42 = vld [vmem:[%s6857_s24 + $0x10] sm:$0x3] }
  0x81   : > { %v1855_v60 = vadd.f32 %v1752_v51, %v1607_v32  ;;  %v1901_v61 = vmul.f32 %v7008_v30, %v388_v31  ;;  %v1856_v2 = vadd.f32 %v1755_v56, %v1608_v33  ;;  %v1857_v17 = vadd.f32 %v1757_v57, %v1609_v34  ;;  %10241 = vst [vmem:[#allocation26_spill] sm:$0xff] %v7039_v26  ;;  %v7064_v46 = vld [vmem:[%s6857_s24 + $0x20] sm:$0xff] }
  0x82   : > { %v1996_v18 = vrot.slane %v1896_v43, 2  ;;  %v1997_v19 = vrot.slane %v1897_v44, 2  ;;  %v1999_v20 = vrot.slane %v1898_v50, 2  ;;  %v2001_v21 = vrot.slane %v1899_v53, 2  ;;  %v7060_v43 = vld [vmem:[%s6857_s24 + $0x18] sm:$0xff] }
  0x83   : > { %v2002_v23 = vrot.slane %v1900_v55, 2  ;;  %v2004_v24 = vrot.slane %v1901_v61, 2  ;;  %v4091_v28 = vrot.slane %v7031_v62, 2  ;;  %v4092_v29 = vrot.slane %v7033_v63, 2  ;;  %v7082_v55 = vld [vmem:[%s6857_s24 + $0x28] sm:$0x3] }
  0x84   : > { %v1998_v25 = vsel %vm849_vm3, %v1996_v18, %v1997_v19  ;;  %v2000_v31 = vsel %vm849_vm3, %v1997_v19, %v1999_v20  ;;  %v7068_v47 = vmul.f32 %v6880_v12, %v7048_v35  ;;  %v7072_v48 = vmul.f32 %v6880_v12, %v7054_v41 }
  0x85   : > { %v2003_v32 = vsel %vm849_vm3, %v2001_v21, %v2002_v23  ;;  %v2005_v33 = vsel %vm849_vm3, %v2002_v23, %v2004_v24  ;;  %v2102_v34 = vadd.f32 %v1998_v25, %v1854_v52  ;;  %v2103_v36 = vadd.f32 %v2000_v31, %v1855_v60 }
  0x86   : > { %v2104_v37 = vadd.f32 %v2003_v32, %v1856_v2  ;;  %v2105_v38 = vadd.f32 %v2005_v33, %v1857_v17  ;;  %v7051_v39 = vsel %vm849_vm3, %v4091_v28, %v4092_v29  ;;  %v7076_v50 = vmul.f32 %v6880_v12, %v7060_v43 }
  0x87   : > { %v2141_v44 = vadd.f32 %v7039_v26, %v2102_v34  ;;  %v2142_v51 = vadd.f32 %v7039_v26, %v2103_v36  ;;  %v7086_v56 = vmul.f32 %v6880_v12, %v7064_v46  ;;  %v7090_v60 = vmul.f32 %v6882_v13, %v7048_v35 }
  0x88   : > { %v2143_v52 = vadd.f32 %v7039_v26, %v2104_v37  ;;  %v2144_v53 = vadd.f32 %v7039_v26, %v2105_v38  ;;  %v7094_v61 = vmul.f32 %v6882_v13, %v7054_v41  ;;  %v7098_v2 = vmul.f32 %v6882_v13, %v7057_v42 }
  0x89   : > { %v2173_v57 = vmax.f32 %v2141_v44, 0.0  ;;  %v2174_v17 = vmax.f32 %v2142_v51, 0.0  ;;  %v7102_v20 = vmul.f32 %v6882_v13, %v7060_v43  ;;  %v7107_v24 = vmul.f32 %v6882_v13, %v7064_v46 }
  0x8a   : > { %v2175_v18 = vmax.f32 %v2143_v52, 0.0  ;;  %v2176_v19 = vmax.f32 %v2144_v53, 0.0  ;;  %v7111_v25 = vmul.f32 %v6882_v13, %v7082_v55  ;;  %vm3955_vm6 = vcmask 1043459  }
  0x8b   : > { %v2301_v21 = vcombine.high %v2173_v57, %v2173_v57  ;;  %v2308_v23 = vrot.slane %v2173_v57, %v6887_v15  ;;  %v2318_v28 = vcombine.high %v2174_v17, %v2174_v17  ;;  %v2325_v29 = vrot.slane %v2174_v17, %v6887_v15 }
  0x8c   : > { %v2335_v31 = vcombine.high %v2175_v18, %v2175_v18  ;;  %v7115_v32 = vrot.slane %v2175_v18, %v6887_v15  ;;  %v2352_v36 = vcombine.high %v2176_v19, %v2176_v19  ;;  %v7119_v37 = vrot.slane %v2176_v19, %v6887_v15 }
  0x8d   : > { %v2315_v33 = vrot.slane %v2301_v21, %v6887_v15  ;;  %v2316_v34 = vcombine.high %v2308_v23, %v2308_v23  ;;  %v2332_v38 = vrot.slane %v2318_v28, %v6887_v15  ;;  %v2333_v44 = vcombine.high %v2325_v29, %v2325_v29 }
  0x8e   : > { %v7123_v51 = vrot.slane %v2335_v31, %v6887_v15  ;;  %v2350_v52 = vcombine.high %v7115_v32, %v7115_v32  ;;  %v7128_v57 = vrot.slane %v2352_v36, %v6887_v15  ;;  %v3018_v18 = vsel %vm2905_vm0, %v2308_v23, -inf }
  0x8f   : > { %v2317_v53 = vcombine.high %v2315_v33, %v2315_v33  ;;  %v2334_v19 = vcombine.high %v2332_v38, %v2332_v38  ;;  %v3019_v28 = vrot.slane %v3018_v18, 4  ;;  %v3025_v31 = vsel %vm2905_vm0, %v2316_v34, -inf }
  0x90   : > { %v2351_v21 = vcombine.high %v7123_v51, %v7123_v51  ;;  %v3026_v3 = vrot.slane %v3025_v31, 4  ;;  %v3032_v27 = vsel %vm2905_vm0, %v2315_v33, -inf  ;;  %v3046_v23 = vsel %vm2905_vm0, %v2325_v29, -inf }
  0x91   : > { %v3039_v36 = vsel %vm2905_vm0, %v2317_v53, -inf  ;;  %v3020_v5 = vmax.f32 %v3018_v18, %v3019_v28  ;;  %v3033_v1 = vrot.slane %v3032_v27, 4  ;;  %v3047_v13 = vrot.slane %v3046_v23, 4 }
  0x92   : > { %v3040_v17 = vrot.slane %v3039_v36, 4  ;;  %v3027_v15 = vmax.f32 %v3025_v31, %v3026_v3  ;;  %v3053_v16 = vsel %vm2905_vm0, %v2333_v44, -inf  ;;  %v3060_v54 = vsel %vm2905_vm0, %v2332_v38, -inf }
  0x93   : > { %v3021_v34 = vrot.slane %v3020_v5, 2  ;;  %v3034_v59 = vmax.f32 %v3032_v27, %v3033_v1  ;;  %v3054_v0 = vrot.slane %v3053_v16, 4  ;;  %v3048_v63 = vmax.f32 %v3046_v23, %v3047_v13 }
  0x94   : > { %v3041_v12 = vmax.f32 %v3039_v36, %v3040_v17  ;;  %v3028_v40 = vrot.slane %v3027_v15, 2  ;;  %v3061_v33 = vrot.slane %v3060_v54, 4  ;;  %v3067_v53 = vsel %vm2905_vm0, %v2334_v19, -inf }
  0x95   : > { %v3022_v18 = vmax.f32 %v3020_v5, %v3021_v34  ;;  %v3035_v28 = vrot.slane %v3034_v59, 2  ;;  %v3055_v62 = vmax.f32 %v3053_v16, %v3054_v0  ;;  %v3049_v3 = vrot.slane %v3048_v63, 2 }
  0x96   : > { %v3042_v26 = vrot.slane %v3041_v12, 2  ;;  %v3029_v29 = vmax.f32 %v3027_v15, %v3028_v40  ;;  %v3062_v31 = vmax.f32 %v3060_v54, %v3061_v33  ;;  %v3068_v30 = vrot.slane %v3067_v53, 4 }
  0x97   : > { %v3023_v44 = vrot.slane %v3022_v18, 1  ;;  %v3036_v11 = vmax.f32 %v3034_v59, %v3035_v28  ;;  %v3056_v4 = vrot.slane %v3055_v62, 2  ;;  %v3050_v27 = vmax.f32 %v3048_v63, %v3049_v3 }
  0x98   : > { %v3043_v38 = vmax.f32 %v3041_v12, %v3042_v26  ;;  %v3030_v1 = vrot.slane %v3029_v29, 1  ;;  %v3063_v17 = vrot.slane %v3062_v31, 2  ;;  %v3069_v36 = vmax.f32 %v3067_v53, %v3068_v30 }
  0x99   : > { %v7144_v13 = vmax.f32 %v3022_v18, %v3023_v44  ;;  %v3037_v23 = vrot.slane %v3036_v11, 1  ;;  %v3057_v5 = vmax.f32 %v3055_v62, %v3056_v4  ;;  %v3051_v0 = vrot.slane %v3050_v27, 1 }
  0x9a   : > { %v3044_v19 = vrot.slane %v3043_v38, 1  ;;  %v7146_v34 = vmax.f32 %v3029_v29, %v3030_v1  ;;  %v3064_v15 = vmax.f32 %v3062_v31, %v3063_v17  ;;  %v3070_v40 = vrot.slane %v3069_v36, 2 }
  0x9b   : > { %v7148_v54 = vmax.f32 %v3036_v11, %v3037_v23  ;;  %v3058_v12 = vrot.slane %v3057_v5, 1  ;;  %v3074_v59 = vsel %vm2905_vm0, %v7115_v32, -inf  ;;  %v7154_v63 = vmax.f32 %v3050_v27, %v3051_v0 }
  0x9c   : > { %v7150_v16 = vmax.f32 %v3043_v38, %v3044_v19  ;;  %v3065_v30 = vrot.slane %v3064_v15, 1  ;;  %v3071_v26 = vmax.f32 %v3069_v36, %v3070_v40  ;;  %v3075_v33 = vrot.slane %v3074_v59, 4 }
  0x9d   : > { %v7156_v53 = vmax.f32 %v3057_v5, %v3058_v12  ;;  %v3081_v4 = vsel %vm2905_vm0, %v2350_v52, -inf  ;;  %v3088_v62 = vsel %vm2905_vm0, %v7123_v51, -inf  ;;  %v3095_v11 = vsel %vm2905_vm0, %v2351_v21, -inf }
  0x9e   : > { %v7162_v18 = vmax.f32 %v3064_v15, %v3065_v30  ;;  %v3072_v28 = vrot.slane %v3071_v26, 1  ;;  %v3076_v29 = vmax.f32 %v3074_v59, %v3075_v33  ;;  %v3082_v3 = vrot.slane %v3081_v4, 4 }
  0x9f   : > { %v3089_v32 = vrot.slane %v3088_v62, 4  ;;  %v3096_v31 = vrot.slane %v3095_v11, 4  ;;  %v3102_v44 = vsel %vm2905_vm0, %v7119_v37, -inf  ;;  %v10242_v38 = vcombine.high %v7119_v37, %v7119_v37 }
  0xa0   : > { %v7170_v1 = vmax.f32 %v3071_v26, %v3072_v28  ;;  %v3077_v51 = vrot.slane %v3076_v29, 2  ;;  %v3083_v27 = vmax.f32 %v3081_v4, %v3082_v3  ;;  %v3103_v21 = vrot.slane %v3102_v44, 4 }
  0xa1   : > { %v3109_v52 = vsel %vm2905_vm0, %v10242_v38, -inf  ;;  %v3090_v17 = vmax.f32 %v3088_v62, %v3089_v32  ;;  %v3097_v36 = vmax.f32 %v3095_v11, %v3096_v31  ;;  %v3116_v19 = vsel %vm2905_vm0, %v7128_v57, -inf }
  0xa2   : > { %v3110_v23 = vrot.slane %v3109_v52, 4  ;;  %v3078_v5 = vmax.f32 %v3076_v29, %v3077_v51  ;;  %v3084_v0 = vrot.slane %v3083_v27, 2  ;;  %v3104_v15 = vmax.f32 %v3102_v44, %v3103_v21 }
  0xa3   : > { %v3117_v40 = vrot.slane %v3116_v19, 4  ;;  %v3091_v37 = vrot.slane %v3090_v17, 2  ;;  %v3098_v12 = vrot.slane %v3097_v36, 2  ;;  %v10243_v30 = vcombine.high %v7128_v57, %v7128_v57 }
  0xa4   : > { %v3111_v59 = vmax.f32 %v3109_v52, %v3110_v23  ;;  %v3079_v33 = vrot.slane %v3078_v5, 1  ;;  %v3085_v4 = vmax.f32 %v3083_v27, %v3084_v0  ;;  %v3105_v62 = vrot.slane %v3104_v15, 2 }
  0xa5   : > { %v3123_v26 = vsel %vm2905_vm0, %v10243_v30, -inf  ;;  %v3118_v11 = vmax.f32 %v3116_v19, %v3117_v40  ;;  %vm3957_vm7 = vcmask 1044484   ;;  %v3092_v28 = vmax.f32 %v3090_v17, %v3091_v37 }
  0xa6   : > { %v3099_v29 = vmax.f32 %v3097_v36, %v3098_v12  ;;  %v3112_v3 = vrot.slane %v3111_v59, 2  ;;  %v3124_v32 = vrot.slane %v3123_v26, 4  ;;  %vm3959_vm8 = vcmask 1045509  }
  0xa7   : > { %v3080_v31 = vmax.f32 %v3078_v5, %v3079_v33  ;;  %v3086_v44 = vrot.slane %v3085_v4, 1  ;;  %v3106_v38 = vmax.f32 %v3104_v15, %v3105_v62  ;;  %v3119_v52 = vrot.slane %v3118_v11, 2 }
  0xa8   : > { %vm3961_vm9 = vcmask 1046534   ;;  %v3093_v51 = vrot.slane %v3092_v28, 1  ;;  %v3100_v57 = vrot.slane %v3099_v29, 1  ;;  %v3113_v21 = vmax.f32 %v3111_v59, %v3112_v3 }
  0xa9   : > { %v3125_v23 = vmax.f32 %v3123_v26, %v3124_v32  ;;  %v3087_v30 = vmax.f32 %v3085_v4, %v3086_v44  ;;  %v3107_v10 = vrot.slane %v3106_v38, 1  ;;  %v3120_v27 = vmax.f32 %v3118_v11, %v3119_v52 }
  0xaa   : > { %v3810_v19 = vmax.f32 %v7144_v13, %v3080_v31  ;;  %vm3963_vm10 = vcmask 1047559   ;;  %v3094_v17 = vmax.f32 %v3092_v28, %v3093_v51  ;;  %v3101_v36 = vmax.f32 %v3099_v29, %v3100_v57 }
  0xab   : > { %v3114_v0 = vrot.slane %v3113_v21, 1  ;;  %v3126_v40 = vrot.slane %v3125_v23, 2  ;;  %v3108_v37 = vmax.f32 %v3106_v38, %v3107_v10  ;;  %v3121_v5 = vrot.slane %v3120_v27, 1 }
  0xac   : > { %v3811_v15 = vmax.f32 %v7146_v34, %v3087_v30  ;;  %v601_v12 = vrot.slane %v7090_v60, 1  ;;  %v3812_v59 = vmax.f32 %v7148_v54, %v3094_v17  ;;  %v3813_v26 = vmax.f32 %v7150_v16, %v3101_v36 }
  0xad   : > { %v3115_v33 = vmax.f32 %v3113_v21, %v3114_v0  ;;  %v3127_v62 = vmax.f32 %v3125_v23, %v3126_v40  ;;  %v3122_v4 = vmax.f32 %v3120_v27, %v3121_v5  ;;  %v3814_v13 = vmax.f32 %v7154_v63, %v3108_v37 }
  0xae   : > { %v3965_v11 = vsel %vm3951_vm4, %v3811_v15, %v3810_v19  ;;  %v602_v28 = vrot.slane %v7094_v61, 1  ;;  %v604_v60 = vrot.slane %v7098_v2, 1  ;;  %v606_v32 = vrot.slane %v7102_v20, 1 }
  0xaf   : > { %v3128_v29 = vrot.slane %v3127_v62, 1  ;;  %v3815_v10 = vmax.f32 %v7156_v53, %v3115_v33  ;;  %v3966_v34 = vsel %vm3953_vm5, %v3812_v59, %v3965_v11  ;;  %v3816_v3 = vmax.f32 %v7162_v18, %v3122_v4 }
  0xb0   : > { %v3967_v54 = vsel %vm3955_vm6, %v3813_v26, %v3966_v34  ;;  %v603_v16 = vsel %vm600_vm2, %v601_v12, %v602_v28  ;;  %v605_v61 = vsel %vm600_vm2, %v602_v28, %v604_v60  ;;  %v607_v44 = vrot.slane %v7107_v24, 1 }
  0xb1   : > { %v3129_v63 = vmax.f32 %v3127_v62, %v3128_v29  ;;  %v3968_v31 = vsel %vm3957_vm7, %v3814_v13, %v3967_v54  ;;  %v609_v38 = vrot.slane %v7111_v25, 1  ;;  %v713_v2 = vadd.f32 %v603_v16, %v7068_v47 }
  0xb2   : > { %v3969_v53 = vsel %vm3959_vm8, %v3815_v10, %v3968_v31  ;;  %v714_v18 = vadd.f32 %v605_v61, %v7072_v48  ;;  %v608_v20 = vsel %vm600_vm2, %v606_v32, %v607_v44  ;;  %v753_v57 = vmul.f32 %v6884_v14, %v7048_v35 }
  0xb3   : > { %v3817_v52 = vmax.f32 %v7170_v1, %v3129_v63  ;;  %v3970_v51 = vsel %vm3961_vm9, %v3816_v3, %v3969_v53  ;;  %v610_v21 = vsel %vm600_vm2, %v607_v44, %v609_v38  ;;  %v715_v24 = vadd.f32 %v608_v20, %v7076_v50 }
  0xb4   : > { %v754_v25 = vmul.f32 %v6884_v14, %v7054_v41  ;;  %v755_v47 = vmul.f32 %v6884_v14, %v7057_v42  ;;  %v716_v1 = vadd.f32 %v610_v21, %v7086_v56  ;;  %v756_v23 = vmul.f32 %v6884_v14, %v7060_v43 }
  0xb5   : > { %v3971_v48 = vsel %vm3963_vm10, %v3817_v52, %v3970_v51  ;;  %v757_v35 = vmul.f32 %v6884_v14, %v7064_v46  ;;  %v758_v50 = vmul.f32 %v6884_v14, %v7082_v55  ;;  %v850_v30 = vrot.slane %v753_v57, 2 }
  0xb6   : > { %4024 = vst.msk [vmem:[#allocation2 + $0x21] sm:$0xff] %vm3866_vm1, %v3971_v48  ;;  %v851_v41 = vrot.slane %v754_v25, 2  ;;  %v853_v27 = vrot.slane %v755_v47, 2  ;;  %v855_v19 = vrot.slane %v756_v23, 2  ;;  %v1002_v17 = vmul.f32 %v6928_v45, %v7060_v43 }
  0xb7   : > { %v856_v42 = vrot.slane %v757_v35, 2  ;;  %v1003_v56 = vmul.f32 %v6928_v45, %v7064_v46  ;;  %v858_v40 = vrot.slane %v758_v50, 2  ;;  %v1004_v37 = vmul.f32 %v6928_v45, %v6863_v6 }
  0xb8   : > { %v852_v36 = vsel %vm849_vm3, %v850_v30, %v851_v41  ;;  %v854_v0 = vsel %vm849_vm3, %v851_v41, %v853_v27  ;;  %v1005_v12 = vmul.f32 %v6928_v45, %v6866_v7  ;;  %v1074_v59 = vmul.f32 %v6937_v58, %v7060_v43 }
  0xb9   : > { %v857_v14 = vsel %vm849_vm3, %v855_v19, %v856_v42  ;;  %v962_v5 = vadd.f32 %v852_v36, %v713_v2  ;;  %v963_v15 = vadd.f32 %v854_v0, %v714_v18  ;;  %v859_v33 = vsel %vm849_vm3, %v856_v42, %v858_v40  ;;  %v10244_v19 = vld [vmem:[#allocation12_spill] sm:$0xff] }
  0xba   : > { %v964_v62 = vadd.f32 %v857_v14, %v715_v24  ;;  %v1075_v26 = vmul.f32 %v6937_v58, %v7064_v46  ;;  %v965_v4 = vadd.f32 %v859_v33, %v716_v1  ;;  %v1076_v28 = vmul.f32 %v6937_v58, %v7082_v55 }
  0xbb   : > { %v1034_v13 = vadd.f32 %v1002_v17, %v962_v5  ;;  %v1035_v11 = vadd.f32 %v1003_v56, %v963_v15  ;;  %v1077_v10 = vmul.f32 %v6937_v58, %v6863_v6  ;;  %v1078_v45 = vmul.f32 %v6937_v58, %v6866_v7  ;;  %v10245_v17 = vld [vmem:[#allocation21_spill] sm:$0xff] }
  0xbc   : > { %v1036_v29 = vadd.f32 %v1004_v37, %v964_v62  ;;  %v1079_v34 = vmul.f32 %v6937_v58, %v6869_v8  ;;  %v1037_v3 = vadd.f32 %v1005_v12, %v965_v4  ;;  %v1170_v54 = vrot.slane %v1074_v59, 1  ;;  %v10246_v59 = vld [vmem:[#allocation13_spill] sm:$0xff] }
  0xbd   : > { %v7244_v60 = vld [vmem:[#allocation2 + $0x20] sm:$0xff]  ;;  %v1171_v16 = vrot.slane %v1075_v26, 1  ;;  %v1173_v32 = vrot.slane %v1076_v28, 1  ;;  %v1175_v31 = vrot.slane %v1077_v10, 1  ;;  %v1176_v61 = vrot.slane %v1078_v45, 1 }
  0xbe   : > { %v6375_v63 = vpack.i.bf16 %v7051_v39, %v7244_v60  ;;  %v1178_v44 = vrot.slane %v1079_v34, 1  ;;  %v1322_v2 = vmul.f32 %v6956_v22, %v7060_v43  ;;  %v1323_v58 = vmul.f32 %v6956_v22, %v7064_v46 }
  0xbf   : > { %v1172_v53 = vsel %vm600_vm2, %v1170_v54, %v1171_v16  ;;  %v1174_v38 = vsel %vm600_vm2, %v1171_v16, %v1173_v32  ;;  %v1177_v18 = vsel %vm600_vm2, %v1175_v31, %v1176_v61  ;;  %v1324_v21 = vmul.f32 %v6956_v22, %v7082_v55  ;;  %v10247_v54 = vld [vmem:[#allocation23_spill] sm:$0xff] }
  0xc0   : > { %6376 = vrot.lane.b32.xlu0 %v6375_v63, %s6646_s28  ;;  %v1179_v39 = vsel %vm600_vm2, %v1176_v61, %v1178_v44  ;;  %v1282_v52 = vadd.f32 %v1172_v53, %v1034_v13  ;;  %v1283_v51 = vadd.f32 %v1174_v38, %v1035_v11  ;;  %v1284_v20 = vadd.f32 %v1177_v18, %v1036_v29  ;;  %v4036_v38 = vld [vmem:[#allocation2 + $0x28] sm:$0x3] }
  0xc1   : > { %v1285_v57 = vadd.f32 %v1179_v39, %v1037_v3  ;;  %v1325_v43 = vmul.f32 %v6956_v22, %v6863_v6  ;;  %v1326_v46 = vmul.f32 %v6956_v22, %v6866_v7  ;;  %v1327_v24 = vmul.f32 %v6956_v22, %v6869_v8 }
  0xc2   : > { %v1418_v25 = vrot.slane %v1322_v2, 2  ;;  %v1419_v47 = vrot.slane %v1323_v58, 2  ;;  %v1421_v48 = vrot.slane %v1324_v21, 2  ;;  %v1570_v23 = vmul.f32 %v6980_v49, %v6863_v6 }
  0xc3   : > { %v1423_v1 = vrot.slane %v1325_v43, 2  ;;  %v1571_v35 = vmul.f32 %v6980_v49, %v6866_v7  ;;  %v1424_v50 = vrot.slane %v1326_v46, 2  ;;  %v1426_v30 = vrot.slane %v1327_v24, 2 }
  0xc4   : > { %v1420_v55 = vsel %vm849_vm3, %v1418_v25, %v1419_v47  ;;  %v1572_v41 = vmul.f32 %v6980_v49, %v6872_v9  ;;  %v1422_v27 = vsel %vm849_vm3, %v1419_v47, %v1421_v48  ;;  %v1573_v42 = vmul.f32 %v6980_v49, %v10244_v19 }
  0xc5   : > { %v1530_v22 = vadd.f32 %v1420_v55, %v1282_v52  ;;  %v1642_v56 = vmul.f32 %v10245_v17, %v6863_v6  ;;  %v1425_v36 = vsel %vm849_vm3, %v1423_v1, %v1424_v50  ;;  %v1427_v0 = vsel %vm849_vm3, %v1424_v50, %v1426_v30  ;;  %v10249_v1 = vld [vmem:[#allocation24_spill] sm:$0xff] }
  0xc6   : > { %v1531_v40 = vadd.f32 %v1422_v27, %v1283_v51  ;;  %v1643_v37 = vmul.f32 %v10245_v17, %v6866_v7  ;;  %v1532_v14 = vadd.f32 %v1425_v36, %v1284_v20  ;;  %v1533_v5 = vadd.f32 %v1427_v0, %v1285_v57 }
  0xc7   : > { %v1602_v15 = vadd.f32 %v1570_v23, %v1530_v22  ;;  %v1644_v12 = vmul.f32 %v10245_v17, %v6869_v8  ;;  %v1645_v49 = vmul.f32 %v10245_v17, %v6872_v9  ;;  %v1646_v62 = vmul.f32 %v10245_v17, %v10244_v19  ;;  %v10250_v22 = vld [vmem:[#allocation26_spill] sm:$0xff] }
  0xc8   : > { %v1603_v33 = vadd.f32 %v1571_v35, %v1531_v40  ;;  %v1647_v26 = vmul.f32 %v10245_v17, %v10246_v59  ;;  %v1604_v4 = vadd.f32 %v1572_v41, %v1532_v14  ;;  %v1605_v13 = vadd.f32 %v1573_v42, %v1533_v5  ;;  %v10251_v42 = vld [vmem:[#allocation25_spill] sm:$0xff]  ;;  %v10256_v5 = vld [vmem:[#allocation18_spill] sm:$0xff] }
  0xc9   : > { %v1738_v11 = vrot.slane %v1642_v56, 1  ;;  %v1739_v28 = vrot.slane %v1643_v37, 1  ;;  %v1741_v29 = vrot.slane %v1644_v12, 1  ;;  %v1743_v10 = vrot.slane %v1645_v49, 1  ;;  %v10254_v40 = vld [vmem:[#allocation17_spill] sm:$0xff]  ;;  %v10255_v37 = vld [vmem:[#allocation14_spill] sm:$0xff] }
  0xca   : > { %v1744_v45 = vrot.slane %v1646_v62, 1  ;;  %v1746_v34 = vrot.slane %v1647_v26, 1  ;;  %v1890_v16 = vmul.f32 %v10247_v54, %v6863_v6  ;;  %v1891_v32 = vmul.f32 %v10247_v54, %v6866_v7  ;;  %v10257_v49 = vld [vmem:[#allocation20_spill] sm:$0xff]  ;;  %v10258_v26 = vld [vmem:[#allocation22_spill] sm:$0xff] }
  0xcb   : > { %v1740_v3 = vsel %vm600_vm2, %v1738_v11, %v1739_v28  ;;  %v1892_v63 = vmul.f32 %v10247_v54, %v6869_v8  ;;  %v1742_v31 = vsel %vm600_vm2, %v1739_v28, %v1741_v29  ;;  %v1893_v6 = vmul.f32 %v10247_v54, %v6872_v9 }
  0xcc   : > { %v1745_v61 = vsel %vm600_vm2, %v1743_v10, %v1744_v45  ;;  %v1747_v44 = vsel %vm600_vm2, %v1744_v45, %v1746_v34  ;;  %v1850_v53 = vadd.f32 %v1740_v3, %v1602_v15  ;;  %v1851_v2 = vadd.f32 %v1742_v31, %v1603_v33  ;;  %v10260_v34 = vld [vmem:[#allocation16_spill] sm:$0xff] }
  0xcd   : > { %v1852_v58 = vadd.f32 %v1745_v61, %v1604_v4  ;;  %v1853_v18 = vadd.f32 %v1747_v44, %v1605_v13  ;;  %v1894_v7 = vmul.f32 %v10247_v54, %v10244_v19  ;;  %v1895_v8 = vmul.f32 %v10247_v54, %v10246_v59  ;;  %v10259_v13 = vld [vmem:[#allocation15_spill] sm:$0xff] }
  0xce   : > { %v1986_v39 = vrot.slane %v1890_v16, 2  ;;  %v1987_v52 = vrot.slane %v1891_v32, 2  ;;  %v1989_v51 = vrot.slane %v1892_v63, 2  ;;  %v1991_v20 = vrot.slane %v1893_v6, 2  ;;  %v10261_v32 = vld [vmem:[#allocation19_spill] sm:$0xff] }
  0xcf   : > { %v4073_v57 = vrot.slane %v7244_v60, 1  ;;  %v4074_v21 = vrot.slane %v4036_v38, 1  ;;  %v1992_v46 = vrot.slane %v1894_v7, 2  ;;  %v1994_v24 = vrot.slane %v1895_v8, 2 }
  0xd0   : > { %v1988_v43 = vsel %vm849_vm3, %v1986_v39, %v1987_v52  ;;  %v4098_v25 = vrot.slane %v4036_v38, 2  ;;  %v1990_v9 = vsel %vm849_vm3, %v1987_v52, %v1989_v51  ;;  %v4067_v23 = vrot.slane %v10249_v1, 1 }
  0xd1   : > { %v2098_v47 = vadd.f32 %v1988_v43, %v1850_v53  ;;  %v7309_v48 = vsel %vm600_vm2, %v4073_v57, %v4074_v21  ;;  %v1993_v35 = vsel %vm849_vm3, %v1991_v20, %v1992_v46  ;;  %v1995_v55 = vsel %vm849_vm3, %v1992_v46, %v1994_v24 }
  0xd2   : > { %10248 = vst [vmem:[#allocation12_spill] sm:$0xff] %v7309_v48  ;;  %v2099_v50 = vadd.f32 %v1990_v9, %v1851_v2  ;;  %v4097_v30 = vrot.slane %v7244_v60, 2  ;;  %v2100_v41 = vadd.f32 %v1993_v35, %v1852_v58  ;;  %v2101_v27 = vadd.f32 %v1995_v55, %v1853_v18 }
  0xd3   : > { %v2137_v19 = vadd.f32 %v10250_v22, %v2098_v47  ;;  %v10252_v17 = vrot.slane %v10251_v42, 1  ;;  %v7327_v14 = vmul.f32 %v10255_v37, %v10254_v40  ;;  %v7331_v60 = vmul.f32 %v10255_v37, %v10256_v5 }
  0xd4   : > { %v2138_v36 = vadd.f32 %v10250_v22, %v2099_v50  ;;  %v7323_v0 = vsel %vm849_vm3, %v4097_v30, %v4098_v25  ;;  %v2139_v15 = vadd.f32 %v10250_v22, %v2100_v41  ;;  %v2140_v12 = vadd.f32 %v10250_v22, %v2101_v27 }
  0xd5   : > { %v7319_v56 = vsel %vm600_vm2, %v4067_v23, %v10252_v17  ;;  %10253 = vst [vmem:[#allocation21_spill] sm:$0xff] %v7323_v0  ;;  %v2169_v33 = vmax.f32 %v2137_v19, 0.0  ;;  %v7337_v62 = vmul.f32 %v10255_v37, %v10257_v49  ;;  %6115 = vmatprep.mubr.msk.f32.mxu1 %vm3866_vm1, %v7323_v0  ;;  %v7343_v4 = vmul.f32 %v10255_v37, %v10258_v26 }
  0xd6   : > { %v2170_v59 = vmax.f32 %v2138_v36, 0.0  ;;  %v7347_v11 = vmul.f32 %v10259_v13, %v10254_v40  ;;  %v7351_v28 = vmul.f32 %v10259_v13, %v10256_v5  ;;  %v2171_v29 = vmax.f32 %v2139_v15, 0.0 }
  0xd7   : > { %v2172_v10 = vmax.f32 %v2140_v12, 0.0  ;;  %v2233_v45 = vcombine.high %v2169_v33, %v2169_v33  ;;  %v2240_v3 = vrot.slane %v2169_v33, %v10260_v34  ;;  %v7357_v63 = vmul.f32 %v10259_v13, %v10261_v32 }
  0xd8   : > { %v2250_v54 = vcombine.high %v2170_v59, %v2170_v59  ;;  %v2257_v16 = vrot.slane %v2170_v59, %v10260_v34  ;;  %v7361_v31 = vmul.f32 %v10259_v13, %v10257_v49  ;;  %v2267_v53 = vcombine.high %v2171_v29, %v2171_v29 }
  0xd9   : > { %v2247_v61 = vrot.slane %v2233_v45, %v10260_v34  ;;  %v2248_v44 = vcombine.high %v2240_v3, %v2240_v3  ;;  %v7365_v38 = vrot.slane %v2171_v29, %v10260_v34  ;;  %v2284_v18 = vcombine.high %v2172_v10, %v2172_v10 }
  0xda   : > { %v2264_v2 = vrot.slane %v2250_v54, %v10260_v34  ;;  %v2265_v58 = vcombine.high %v2257_v16, %v2257_v16  ;;  %v7369_v6 = vrot.slane %v2172_v10, %v10260_v34  ;;  %v7372_v8 = vrot.slane %v2267_v53, %v10260_v34 }
  0xdb   : > { %v2249_v7 = vcombine.high %v2247_v61, %v2247_v61  ;;  %v2282_v39 = vcombine.high %v7365_v38, %v7365_v38  ;;  %v2906_v52 = vsel %vm2905_vm0, %v2240_v3, -inf  ;;  %v7378_v20 = vrot.slane %v2284_v18, %v10260_v34 }
  0xdc   : > { %v2266_v51 = vcombine.high %v2264_v2, %v2264_v2  ;;  %v2299_v57 = vcombine.high %v7369_v6, %v7369_v6  ;;  %v2907_v21 = vrot.slane %v2906_v52, 4  ;;  %v2283_v43 = vcombine.high %v7372_v8, %v7372_v8 }
  0xdd   : > { %v2913_v46 = vsel %vm2905_vm0, %v2248_v44, -inf  ;;  %v2920_v24 = vsel %vm2905_vm0, %v2247_v61, -inf  ;;  %v2927_v25 = vsel %vm2905_vm0, %v2249_v7, -inf  ;;  %v2300_v9 = vcombine.high %v7378_v20, %v7378_v20 }
  0xde   : > { %v2908_v47 = vmax.f32 %v2906_v52, %v2907_v21  ;;  %v2914_v1 = vrot.slane %v2913_v46, 4  ;;  %v2921_v23 = vrot.slane %v2920_v24, 4  ;;  %v2928_v35 = vrot.slane %v2927_v25, 4 }
  0xdf   : > { %v2934_v55 = vsel %vm2905_vm0, %v2257_v16, -inf  ;;  %v2941_v50 = vsel %vm2905_vm0, %v2265_v58, -inf  ;;  %v2948_v30 = vsel %vm2905_vm0, %v2264_v2, -inf  ;;  %v2955_v40 = vsel %vm2905_vm0, %v2266_v51, -inf }
  0xe0   : > { %v2909_v41 = vrot.slane %v2908_v47, 2  ;;  %v2915_v27 = vmax.f32 %v2913_v46, %v2914_v1  ;;  %v2922_v22 = vmax.f32 %v2920_v24, %v2921_v23  ;;  %v2935_v19 = vrot.slane %v2934_v55, 4 }
  0xe1   : > { %v2929_v42 = vmax.f32 %v2927_v25, %v2928_v35  ;;  %v2942_v17 = vrot.slane %v2941_v50, 4  ;;  %v2949_v36 = vrot.slane %v2948_v30, 4  ;;  %v2956_v26 = vrot.slane %v2955_v40, 4 }
  0xe2   : > { %v2910_v37 = vmax.f32 %v2908_v47, %v2909_v41  ;;  %v2916_v5 = vrot.slane %v2915_v27, 2  ;;  %v2923_v15 = vrot.slane %v2922_v22, 2  ;;  %v2936_v12 = vmax.f32 %v2934_v55, %v2935_v19 }
  0xe3   : > { %v2930_v33 = vrot.slane %v2929_v42, 2  ;;  %v2943_v49 = vmax.f32 %v2941_v50, %v2942_v17  ;;  %v2950_v59 = vmax.f32 %v2948_v30, %v2949_v36  ;;  %v2957_v32 = vmax.f32 %v2955_v40, %v2956_v26 }
  0xe4   : > { %v2911_v13 = vrot.slane %v2910_v37, 1  ;;  %v2917_v29 = vmax.f32 %v2915_v27, %v2916_v5  ;;  %v2924_v10 = vmax.f32 %v2922_v22, %v2923_v15  ;;  %v2937_v45 = vrot.slane %v2936_v12, 2 }
  0xe5   : > { %v2931_v3 = vmax.f32 %v2929_v42, %v2930_v33  ;;  %v2944_v54 = vrot.slane %v2943_v49, 2  ;;  %v2951_v16 = vrot.slane %v2950_v59, 2  ;;  %v2958_v52 = vrot.slane %v2957_v32, 2 }
  0xe6   : > { %v7393_v61 = vmax.f32 %v2910_v37, %v2911_v13  ;;  %v2918_v44 = vrot.slane %v2917_v29, 1  ;;  %v2925_v53 = vrot.slane %v2924_v10, 1  ;;  %v2938_v2 = vmax.f32 %v2936_v12, %v2937_v45 }
  0xe7   : > { %v2932_v58 = vrot.slane %v2931_v3, 1  ;;  %v2945_v18 = vmax.f32 %v2943_v49, %v2944_v54  ;;  %v2952_v7 = vmax.f32 %v2950_v59, %v2951_v16  ;;  %v2962_v24 = vsel %vm2905_vm0, %v7365_v38, -inf }
  0xe8   : > { %v7395_v51 = vmax.f32 %v2917_v29, %v2918_v44  ;;  %v7397_v21 = vmax.f32 %v2924_v10, %v2925_v53  ;;  %v2939_v46 = vrot.slane %v2938_v2, 1  ;;  %v2959_v23 = vmax.f32 %v2957_v32, %v2958_v52 }
  0xe9   : > { %v7401_v25 = vmax.f32 %v2931_v3, %v2932_v58  ;;  %v2946_v47 = vrot.slane %v2945_v18, 1  ;;  %v2953_v1 = vrot.slane %v2952_v7, 1  ;;  %v2963_v55 = vrot.slane %v2962_v24, 4 }
  0xea   : > { %v7403_v35 = vmax.f32 %v2938_v2, %v2939_v46  ;;  %v2969_v50 = vsel %vm2905_vm0, %v2282_v39, -inf  ;;  %v2976_v30 = vsel %vm2905_vm0, %v7372_v8, -inf  ;;  %v2960_v22 = vrot.slane %v2959_v23, 1 }
  0xeb   : > { %v7408_v41 = vmax.f32 %v2945_v18, %v2946_v47  ;;  %v7410_v27 = vmax.f32 %v2952_v7, %v2953_v1  ;;  %v2970_v19 = vrot.slane %v2969_v50, 4  ;;  %v2964_v38 = vmax.f32 %v2962_v24, %v2963_v55 }
  0xec   : > { %v2977_v42 = vrot.slane %v2976_v30, 4  ;;  %v2983_v17 = vsel %vm2905_vm0, %v2283_v43, -inf  ;;  %v2990_v36 = vsel %vm2905_vm0, %v7369_v6, -inf  ;;  %v7415_v40 = vmax.f32 %v2959_v23, %v2960_v22 }
  0xed   : > { %v2971_v37 = vmax.f32 %v2969_v50, %v2970_v19  ;;  %v2984_v39 = vrot.slane %v2983_v17, 4  ;;  %v2991_v5 = vrot.slane %v2990_v36, 4  ;;  %v2965_v15 = vrot.slane %v2964_v38, 2 }
  0xee   : > { %v2978_v8 = vmax.f32 %v2976_v30, %v2977_v42  ;;  %v2997_v12 = vsel %vm2905_vm0, %v2299_v57, -inf  ;;  %v3004_v33 = vsel %vm2905_vm0, %v7378_v20, -inf  ;;  %v3011_v45 = vsel %vm2905_vm0, %v2300_v9, -inf }
  0xef   : > { %v2972_v49 = vrot.slane %v2971_v37, 2  ;;  %v2985_v43 = vmax.f32 %v2983_v17, %v2984_v39  ;;  %v2992_v59 = vmax.f32 %v2990_v36, %v2991_v5  ;;  %v2998_v26 = vrot.slane %v2997_v12, 4  ;;  %v7430_v5 = vld [vmem:[#allocation4 + $0x1] ss:$0 sm:$0xff] }
  0xf0   : > { %v2966_v13 = vmax.f32 %v2964_v38, %v2965_v15  ;;  %v2979_v29 = vrot.slane %v2978_v8, 2  ;;  %v3005_v10 = vrot.slane %v3004_v33, 4  ;;  %v3012_v53 = vrot.slane %v3011_v45, 4  ;;  %10262 = vst [vmem:[#allocation13_spill] sm:$0xff] %v7430_v5  ;;  %v7433_v15 = vld [vmem:[%s6857_s24 + $0x80] sm:$0xff] }
  0xf1   : > { %v2973_v3 = vmax.f32 %v2971_v37, %v2972_v49  ;;  %v2986_v54 = vrot.slane %v2985_v43, 2  ;;  %v2993_v6 = vrot.slane %v2992_v59, 2  ;;  %v2999_v16 = vmax.f32 %v2997_v12, %v2998_v26  ;;  %v7442_v26 = vld [vmem:[%s6857_s24 + $0x88] sm:$0x3] }
  0xf2   : > { %v2967_v57 = vrot.slane %v2966_v13, 1  ;;  %v2980_v32 = vmax.f32 %v2978_v8, %v2979_v29  ;;  %v3006_v44 = vmax.f32 %v3004_v33, %v3005_v10  ;;  %v3013_v47 = vmax.f32 %v3011_v45, %v3012_v53 }
  0xf3   : > { %v2974_v2 = vrot.slane %v2973_v3, 1  ;;  %v2987_v58 = vmax.f32 %v2985_v43, %v2986_v54  ;;  %v2994_v18 = vmax.f32 %v2992_v59, %v2993_v6  ;;  %v3000_v7 = vrot.slane %v2999_v16, 2 }
  0xf4   : > { %v2968_v52 = vmax.f32 %v2966_v13, %v2967_v57  ;;  %v2981_v46 = vrot.slane %v2980_v32, 1  ;;  %v3007_v24 = vrot.slane %v3006_v44, 2  ;;  %v3014_v30 = vrot.slane %v3013_v47, 2 }
  0xf5   : > { %v2975_v1 = vmax.f32 %v2973_v3, %v2974_v2  ;;  %v2988_v20 = vrot.slane %v2987_v58, 1  ;;  %v2995_v9 = vrot.slane %v2994_v18, 1  ;;  %v3001_v23 = vmax.f32 %v2999_v16, %v3000_v7  ;;  %v7462_v2 = vld [vmem:[#allocation4 + $0x2] ss:$0 sm:$0xff] }
  0xf6   : > { %v2982_v55 = vmax.f32 %v2980_v32, %v2981_v46  ;;  %v3008_v50 = vmax.f32 %v3006_v44, %v3007_v24  ;;  %v3802_v22 = vmax.f32 %v7393_v61, %v2968_v52  ;;  %v3015_v37 = vmax.f32 %v3013_v47, %v3014_v30  ;;  %v6500_v52 = vld [vmem:[%s6857_s24 + $0x68] sm:$0xff]  ;;  %v7476_v47 = vld [vmem:[%s6857_s24 + $0x78] sm:$0xff] }
  0xf7   : > { %v2989_v19 = vmax.f32 %v2987_v58, %v2988_v20  ;;  %v2996_v38 = vmax.f32 %v2994_v18, %v2995_v9  ;;  %v3002_v42 = vrot.slane %v3001_v23, 1  ;;  %v3803_v17 = vmax.f32 %v7395_v51, %v2975_v1  ;;  %v6499_v58 = vld [vmem:[%s6857_s24 + $0x60] sm:$0xff]  ;;  %v7492_v30 = vld [vmem:[%s6857_s24 + $0x98] sm:$0xff] }
  0xf8   : > { %v3009_v36 = vrot.slane %v3008_v50, 1  ;;  %v3804_v39 = vmax.f32 %v7397_v21, %v2982_v55  ;;  %v520_v8 = vmul.f32 %v7433_v15, %v7430_v5  ;;  %v3016_v51 = vrot.slane %v3015_v37, 1  ;;  %v7484_v55 = vld [vmem:[#allocation4 + $0x3] ss:$0 sm:$0xff] }
  0xf9   : > { %v3003_v12 = vmax.f32 %v3001_v23, %v3002_v42  ;;  %v3805_v61 = vmax.f32 %v7401_v25, %v2989_v19  ;;  %v3806_v33 = vmax.f32 %v7403_v35, %v2996_v38  ;;  %v3952_v49 = vsel %vm3951_vm4, %v3803_v17, %v3802_v22 }
  0xfa   : > { %v3010_v43 = vmax.f32 %v3008_v50, %v3009_v36  ;;  %v3954_v59 = vsel %vm3953_vm5, %v3804_v39, %v3952_v49  ;;  %v521_v21 = vmul.f32 %v7442_v26, %v7430_v5  ;;  %v621_v10 = vrot.slane %v7347_v11, 1  ;;  %v7489_v50 = vld [vmem:[%s6857_s24 + $0x90] sm:$0xff]  ;;  %v7506_v49 = vld [vmem:[#allocation4 + $0x4] ss:$0 sm:$0xff] }
  0xfb   : > { %v3807_v13 = vmax.f32 %v7408_v41, %v3003_v12  ;;  %v3956_v29 = vsel %vm3955_vm6, %v3805_v61, %v3954_v59  ;;  %v622_v25 = vrot.slane %v7351_v28, 1  ;;  %v3017_v35 = vmax.f32 %v3015_v37, %v3016_v51 }
  0xfc   : > { %v3808_v45 = vmax.f32 %v7410_v27, %v3010_v43  ;;  %v3958_v3 = vsel %vm3957_vm7, %v3806_v33, %v3956_v29  ;;  %v624_v54 = vrot.slane %v7357_v63, 1  ;;  %v626_v41 = vrot.slane %v7361_v31, 1 }
  0xfd   : > { %v3960_v6 = vsel %vm3959_vm8, %v3807_v13, %v3958_v3  ;;  %v623_v16 = vsel %vm600_vm2, %v621_v10, %v622_v25  ;;  %v627_v57 = vrot.slane %v520_v8, 1  ;;  %v3809_v11 = vmax.f32 %v7415_v40, %v3017_v35  ;;  %v7502_v8 = vld [vmem:[%s6857_s24 + $0xa0] sm:$0x3] }
  0xfe   : > { %v3962_v28 = vsel %vm3961_vm9, %v3808_v45, %v3960_v6  ;;  %v625_v32 = vsel %vm600_vm2, %v622_v25, %v624_v54  ;;  %v629_v27 = vrot.slane %v521_v21, 1  ;;  %v721_v63 = vadd.f32 %v623_v16, %v7327_v14 }
  0xff   : > { %v628_v44 = vsel %vm600_vm2, %v626_v41, %v627_v57  ;;  %v722_v53 = vadd.f32 %v625_v32, %v7331_v60  ;;  %v765_v31 = vmul.f32 %v6499_v58, %v7462_v2  ;;  %v3964_v40 = vsel %vm3963_vm10, %v3809_v11, %v3962_v28  ;;  %v6501_v60 = vld [vmem:[%s6857_s24 + $0x70] sm:$0x3] }
 0x100   : > { %v630_v18 = vsel %vm600_vm2, %v627_v57, %v629_v27  ;;  %v723_v7 = vadd.f32 %v628_v44, %v7337_v62  ;;  %v766_v46 = vmul.f32 %v6500_v52, %v7462_v2  ;;  %4023 = vst.msk [vmem:[#allocation2 + $0x11] sm:$0xff] %vm3866_vm1, %v3964_v40  ;;  %v767_v24 = vmul.f32 %v6501_v60, %v7462_v2 }
 0x101   : > { %v724_v14 = vadd.f32 %v630_v18, %v7343_v4  ;;  %v768_v1 = vmul.f32 %v7476_v47, %v7462_v2  ;;  %v769_v20 = vmul.f32 %v7462_v2, %v7433_v15  ;;  %v770_v62 = vmul.f32 %v7462_v2, %v7442_v26 }
 0x102   : > { %v870_v9 = vrot.slane %v765_v31, 2  ;;  %v871_v23 = vrot.slane %v766_v46, 2  ;;  %v1010_v4 = vmul.f32 %v7484_v55, %v7476_v47  ;;  %v873_v22 = vrot.slane %v767_v24, 2 }
 0x103   : > { %v875_v19 = vrot.slane %v768_v1, 2  ;;  %v876_v38 = vrot.slane %v769_v20, 2  ;;  %v1011_v42 = vmul.f32 %v7484_v55, %v7433_v15  ;;  %v878_v36 = vrot.slane %v770_v62, 2 }
 0x104   : > { %v872_v17 = vsel %vm849_vm3, %v870_v9, %v871_v23  ;;  %v1012_v37 = vmul.f32 %v7484_v55, %v7489_v50  ;;  %v1013_v39 = vmul.f32 %v7484_v55, %v7492_v30  ;;  %v874_v12 = vsel %vm849_vm3, %v871_v23, %v873_v22  ;;  %v7538_v23 = vld [vmem:[#allocation4 + $0x5] ss:$0 sm:$0xff] }
 0x105   : > { %v877_v61 = vsel %vm849_vm3, %v875_v19, %v876_v38  ;;  %v970_v33 = vadd.f32 %v872_v17, %v721_v63  ;;  %v1086_v43 = vmul.f32 %v7506_v49, %v7476_v47  ;;  %v879_v51 = vsel %vm849_vm3, %v876_v38, %v878_v36 }
 0x106   : > { %v971_v59 = vadd.f32 %v874_v12, %v722_v53  ;;  %v972_v21 = vadd.f32 %v877_v61, %v723_v7  ;;  %v1087_v13 = vmul.f32 %v7506_v49, %v7433_v15  ;;  %v973_v29 = vadd.f32 %v879_v51, %v724_v14  ;;  %v7558_v12 = vld [vmem:[%s6857_s24 + $0xa8] sm:$0xff] }
 0x107   : > { %v1042_v10 = vadd.f32 %v1010_v4, %v970_v33  ;;  %v1088_v25 = vmul.f32 %v7506_v49, %v7442_v26  ;;  %v1089_v35 = vmul.f32 %v7506_v49, %v7489_v50  ;;  %v4033_v45 = vld [vmem:[#allocation2 + $0x10] sm:$0xff]  ;;  %v4034_v3 = vld [vmem:[#allocation2 + $0x18] sm:$0x3]  ;;  %v1090_v16 = vmul.f32 %v7506_v49, %v7492_v30 }
 0x108   : > { %v1043_v54 = vadd.f32 %v1011_v42, %v971_v59  ;;  %v1044_v6 = vadd.f32 %v1012_v37, %v972_v21  ;;  %v1091_v41 = vmul.f32 %v7506_v49, %v7502_v8  ;;  %v6385_v57 = vpack.i.bf16 %v4033_v45, %v7309_v48 }
 0x109   : > { %v4094_v11 = vrot.slane %v4033_v45, 2  ;;  %v4095_v28 = vrot.slane %v4034_v3, 2  ;;  %v4070_v32 = vrot.slane %v4033_v45, 1  ;;  %v4071_v27 = vrot.slane %v4034_v3, 1 }
 0x10a   : > { %v1045_v44 = vadd.f32 %v1013_v39, %v973_v29  ;;  %v1190_v63 = vrot.slane %v1086_v43, 1  ;;  %v1191_v53 = vrot.slane %v1087_v13, 1  ;;  %6386 = vrot.lane.b32.xlu1 %v6385_v57, %s6647_s29  ;;  %v1193_v31 = vrot.slane %v1088_v25, 1  ;;  %v7571_v25 = vld [vmem:[#allocation4 + $0x7] ss:$0 sm:$0xff] }
 0x10b   : > { %v7524_v58 = vsel %vm849_vm3, %v4094_v11, %v4095_v28  ;;  %v1195_v40 = vrot.slane %v1089_v35, 1  ;;  %v1196_v18 = vrot.slane %v1090_v16, 1  ;;  %v7529_v52 = vsel %vm600_vm2, %v4070_v32, %v4071_v27 }
 0x10c   : > { %v6380_v7 = vpack.i.bf16 %v7319_v56, %v7524_v58  ;;  %10263 = vst [vmem:[#allocation23_spill] sm:$0xff] %v7529_v52  ;;  %v1192_v46 = vsel %vm600_vm2, %v1190_v63, %v1191_v53  ;;  %v1198_v14 = vrot.slane %v1091_v41, 1  ;;  %v6390_v60 = vpack.i.bf16 %v7529_v52, %v7323_v0  ;;  %v7580_v41 = vld [vmem:[%s6857_s24 + $0xb8] sm:$0x3] }
 0x10d   : > { %v1194_v24 = vsel %vm600_vm2, %v1191_v53, %v1193_v31  ;;  %v1197_v1 = vsel %vm600_vm2, %v1195_v40, %v1196_v18  ;;  %v1290_v20 = vadd.f32 %v1192_v46, %v1042_v10  ;;  %v1334_v4 = vmul.f32 %v7538_v23, %v7476_v47  ;;  %v7553_v47 = vld [vmem:[#allocation4 + $0x6] ss:$0 sm:$0xff] }
 0x10e   : > { %6381 = vrot.lane.b32.xlu0 %v6380_v7, %s6648_s10  ;;  %v1199_v56 = vsel %vm600_vm2, %v1196_v18, %v1198_v14  ;;  %v1291_v62 = vadd.f32 %v1194_v24, %v1043_v54  ;;  %v1292_v9 = vadd.f32 %v1197_v1, %v1044_v6  ;;  %6391 = vrot.lane.b32.xlu1 %v6390_v60, %s6648_s10  ;;  %vm4291_vm11 = vcmask 523264  }
 0x10f   : > { %v1293_v22 = vadd.f32 %v1199_v56, %v1045_v44  ;;  %v1335_v19 = vmul.f32 %v7538_v23, %v7433_v15  ;;  %v1336_v38 = vmul.f32 %v7538_v23, %v7442_v26  ;;  %v1337_v42 = vmul.f32 %v7538_v23, %v7489_v50  ;;  %v7561_v15 = vld [vmem:[%s6857_s24 + $0xb0] sm:$0xff] }
 0x110   : > { %v1338_v17 = vmul.f32 %v7538_v23, %v7492_v30  ;;  %v1339_v36 = vmul.f32 %v7538_v23, %v7502_v8  ;;  %v1438_v37 = vrot.slane %v1334_v4, 2  ;;  %v1578_v39 = vmul.f32 %v7553_v47, %v7489_v50 }
 0x111   : > { %v1439_v26 = vrot.slane %v1335_v19, 2  ;;  %v1441_v61 = vrot.slane %v1336_v38, 2  ;;  %v1443_v33 = vrot.slane %v1337_v42, 2  ;;  %v1579_v43 = vmul.f32 %v7553_v47, %v7492_v30 }
 0x112   : > { %v1444_v51 = vrot.slane %v1338_v17, 2  ;;  %v1446_v59 = vrot.slane %v1339_v36, 2  ;;  %v1580_v21 = vmul.f32 %v7553_v47, %v7558_v12  ;;  %v1581_v13 = vmul.f32 %v7553_v47, %v7561_v15 }
 0x113   : > { %v1440_v29 = vsel %vm849_vm3, %v1438_v37, %v1439_v26  ;;  %v1442_v10 = vsel %vm849_vm3, %v1439_v26, %v1441_v61  ;;  %v1654_v35 = vmul.f32 %v7571_v25, %v7489_v50  ;;  %v1655_v45 = vmul.f32 %v7571_v25, %v7492_v30 }
 0x114   : > { %v1445_v3 = vsel %vm849_vm3, %v1443_v33, %v1444_v51  ;;  %v1447_v54 = vsel %vm849_vm3, %v1444_v51, %v1446_v59  ;;  %v1538_v6 = vadd.f32 %v1440_v29, %v1290_v20  ;;  %v1539_v16 = vadd.f32 %v1442_v10, %v1291_v62  ;;  %v7591_v20 = vld [vmem:[#allocation4 + $0x8] ss:$0 sm:$0xff]  ;;  %v7608_v59 = vld [vmem:[#allocation4] ss:$0 sm:$0xff] }
 0x115   : > { %v1540_v57 = vadd.f32 %v1445_v3, %v1292_v9  ;;  %v1541_v11 = vadd.f32 %v1447_v54, %v1293_v22  ;;  %v1656_v28 = vmul.f32 %v7571_v25, %v7502_v8  ;;  %v1657_v32 = vmul.f32 %v7571_v25, %v7558_v12  ;;  %10264 = vst [vmem:[#allocation24_spill] sm:$0xff] %v7591_v20 }
 0x116   : > { %v1610_v27 = vadd.f32 %v1578_v39, %v1538_v6  ;;  %v1611_v44 = vadd.f32 %v1579_v43, %v1539_v16  ;;  %v1658_v63 = vmul.f32 %v7571_v25, %v7561_v15  ;;  %v1659_v53 = vmul.f32 %v7571_v25, %v7580_v41  ;;  %10265 = vst [vmem:[#allocation26_spill] sm:$0xff] %v7608_v59 }
 0x117   : > { %v1612_v31 = vadd.f32 %v1580_v21, %v1540_v57  ;;  %v1613_v40 = vadd.f32 %v1581_v13, %v1541_v11  ;;  %v1758_v18 = vrot.slane %v1654_v35, 1  ;;  %v1759_v7 = vrot.slane %v1655_v45, 1 }
 0x118   : > { %v1761_v46 = vrot.slane %v1656_v28, 1  ;;  %v1763_v14 = vrot.slane %v1657_v32, 1  ;;  %v1764_v60 = vrot.slane %v1658_v63, 1  ;;  %v1766_v24 = vrot.slane %v1659_v53, 1  ;;  %v7637_v63 = vld [vmem:[%s10139_s2] ss:$0 sm:$0xff] }
 0x119   : > { %v1760_v1 = vsel %vm600_vm2, %v1758_v18, %v1759_v7  ;;  %v1902_v56 = vmul.f32 %v7591_v20, %v7489_v50  ;;  %v1903_v62 = vmul.f32 %v7591_v20, %v7492_v30  ;;  %v1904_v9 = vmul.f32 %v7591_v20, %v7502_v8  ;;  %10266 = vst [vmem:[#allocation25_spill] sm:$0xff] %v7637_v63 }
 0x11a   : > { %v1762_v4 = vsel %vm600_vm2, %v1759_v7, %v1761_v46  ;;  %v1765_v22 = vsel %vm600_vm2, %v1763_v14, %v1764_v60  ;;  %v1767_v19 = vsel %vm600_vm2, %v1764_v60, %v1766_v24  ;;  %v1858_v38 = vadd.f32 %v1760_v1, %v1610_v27 }
 0x11b   : > { %v1859_v42 = vadd.f32 %v1762_v4, %v1611_v44  ;;  %v1860_v17 = vadd.f32 %v1765_v22, %v1612_v31  ;;  %v1861_v36 = vadd.f32 %v1767_v19, %v1613_v40  ;;  %v1905_v37 = vmul.f32 %v7591_v20, %v7558_v12 }
 0x11c   : > { %v1906_v39 = vmul.f32 %v7591_v20, %v7561_v15  ;;  %v1907_v26 = vmul.f32 %v7591_v20, %v7580_v41  ;;  %v2006_v61 = vrot.slane %v1902_v56, 2  ;;  %v2007_v33 = vrot.slane %v1903_v62, 2 }
 0x11d   : > { %v2009_v43 = vrot.slane %v1904_v9, 2  ;;  %v2011_v51 = vrot.slane %v1905_v37, 2  ;;  %v7612_v21 = vmul.f32 %v7608_v59, %v7489_v50  ;;  %v7616_v13 = vmul.f32 %v7608_v59, %v7492_v30 }
 0x11e   : > { %v2008_v29 = vsel %vm849_vm3, %v2006_v61, %v2007_v33  ;;  %v2012_v10 = vrot.slane %v1906_v39, 2  ;;  %v2014_v35 = vrot.slane %v1907_v26, 2  ;;  %v7621_v45 = vmul.f32 %v7608_v59, %v7558_v12 }
 0x11f   : > { %v2010_v3 = vsel %vm849_vm3, %v2007_v33, %v2009_v43  ;;  %v2106_v54 = vadd.f32 %v2008_v29, %v1858_v38  ;;  %v7626_v6 = vmul.f32 %v7608_v59, %v7561_v15  ;;  %v522_v16 = vmul.f32 %v7430_v5, %v7489_v50 }
 0x120   : > { %v2013_v57 = vsel %vm849_vm3, %v2011_v51, %v2012_v10  ;;  %v2015_v11 = vsel %vm849_vm3, %v2012_v10, %v2014_v35  ;;  %v2107_v28 = vadd.f32 %v2010_v3, %v1859_v42  ;;  %v523_v32 = vmul.f32 %v7430_v5, %v7492_v30 }
 0x121   : > { %v2108_v27 = vadd.f32 %v2013_v57, %v1860_v17  ;;  %v2109_v44 = vadd.f32 %v2015_v11, %v1861_v36  ;;  %v2145_v53 = vadd.f32 %v7637_v63, %v2106_v54  ;;  %v524_v31 = vmul.f32 %v7430_v5, %v7502_v8 }
 0x122   : > { %v2146_v40 = vadd.f32 %v7637_v63, %v2107_v28  ;;  %v7645_v18 = vmul.f32 %v7430_v5, %v7558_v12  ;;  %v7649_v7 = vmul.f32 %v7430_v5, %v7561_v15  ;;  %v7653_v46 = vmul.f32 %v7430_v5, %v7580_v41 }
 0x123   : > { %v2147_v14 = vadd.f32 %v7637_v63, %v2108_v27  ;;  %v2148_v60 = vadd.f32 %v7637_v63, %v2109_v44  ;;  %v2177_v24 = vmax.f32 %v2145_v53, 0.0  ;;  %v631_v1 = vrot.slane %v522_v16, 1 }
 0x124   : > { %v2178_v56 = vmax.f32 %v2146_v40, 0.0  ;;  %v632_v62 = vrot.slane %v523_v32, 1  ;;  %v634_v9 = vrot.slane %v524_v31, 1  ;;  %vm4300_vm12 = vcmask 785408  }
 0x125   : > { %v2179_v22 = vmax.f32 %v2147_v14, 0.0  ;;  %v2180_v19 = vmax.f32 %v2148_v60, 0.0  ;;  %v2369_v38 = vcombine.high %v2177_v24, %v2177_v24  ;;  %v2376_v42 = vrot.slane %v2177_v24, %v10260_v34 }
 0x126   : > { %v2386_v17 = vcombine.high %v2178_v56, %v2178_v56  ;;  %v2393_v36 = vrot.slane %v2178_v56, %v10260_v34  ;;  %v7661_v37 = vsel %vm600_vm2, %v631_v1, %v632_v62  ;;  %v7664_v39 = vsel %vm600_vm2, %v632_v62, %v634_v9 }
 0x127   : > { %v2383_v26 = vrot.slane %v2369_v38, %v10260_v34  ;;  %v2384_v61 = vcombine.high %v2376_v42, %v2376_v42  ;;  %v2403_v33 = vcombine.high %v2179_v22, %v2179_v22  ;;  %v7668_v43 = vrot.slane %v2179_v22, %v10260_v34 }
 0x128   : > { %v2400_v51 = vrot.slane %v2386_v17, %v10260_v34  ;;  %v2401_v29 = vcombine.high %v2393_v36, %v2393_v36  ;;  %v2420_v10 = vcombine.high %v2180_v19, %v2180_v19  ;;  %v7672_v35 = vrot.slane %v2180_v19, %v10260_v34 }
 0x129   : > { %v2385_v3 = vcombine.high %v2383_v26, %v2383_v26  ;;  %v7675_v54 = vrot.slane %v2403_v33, %v10260_v34  ;;  %v2418_v16 = vcombine.high %v7668_v43, %v7668_v43  ;;  %v3130_v57 = vsel %vm2905_vm0, %v2376_v42, -inf }
 0x12a   : > { %v2402_v11 = vcombine.high %v2400_v51, %v2400_v51  ;;  %v7681_v28 = vrot.slane %v2420_v10, %v10260_v34  ;;  %v3131_v27 = vrot.slane %v3130_v57, 4  ;;  %v3137_v53 = vsel %vm2905_vm0, %v2384_v61, -inf }
 0x12b   : > { %v2419_v44 = vcombine.high %v7675_v54, %v7675_v54  ;;  %v3144_v31 = vsel %vm2905_vm0, %v2383_v26, -inf  ;;  %v3151_v40 = vsel %vm2905_vm0, %v2385_v3, -inf  ;;  %v3138_v24 = vrot.slane %v3137_v53, 4 }
 0x12c   : > { %v3132_v60 = vmax.f32 %v3130_v57, %v3131_v27  ;;  %v3145_v1 = vrot.slane %v3144_v31, 4  ;;  %v3152_v56 = vrot.slane %v3151_v40, 4  ;;  %v3158_v62 = vsel %vm2905_vm0, %v2393_v36, -inf }
 0x12d   : > { %v3165_v9 = vsel %vm2905_vm0, %v2401_v29, -inf  ;;  %v3172_v22 = vsel %vm2905_vm0, %v2400_v51, -inf  ;;  %v3139_v38 = vmax.f32 %v3137_v53, %v3138_v24  ;;  %v3159_v17 = vrot.slane %v3158_v62, 4 }
 0x12e   : > { %v3133_v19 = vrot.slane %v3132_v60, 2  ;;  %v3146_v42 = vmax.f32 %v3144_v31, %v3145_v1  ;;  %v3153_v26 = vmax.f32 %v3151_v40, %v3152_v56  ;;  %v3166_v61 = vrot.slane %v3165_v9, 4 }
 0x12f   : > { %v3173_v33 = vrot.slane %v3172_v22, 4  ;;  %v3179_v10 = vsel %vm2905_vm0, %v2402_v11, -inf  ;;  %v3140_v57 = vrot.slane %v3139_v38, 2  ;;  %v3160_v4 = vmax.f32 %v3158_v62, %v3159_v17 }
 0x130   : > { %v3134_v3 = vmax.f32 %v3132_v60, %v3133_v19  ;;  %v3147_v27 = vrot.slane %v3146_v42, 2  ;;  %v3154_v14 = vrot.slane %v3153_v26, 2  ;;  %v3167_v32 = vmax.f32 %v3165_v9, %v3166_v61 }
 0x131   : > { %v3174_v36 = vmax.f32 %v3172_v22, %v3173_v33  ;;  %v3180_v52 = vrot.slane %v3179_v10, 4  ;;  %v3141_v0 = vmax.f32 %v3139_v38, %v3140_v57  ;;  %v3161_v34 = vrot.slane %v3160_v4, 2 }
 0x132   : > { %v3135_v29 = vrot.slane %v3134_v3, 1  ;;  %v3148_v51 = vmax.f32 %v3146_v42, %v3147_v27  ;;  %v3155_v53 = vmax.f32 %v3153_v26, %v3154_v14  ;;  %v3168_v31 = vrot.slane %v3167_v32, 2 }
 0x133   : > { %v3175_v24 = vrot.slane %v3174_v36, 2  ;;  %v3181_v40 = vmax.f32 %v3179_v10, %v3180_v52  ;;  %v3142_v56 = vrot.slane %v3141_v0, 1  ;;  %v3162_v60 = vmax.f32 %v3160_v4, %v3161_v34 }
 0x134   : > { %v7696_v1 = vmax.f32 %v3134_v3, %v3135_v29  ;;  %v3149_v11 = vrot.slane %v3148_v51, 1  ;;  %v3156_v19 = vrot.slane %v3155_v53, 1  ;;  %v3169_v63 = vmax.f32 %v3167_v32, %v3168_v31 }
 0x135   : > { %v3176_v62 = vmax.f32 %v3174_v36, %v3175_v24  ;;  %v3182_v17 = vrot.slane %v3181_v40, 2  ;;  %v7698_v9 = vmax.f32 %v3141_v0, %v3142_v56  ;;  %v3163_v38 = vrot.slane %v3162_v60, 1 }
 0x136   : > { %v7700_v22 = vmax.f32 %v3148_v51, %v3149_v11  ;;  %v3186_v14 = vsel %vm2905_vm0, %v7668_v43, -inf  ;;  %v7704_v42 = vmax.f32 %v3155_v53, %v3156_v19  ;;  %v3170_v52 = vrot.slane %v3169_v63, 1 }
 0x137   : > { %v3177_v26 = vrot.slane %v3176_v62, 1  ;;  %v3183_v61 = vmax.f32 %v3181_v40, %v3182_v17  ;;  %v7706_v33 = vmax.f32 %v3162_v60, %v3163_v38  ;;  %v3187_v34 = vrot.slane %v3186_v14, 4 }
 0x138   : > { %v3193_v4 = vsel %vm2905_vm0, %v2418_v16, -inf  ;;  %v3200_v0 = vsel %vm2905_vm0, %v7675_v54, -inf  ;;  %v7711_v32 = vmax.f32 %v3169_v63, %v3170_v52  ;;  %v3207_v36 = vsel %vm2905_vm0, %v2419_v44, -inf }
 0x139   : > { %v7713_v10 = vmax.f32 %v3176_v62, %v3177_v26  ;;  %v3184_v3 = vrot.slane %v3183_v61, 1  ;;  %v3194_v57 = vrot.slane %v3193_v4, 4  ;;  %v3188_v43 = vmax.f32 %v3186_v14, %v3187_v34 }
 0x13a   : > { %v3201_v27 = vrot.slane %v3200_v0, 4  ;;  %v3214_v29 = vsel %vm2905_vm0, %v7672_v35, -inf  ;;  %v3208_v16 = vrot.slane %v3207_v36, 4  ;;  %v10267_v63 = vcombine.high %v7672_v35, %v7672_v35 }
 0x13b   : > { %v7718_v51 = vmax.f32 %v3183_v61, %v3184_v3  ;;  %v3195_v53 = vmax.f32 %v3193_v4, %v3194_v57  ;;  %v3215_v31 = vrot.slane %v3214_v29, 4  ;;  %v3189_v24 = vrot.slane %v3188_v43, 2 }
 0x13c   : > { %v3202_v54 = vmax.f32 %v3200_v0, %v3201_v27  ;;  %v3221_v40 = vsel %vm2905_vm0, %v10267_v63, -inf  ;;  %v3228_v56 = vsel %vm2905_vm0, %v7681_v28, -inf  ;;  %v3209_v44 = vmax.f32 %v3207_v36, %v3208_v16 }
 0x13d   : > { %v3196_v11 = vrot.slane %v3195_v53, 2  ;;  %v3216_v60 = vmax.f32 %v3214_v29, %v3215_v31  ;;  %v3222_v19 = vrot.slane %v3221_v40, 4  ;;  %v3190_v62 = vmax.f32 %v3188_v43, %v3189_v24 }
 0x13e   : > { %v3203_v17 = vrot.slane %v3202_v54, 2  ;;  %v3229_v38 = vrot.slane %v3228_v56, 4  ;;  %v10268_v14 = vcombine.high %v7681_v28, %v7681_v28  ;;  %v3210_v61 = vrot.slane %v3209_v44, 2 }
 0x13f   : > { %v3197_v26 = vmax.f32 %v3195_v53, %v3196_v11  ;;  %v3217_v35 = vrot.slane %v3216_v60, 2  ;;  %v3223_v34 = vmax.f32 %v3221_v40, %v3222_v19  ;;  %v3191_v4 = vrot.slane %v3190_v62, 1 }
 0x140   : > { %v3235_v52 = vsel %vm2905_vm0, %v10268_v14, -inf  ;;  %v3204_v0 = vmax.f32 %v3202_v54, %v3203_v17  ;;  %v3230_v3 = vmax.f32 %v3228_v56, %v3229_v38  ;;  %v3211_v36 = vmax.f32 %v3209_v44, %v3210_v61 }
 0x141   : > { %v3236_v57 = vrot.slane %v3235_v52, 4  ;;  %v3198_v27 = vrot.slane %v3197_v26, 1  ;;  %v3218_v29 = vmax.f32 %v3216_v60, %v3217_v35  ;;  %v3224_v16 = vrot.slane %v3223_v34, 2 }
 0x142   : > { %v3192_v43 = vmax.f32 %v3190_v62, %v3191_v4  ;;  %v3205_v31 = vrot.slane %v3204_v0, 1  ;;  %v3231_v24 = vrot.slane %v3230_v3, 2  ;;  %v3212_v28 = vrot.slane %v3211_v36, 1 }
 0x143   : > { %v3237_v63 = vmax.f32 %v3235_v52, %v3236_v57  ;;  %v3199_v5 = vmax.f32 %v3197_v26, %v3198_v27  ;;  %v3219_v59 = vrot.slane %v3218_v29, 1  ;;  %v3225_v14 = vmax.f32 %v3223_v34, %v3224_v16 }
 0x144   : > { %v3206_v53 = vmax.f32 %v3204_v0, %v3205_v31  ;;  %v3232_v11 = vmax.f32 %v3230_v3, %v3231_v24  ;;  %v3818_v40 = vmax.f32 %v7696_v1, %v3192_v43  ;;  %v3213_v54 = vmax.f32 %v3211_v36, %v3212_v28 }
 0x145   : > { %v3238_v20 = vrot.slane %v3237_v63, 2  ;;  %v3220_v56 = vmax.f32 %v3218_v29, %v3219_v59  ;;  %v3226_v19 = vrot.slane %v3225_v14, 1  ;;  %v3819_v44 = vmax.f32 %v7698_v9, %v3199_v5 }
 0x146   : > { %v3233_v60 = vrot.slane %v3232_v11, 1  ;;  %v3820_v62 = vmax.f32 %v7700_v22, %v3206_v53  ;;  %v637_v38 = vrot.slane %v7649_v7, 1  ;;  %v3821_v26 = vmax.f32 %v7704_v42, %v3213_v54 }
 0x147   : > { %v3239_v17 = vmax.f32 %v3237_v63, %v3238_v20  ;;  %v3227_v52 = vmax.f32 %v3225_v14, %v3226_v19  ;;  %v3822_v61 = vmax.f32 %v7706_v33, %v3220_v56  ;;  %v3972_v35 = vsel %vm3951_vm4, %v3819_v44, %v3818_v40  ;;  %v7789_v56 = vld [vmem:[%s6857_s24 + $0xd0] sm:$0x3] }
 0x148   : > { %v3234_v34 = vmax.f32 %v3232_v11, %v3233_v60  ;;  %v3973_v59 = vsel %vm3953_vm5, %v3820_v62, %v3972_v35  ;;  %v10269_v4 = vrot.slane %v7645_v18, 1  ;;  %v639_v9 = vrot.slane %v7653_v46, 1 }
 0x149   : > { %v3240_v1 = vrot.slane %v3239_v17, 1  ;;  %v3823_v20 = vmax.f32 %v7711_v32, %v3227_v52  ;;  %v3974_v7 = vsel %vm3955_vm6, %v3821_v26, %v3973_v59  ;;  %v725_v22 = vadd.f32 %v7661_v37, %v7612_v21 }
 0x14a   : > { %v638_v5 = vsel %vm600_vm2, %v10269_v4, %v637_v38  ;;  %v3824_v33 = vmax.f32 %v7713_v10, %v3234_v34  ;;  %v3975_v0 = vsel %vm3957_vm7, %v3822_v61, %v3974_v7  ;;  %v726_v18 = vadd.f32 %v7664_v39, %v7616_v13  ;;  %v7761_v13 = vld [vmem:[%s6857_s24 + $0xc0] sm:$0xff] }
 0x14b   : > { %v3241_v42 = vmax.f32 %v3239_v17, %v3240_v1  ;;  %v3976_v3 = vsel %vm3959_vm8, %v3823_v20, %v3975_v0  ;;  %v640_v32 = vsel %vm600_vm2, %v637_v38, %v639_v9  ;;  %v727_v57 = vadd.f32 %v638_v5, %v7621_v45 }
 0x14c   : > { %v771_v46 = vmul.f32 %v7462_v2, %v7489_v50  ;;  %v3977_v37 = vsel %vm3961_vm9, %v3824_v33, %v3976_v3  ;;  %v728_v10 = vadd.f32 %v640_v32, %v7626_v6  ;;  %v772_v27 = vmul.f32 %v7462_v2, %v7492_v30 }
 0x14d   : > { %v3825_v21 = vmax.f32 %v7718_v51, %v3241_v42  ;;  %v773_v39 = vmul.f32 %v7462_v2, %v7502_v8  ;;  %v774_v45 = vmul.f32 %v7462_v2, %v7558_v12  ;;  %v775_v50 = vmul.f32 %v7462_v2, %v7561_v15  ;;  %v7776_v8 = vld [vmem:[%s6857_s24 + $0xc8] sm:$0xff] }
 0x14e   : > { %v776_v51 = vmul.f32 %v7462_v2, %v7580_v41  ;;  %v880_v6 = vrot.slane %v771_v46, 2  ;;  %v881_v29 = vrot.slane %v772_v27, 2  ;;  %v1014_v30 = vmul.f32 %v7484_v55, %v7558_v12 }
 0x14f   : > { %v3978_v36 = vsel %vm3963_vm10, %v3825_v21, %v3977_v37  ;;  %v883_v16 = vrot.slane %v773_v39, 2  ;;  %v885_v43 = vrot.slane %v774_v45, 2  ;;  %v886_v31 = vrot.slane %v775_v50, 2 }
 0x150   : > { %4025 = vst.msk [vmem:[#allocation2 + $0x31] sm:$0xff] %vm3866_vm1, %v3978_v36  ;;  %v888_v24 = vrot.slane %v776_v51, 2  ;;  %v882_v63 = vsel %vm849_vm3, %v880_v6, %v881_v29  ;;  %v1015_v2 = vmul.f32 %v7484_v55, %v7561_v15  ;;  %v1016_v28 = vmul.f32 %v7484_v55, %v7761_v13 }
 0x151   : > { %v1017_v14 = vmul.f32 %v7484_v55, %v7776_v8  ;;  %v884_v53 = vsel %vm849_vm3, %v881_v29, %v883_v16  ;;  %v887_v11 = vsel %vm849_vm3, %v885_v43, %v886_v31  ;;  %v974_v54 = vadd.f32 %v882_v63, %v725_v22 }
 0x152   : > { %v889_v40 = vsel %vm849_vm3, %v886_v31, %v888_v24  ;;  %v975_v19 = vadd.f32 %v884_v53, %v726_v18  ;;  %v976_v44 = vadd.f32 %v887_v11, %v727_v57  ;;  %v1092_v17 = vmul.f32 %v7506_v49, %v7558_v12  ;;  %v7838_v31 = vld [vmem:[%s6857_s24 + $0xd8] sm:$0xff] }
 0x153   : > { %v977_v60 = vadd.f32 %v889_v40, %v728_v10  ;;  %v1046_v62 = vadd.f32 %v1014_v30, %v974_v54  ;;  %v1093_v38 = vmul.f32 %v7506_v49, %v7561_v15  ;;  %v1094_v55 = vmul.f32 %v7506_v49, %v7580_v41  ;;  %v6511_v10 = vld [vmem:[#allocation2 + $0x20] sm:$0xff] }
 0x154   : > { %v1095_v52 = vmul.f32 %v7506_v49, %v7761_v13  ;;  %v1047_v26 = vadd.f32 %v1015_v2, %v975_v19  ;;  %v1048_v61 = vadd.f32 %v1016_v28, %v976_v44  ;;  %v1096_v34 = vmul.f32 %v7506_v49, %v7776_v8 }
 0x155   : > { %v1049_v35 = vadd.f32 %v1017_v14, %v977_v60  ;;  %v1097_v1 = vmul.f32 %v7506_v49, %v7789_v56  ;;  %v1200_v59 = vrot.slane %v1092_v17, 1  ;;  %v1201_v4 = vrot.slane %v1093_v38, 1  ;;  %v7843_v14 = vld [vmem:[%s6857_s24 + $0xe0] sm:$0xff] }
 0x156   : > { %v1203_v5 = vrot.slane %v1094_v55, 1  ;;  %v1205_v9 = vrot.slane %v1095_v52, 1  ;;  %v1206_v22 = vrot.slane %v1096_v34, 1  ;;  %v1340_v42 = vmul.f32 %v7538_v23, %v7558_v12  ;;  %v7862_v34 = vld [vmem:[%s6857_s24 + $0xe8] sm:$0x3] }
 0x157   : > { %v7803_v20 = vld [vmem:[#allocation2 + $0x30] sm:$0xff]  ;;  %v4038_v7 = vld [vmem:[#allocation2 + $0x38] sm:$0x3]  ;;  %v1341_v33 = vmul.f32 %v7538_v23, %v7561_v15  ;;  %v1202_v57 = vsel %vm600_vm2, %v1200_v59, %v1201_v4  ;;  %v1208_v15 = vrot.slane %v1097_v1, 1  ;;  %v1342_v50 = vmul.f32 %v7538_v23, %v7580_v41 }
 0x158   : > { %v6395_v0 = vpack.i.bf16 %v7524_v58, %v7803_v20  ;;  %v4076_v18 = vrot.slane %v7803_v20, 1  ;;  %v4077_v49 = vrot.slane %v4038_v7, 1  ;;  %v4100_v3 = vrot.slane %v7803_v20, 2 }
 0x159   : > { %v4101_v32 = vrot.slane %v4038_v7, 2  ;;  %v1204_v46 = vsel %vm600_vm2, %v1201_v4, %v1203_v5  ;;  %v1207_v21 = vsel %vm600_vm2, %v1205_v9, %v1206_v22  ;;  %v1294_v37 = vadd.f32 %v1202_v57, %v1046_v62 }
 0x15a   : > { %6396 = vrot.lane.b32.xlu0 %v6395_v0, %s6646_s28  ;;  %v7818_v12 = vsel %vm600_vm2, %v4076_v18, %v4077_v49  ;;  %v1295_v58 = vadd.f32 %v1204_v46, %v1047_v26  ;;  %v1296_v45 = vadd.f32 %v1207_v21, %v1048_v61  ;;  %v1209_v36 = vsel %vm600_vm2, %v1206_v22, %v1208_v15  ;;  %v10272_v18 = vld [vmem:[#allocation24_spill] sm:$0xff] }
 0x15b   : > { %10270 = vst [vmem:[#allocation17_spill] sm:$0xff] %v7818_v12  ;;  %v6400_v27 = vpack.i.bf16 %v6511_v10, %v7818_v12  ;;  %v7822_v39 = vsel %vm849_vm3, %v4100_v3, %v4101_v32  ;;  %v1343_v6 = vmul.f32 %v7538_v23, %v7761_v13  ;;  %v1344_v29 = vmul.f32 %v7538_v23, %v7776_v8 }
 0x15c   : > { %10271 = vst [vmem:[#allocation14_spill] sm:$0xff] %v7822_v39  ;;  %v6405_v51 = vpack.i.bf16 %v7309_v48, %v7822_v39  ;;  %v1297_v30 = vadd.f32 %v1209_v36, %v1049_v35  ;;  %v1345_v16 = vmul.f32 %v7538_v23, %v7789_v56  ;;  %v1448_v43 = vrot.slane %v1340_v42, 2 }
 0x15d   : > { %6401 = vrot.lane.b32.xlu1 %v6400_v27, %s6647_s29  ;;  %v1449_v41 = vrot.slane %v1341_v33, 2  ;;  %v1451_v24 = vrot.slane %v1342_v50, 2  ;;  %v1453_v63 = vrot.slane %v1343_v6, 2  ;;  %v1454_v2 = vrot.slane %v1344_v29, 2 }
 0x15e   : > { %6406 = vrot.lane.b32.xlu0 %v6405_v51, %s6648_s10  ;;  %v1582_v28 = vmul.f32 %v7553_v47, %v7761_v13  ;;  %v1456_v11 = vrot.slane %v1345_v16, 2  ;;  %v1583_v23 = vmul.f32 %v7553_v47, %v7776_v8  ;;  %v1584_v40 = vmul.f32 %v7553_v47, %v7838_v31 }
 0x15f   : > { %v1450_v53 = vsel %vm849_vm3, %v1448_v43, %v1449_v41  ;;  %v1452_v54 = vsel %vm849_vm3, %v1449_v41, %v1451_v24  ;;  %v1455_v19 = vsel %vm849_vm3, %v1453_v63, %v1454_v2  ;;  %v1585_v60 = vmul.f32 %v7553_v47, %v7843_v14  ;;  %v10273_v43 = vld [vmem:[#allocation26_spill] sm:$0xff] }
 0x160   : > { %v1542_v44 = vadd.f32 %v1450_v53, %v1294_v37  ;;  %v1457_v17 = vsel %vm849_vm3, %v1454_v2, %v1456_v11  ;;  %v1543_v62 = vadd.f32 %v1452_v54, %v1295_v58  ;;  %v1544_v38 = vadd.f32 %v1455_v19, %v1296_v45 }
 0x161   : > { %v1660_v55 = vmul.f32 %v7571_v25, %v7761_v13  ;;  %v1545_v52 = vadd.f32 %v1457_v17, %v1297_v30  ;;  %v1661_v61 = vmul.f32 %v7571_v25, %v7776_v8  ;;  %v1662_v35 = vmul.f32 %v7571_v25, %v7789_v56 }
 0x162   : > { %v1614_v26 = vadd.f32 %v1582_v28, %v1542_v44  ;;  %v1615_v1 = vadd.f32 %v1583_v23, %v1543_v62  ;;  %v1616_v59 = vadd.f32 %v1584_v40, %v1544_v38  ;;  %v1663_v47 = vmul.f32 %v7571_v25, %v7838_v31  ;;  %v10275_v38 = vld [vmem:[#allocation25_spill] sm:$0xff] }
 0x163   : > { %v1664_v4 = vmul.f32 %v7571_v25, %v7843_v14  ;;  %v1617_v5 = vadd.f32 %v1585_v60, %v1545_v52  ;;  %v1665_v7 = vmul.f32 %v7571_v25, %v7862_v34  ;;  %v1768_v9 = vrot.slane %v1660_v55, 1  ;;  %v10274_v60 = vld [vmem:[#allocation13_spill] sm:$0xff] }
 0x164   : > { %v1769_v22 = vrot.slane %v1661_v61, 1  ;;  %v1771_v42 = vrot.slane %v1662_v35, 1  ;;  %v1773_v33 = vrot.slane %v1663_v47, 1  ;;  %v1908_v49 = vmul.f32 %v10272_v18, %v7761_v13 }
 0x165   : > { %v1774_v0 = vrot.slane %v1664_v4, 1  ;;  %v1776_v32 = vrot.slane %v1665_v7, 1  ;;  %v1909_v57 = vmul.f32 %v10272_v18, %v7776_v8  ;;  %v1910_v46 = vmul.f32 %v10272_v18, %v7789_v56 }
 0x166   : > { %v1770_v3 = vsel %vm600_vm2, %v1768_v9, %v1769_v22  ;;  %v1772_v21 = vsel %vm600_vm2, %v1769_v22, %v1771_v42  ;;  %v1911_v37 = vmul.f32 %v10272_v18, %v7838_v31  ;;  %v1912_v45 = vmul.f32 %v10272_v18, %v7843_v14 }
 0x167   : > { %v1775_v25 = vsel %vm600_vm2, %v1773_v33, %v1774_v0  ;;  %v1862_v15 = vadd.f32 %v1770_v3, %v1614_v26  ;;  %v1777_v58 = vsel %vm600_vm2, %v1774_v0, %v1776_v32  ;;  %v1863_v10 = vadd.f32 %v1772_v21, %v1615_v1 }
 0x168   : > { %v1864_v27 = vadd.f32 %v1775_v25, %v1616_v59  ;;  %v1865_v50 = vadd.f32 %v1777_v58, %v1617_v5  ;;  %v1913_v51 = vmul.f32 %v10272_v18, %v7862_v34  ;;  %v2016_v36 = vrot.slane %v1908_v49, 2  ;;  %v10276_v49 = vld [vmem:[#allocation16_spill] sm:$0xff] }
 0x169   : > { %v2017_v6 = vrot.slane %v1909_v57, 2  ;;  %v2019_v29 = vrot.slane %v1910_v46, 2  ;;  %v2021_v30 = vrot.slane %v1911_v37, 2  ;;  %v2022_v16 = vrot.slane %v1912_v45, 2 }
 0x16a   : > { %v7888_v41 = vmul.f32 %v10273_v43, %v7761_v13  ;;  %v2024_v63 = vrot.slane %v1913_v51, 2  ;;  %v7893_v2 = vmul.f32 %v10273_v43, %v7776_v8  ;;  %v7897_v28 = vmul.f32 %v10273_v43, %v7838_v31 }
 0x16b   : > { %v2018_v24 = vsel %vm849_vm3, %v2016_v36, %v2017_v6  ;;  %v2020_v53 = vsel %vm849_vm3, %v2017_v6, %v2019_v29  ;;  %v2023_v11 = vsel %vm849_vm3, %v2021_v30, %v2022_v16  ;;  %v7903_v40 = vmul.f32 %v10273_v43, %v7843_v14 }
 0x16c   : > { %v2110_v23 = vadd.f32 %v2018_v24, %v1862_v15  ;;  %v2025_v54 = vsel %vm849_vm3, %v2022_v16, %v2024_v63  ;;  %v2111_v19 = vadd.f32 %v2020_v53, %v1863_v10  ;;  %v2112_v44 = vadd.f32 %v2023_v11, %v1864_v27 }
 0x16d   : > { %v7908_v17 = vmul.f32 %v10274_v60, %v7761_v13  ;;  %v2113_v62 = vadd.f32 %v2025_v54, %v1865_v50  ;;  %v7913_v52 = vmul.f32 %v10274_v60, %v7776_v8  ;;  %v7917_v26 = vmul.f32 %v10274_v60, %v7789_v56 }
 0x16e   : > { %v2149_v55 = vadd.f32 %v10275_v38, %v2110_v23  ;;  %v2150_v61 = vadd.f32 %v10275_v38, %v2111_v19  ;;  %v2151_v35 = vadd.f32 %v10275_v38, %v2112_v44  ;;  %v7923_v1 = vmul.f32 %v10274_v60, %v7838_v31 }
 0x16f   : > { %v7927_v59 = vmul.f32 %v10274_v60, %v7843_v14  ;;  %v2152_v47 = vadd.f32 %v10275_v38, %v2113_v62  ;;  %v7932_v5 = vmul.f32 %v10274_v60, %v7862_v34  ;;  %v641_v7 = vrot.slane %v7908_v17, 1 }
 0x170   : > { %v2181_v4 = vmax.f32 %v2149_v55, 0.0  ;;  %v2182_v9 = vmax.f32 %v2150_v61, 0.0  ;;  %v2183_v22 = vmax.f32 %v2151_v35, 0.0  ;;  %v642_v42 = vrot.slane %v7913_v52, 1 }
 0x171   : > { %v644_v33 = vrot.slane %v7917_v26, 1  ;;  %v2184_v0 = vmax.f32 %v2152_v47, 0.0  ;;  %vm4786_vm13 = vcmask 517120  }
 0x172   : > { %v2437_v18 = vcombine.high %v2181_v4, %v2181_v4  ;;  %v2444_v3 = vrot.slane %v2181_v4, %v10276_v49  ;;  %v2454_v57 = vcombine.high %v2182_v9, %v2182_v9  ;;  %v2461_v46 = vrot.slane %v2182_v9, %v10276_v49 }
 0x173   : > { %v2471_v21 = vcombine.high %v2183_v22, %v2183_v22  ;;  %v7941_v25 = vrot.slane %v2183_v22, %v10276_v49  ;;  %v2488_v58 = vcombine.high %v2184_v0, %v2184_v0  ;;  %v7945_v10 = vrot.slane %v2184_v0, %v10276_v49 }
 0x174   : > { %v2451_v15 = vrot.slane %v2437_v18, %v10276_v49  ;;  %v2452_v37 = vcombine.high %v2444_v3, %v2444_v3  ;;  %v2468_v27 = vrot.slane %v2454_v57, %v10276_v49  ;;  %v2469_v45 = vcombine.high %v2461_v46, %v2461_v46 }
 0x175   : > { %v7949_v50 = vrot.slane %v2471_v21, %v10276_v49  ;;  %v2486_v51 = vcombine.high %v7941_v25, %v7941_v25  ;;  %v7954_v6 = vrot.slane %v2488_v58, %v10276_v49  ;;  %v2503_v29 = vcombine.high %v7945_v10, %v7945_v10 }
 0x176   : > { %v2453_v36 = vcombine.high %v2451_v15, %v2451_v15  ;;  %v3242_v30 = vsel %vm2905_vm0, %v2444_v3, -inf  ;;  %v2470_v16 = vcombine.high %v2468_v27, %v2468_v27  ;;  %v3249_v63 = vsel %vm2905_vm0, %v2452_v37, -inf }
 0x177   : > { %v2487_v43 = vcombine.high %v7949_v50, %v7949_v50  ;;  %v3243_v24 = vrot.slane %v3242_v30, 4  ;;  %v2504_v53 = vcombine.high %v7954_v6, %v7954_v6  ;;  %v3250_v11 = vrot.slane %v3249_v63, 4 }
 0x178   : > { %v3256_v23 = vsel %vm2905_vm0, %v2451_v15, -inf  ;;  %v3263_v54 = vsel %vm2905_vm0, %v2453_v36, -inf  ;;  %v3270_v62 = vsel %vm2905_vm0, %v2461_v46, -inf  ;;  %v3277_v61 = vsel %vm2905_vm0, %v2469_v45, -inf }
 0x179   : > { %v3244_v19 = vmax.f32 %v3242_v30, %v3243_v24  ;;  %v3257_v44 = vrot.slane %v3256_v23, 4  ;;  %v3264_v60 = vrot.slane %v3263_v54, 4  ;;  %v3251_v38 = vmax.f32 %v3249_v63, %v3250_v11 }
 0x17a   : > { %v3271_v55 = vrot.slane %v3270_v62, 4  ;;  %v3284_v35 = vsel %vm2905_vm0, %v2468_v27, -inf  ;;  %v3278_v22 = vrot.slane %v3277_v61, 4  ;;  %v3291_v57 = vsel %vm2905_vm0, %v2470_v16, -inf }
 0x17b   : > { %v3245_v47 = vrot.slane %v3244_v19, 2  ;;  %v3258_v4 = vmax.f32 %v3256_v23, %v3257_v44  ;;  %v3265_v9 = vmax.f32 %v3263_v54, %v3264_v60  ;;  %v3252_v0 = vrot.slane %v3251_v38, 2 }
 0x17c   : > { %v3272_v18 = vmax.f32 %v3270_v62, %v3271_v55  ;;  %v3285_v3 = vrot.slane %v3284_v35, 4  ;;  %v3279_v58 = vmax.f32 %v3277_v61, %v3278_v22  ;;  %v3292_v24 = vrot.slane %v3291_v57, 4 }
 0x17d   : > { %v3246_v21 = vmax.f32 %v3244_v19, %v3245_v47  ;;  %v3259_v15 = vrot.slane %v3258_v4, 2  ;;  %v3266_v37 = vrot.slane %v3265_v9, 2  ;;  %v3253_v46 = vmax.f32 %v3251_v38, %v3252_v0 }
 0x17e   : > { %v3273_v36 = vrot.slane %v3272_v18, 2  ;;  %v3286_v30 = vmax.f32 %v3284_v35, %v3285_v3  ;;  %v3280_v11 = vrot.slane %v3279_v58, 2  ;;  %v3293_v60 = vmax.f32 %v3291_v57, %v3292_v24 }
 0x17f   : > { %v3247_v45 = vrot.slane %v3246_v21, 1  ;;  %v3260_v63 = vmax.f32 %v3258_v4, %v3259_v15  ;;  %v3267_v27 = vmax.f32 %v3265_v9, %v3266_v37  ;;  %v3254_v23 = vrot.slane %v3253_v46, 1 }
 0x180   : > { %v3274_v54 = vmax.f32 %v3272_v18, %v3273_v36  ;;  %v3287_v44 = vrot.slane %v3286_v30, 2  ;;  %v3281_v19 = vmax.f32 %v3279_v58, %v3280_v11  ;;  %v3294_v22 = vrot.slane %v3293_v60, 2 }
 0x181   : > { %v7970_v62 = vmax.f32 %v3246_v21, %v3247_v45  ;;  %v3261_v55 = vrot.slane %v3260_v63, 1  ;;  %v3268_v16 = vrot.slane %v3267_v27, 1  ;;  %v7972_v47 = vmax.f32 %v3253_v46, %v3254_v23 }
 0x182   : > { %v3275_v61 = vrot.slane %v3274_v54, 1  ;;  %v3288_v38 = vmax.f32 %v3286_v30, %v3287_v44  ;;  %v3282_v4 = vrot.slane %v3281_v19, 1  ;;  %v3298_v9 = vsel %vm2905_vm0, %v7941_v25, -inf }
 0x183   : > { %v7974_v35 = vmax.f32 %v3260_v63, %v3261_v55  ;;  %v7976_v0 = vmax.f32 %v3267_v27, %v3268_v16  ;;  %v3295_v57 = vmax.f32 %v3293_v60, %v3294_v22  ;;  %v3299_v21 = vrot.slane %v3298_v9, 4 }
 0x184   : > { %v7980_v18 = vmax.f32 %v3274_v54, %v3275_v61  ;;  %v3289_v3 = vrot.slane %v3288_v38, 1  ;;  %v7982_v15 = vmax.f32 %v3281_v19, %v3282_v4  ;;  %v3305_v37 = vsel %vm2905_vm0, %v2486_v51, -inf }
 0x185   : > { %v3312_v58 = vsel %vm2905_vm0, %v7949_v50, -inf  ;;  %v3319_v46 = vsel %vm2905_vm0, %v2487_v43, -inf  ;;  %v3296_v30 = vrot.slane %v3295_v57, 1  ;;  %v3300_v24 = vmax.f32 %v3298_v9, %v3299_v21 }
 0x186   : > { %v7988_v36 = vmax.f32 %v3288_v38, %v3289_v3  ;;  %v3306_v45 = vrot.slane %v3305_v37, 4  ;;  %v3313_v25 = vrot.slane %v3312_v58, 4  ;;  %v3320_v63 = vrot.slane %v3319_v46, 4 }
 0x187   : > { %v3326_v27 = vsel %vm2905_vm0, %v7945_v10, -inf  ;;  %v3333_v51 = vsel %vm2905_vm0, %v2503_v29, -inf  ;;  %v7996_v11 = vmax.f32 %v3295_v57, %v3296_v30  ;;  %v3301_v50 = vrot.slane %v3300_v24, 2 }
 0x188   : > { %v3307_v23 = vmax.f32 %v3305_v37, %v3306_v45  ;;  %v3327_v43 = vrot.slane %v3326_v27, 4  ;;  %v3314_v54 = vmax.f32 %v3312_v58, %v3313_v25  ;;  %v3321_v44 = vmax.f32 %v3319_v46, %v3320_v63 }
 0x189   : > { %v3334_v60 = vrot.slane %v3333_v51, 4  ;;  %v3340_v55 = vsel %vm2905_vm0, %v7954_v6, -inf  ;;  %v3302_v16 = vmax.f32 %v3300_v24, %v3301_v50  ;;  %v3347_v29 = vsel %vm2905_vm0, %v2504_v53, -inf }
 0x18a   : > { %v3308_v19 = vrot.slane %v3307_v23, 2  ;;  %v3328_v61 = vmax.f32 %v3326_v27, %v3327_v43  ;;  %v3341_v38 = vrot.slane %v3340_v55, 4  ;;  %v3315_v22 = vrot.slane %v3314_v54, 2 }
 0x18b   : > { %v3322_v4 = vrot.slane %v3321_v44, 2  ;;  %v3335_v10 = vmax.f32 %v3333_v51, %v3334_v60  ;;  %v3303_v9 = vrot.slane %v3302_v16, 1  ;;  %v3348_v30 = vrot.slane %v3347_v29, 4 }
 0x18c   : > { %v3309_v3 = vmax.f32 %v3307_v23, %v3308_v19  ;;  %v3329_v57 = vrot.slane %v3328_v61, 2  ;;  %v3342_v21 = vmax.f32 %v3340_v55, %v3341_v38  ;;  %v3316_v37 = vmax.f32 %v3314_v54, %v3315_v22 }
 0x18d   : > { %v3323_v58 = vmax.f32 %v3321_v44, %v3322_v4  ;;  %v3336_v46 = vrot.slane %v3335_v10, 2  ;;  %v3304_v24 = vmax.f32 %v3302_v16, %v3303_v9  ;;  %v3349_v43 = vmax.f32 %v3347_v29, %v3348_v30 }
 0x18e   : > { %v3310_v45 = vrot.slane %v3309_v3, 1  ;;  %v3330_v25 = vmax.f32 %v3328_v61, %v3329_v57  ;;  %v3343_v63 = vrot.slane %v3342_v21, 2  ;;  %v3317_v27 = vrot.slane %v3316_v37, 1 }
 0x18f   : > { %v3324_v50 = vrot.slane %v3323_v58, 1  ;;  %v3337_v51 = vmax.f32 %v3335_v10, %v3336_v46  ;;  %v3826_v53 = vmax.f32 %v7970_v62, %v3304_v24  ;;  %v3350_v54 = vrot.slane %v3349_v43, 2 }
 0x190   : > { %v3311_v60 = vmax.f32 %v3309_v3, %v3310_v45  ;;  %v3331_v6 = vrot.slane %v3330_v25, 1  ;;  %v3344_v32 = vmax.f32 %v3342_v21, %v3343_v63  ;;  %v3318_v23 = vmax.f32 %v3316_v37, %v3317_v27  ;;  %v8062_v63 = vld [vmem:[%s6857_s24 + $0xf8] sm:$0xff] }
 0x191   : > { %v3325_v19 = vmax.f32 %v3323_v58, %v3324_v50  ;;  %v3338_v55 = vrot.slane %v3337_v51, 1  ;;  %v643_v61 = vsel %vm600_vm2, %v641_v7, %v642_v42  ;;  %v3351_v4 = vmax.f32 %v3349_v43, %v3350_v54  ;;  %v8035_v58 = vld [vmem:[#allocation4 + $0x2] ss:$0 sm:$0xff] }
 0x192   : > { %v3332_v44 = vmax.f32 %v3330_v25, %v3331_v6  ;;  %v3345_v38 = vrot.slane %v3344_v32, 1  ;;  %v3827_v16 = vmax.f32 %v7972_v47, %v3311_v60  ;;  %v3828_v10 = vmax.f32 %v7974_v35, %v3318_v23 }
 0x193   : > { %v3339_v22 = vmax.f32 %v3337_v51, %v3338_v55  ;;  %v3829_v62 = vmax.f32 %v7976_v0, %v3325_v19  ;;  %v645_v47 = vsel %vm600_vm2, %v642_v42, %v644_v33  ;;  %v3352_v17 = vrot.slane %v3351_v4, 1 }
 0x194   : > { %v3346_v29 = vmax.f32 %v3344_v32, %v3345_v38  ;;  %v3830_v9 = vmax.f32 %v7980_v18, %v3332_v44  ;;  %v3979_v3 = vsel %vm3951_vm4, %v3827_v16, %v3826_v53  ;;  %v647_v35 = vrot.slane %v7927_v59, 1  ;;  %v8075_v38 = vld [vmem:[%s6857_s24 + $0x100] sm:$0x3] }
 0x195   : > { %v3831_v7 = vmax.f32 %v7982_v15, %v3339_v22  ;;  %v3980_v57 = vsel %vm3953_vm5, %v3828_v10, %v3979_v3  ;;  %v649_v18 = vrot.slane %v7932_v5, 1  ;;  %v729_v21 = vadd.f32 %v643_v61, %v7888_v41 }
 0x196   : > { %v3832_v0 = vmax.f32 %v7988_v36, %v3346_v29  ;;  %v3981_v32 = vsel %vm3955_vm6, %v3829_v62, %v3980_v57  ;;  %v3353_v26 = vmax.f32 %v3351_v4, %v3352_v17  ;;  %v10277_v42 = vrot.slane %v7923_v1, 1  ;;  %v8077_v4 = vld [vmem:[#allocation4 + $0x4] ss:$0 sm:$0xff] }
 0x197   : > { %v3982_v52 = vsel %vm3957_vm7, %v3830_v9, %v3981_v32  ;;  %v730_v15 = vadd.f32 %v645_v47, %v7893_v2  ;;  %v650_v59 = vsel %vm600_vm2, %v647_v35, %v649_v18  ;;  %v777_v41 = vmul.f32 %v8035_v58, %v7761_v13 }
 0x198   : > { %v648_v33 = vsel %vm600_vm2, %v10277_v42, %v647_v35  ;;  %v3983_v37 = vsel %vm3959_vm8, %v3831_v7, %v3982_v52  ;;  %v3833_v5 = vmax.f32 %v7996_v11, %v3353_v26  ;;  %v732_v46 = vadd.f32 %v650_v59, %v7903_v40  ;;  %v8053_v40 = vld [vmem:[#allocation4 + $0x3] ss:$0 sm:$0xff] }
 0x199   : > { %v731_v36 = vadd.f32 %v648_v33, %v7897_v28  ;;  %v3984_v1 = vsel %vm3961_vm9, %v3832_v0, %v3983_v37  ;;  %v778_v2 = vmul.f32 %v8035_v58, %v7776_v8  ;;  %v779_v30 = vmul.f32 %v8035_v58, %v7789_v56  ;;  %v8059_v56 = vld [vmem:[%s6857_s24 + $0xf0] sm:$0xff]  ;;  %v8093_v33 = vld [vmem:[#allocation4 + $0x5] ss:$0 sm:$0xff] }
 0x19a   : > { %v780_v28 = vmul.f32 %v8035_v58, %v7838_v31  ;;  %v781_v24 = vmul.f32 %v8035_v58, %v7843_v14  ;;  %v782_v13 = vmul.f32 %v8035_v58, %v7862_v34  ;;  %v3985_v11 = vsel %vm3963_vm10, %v3833_v5, %v3984_v1  ;;  %v10278_v59 = vld [vmem:[#allocation21_spill] sm:$0xff] }
 0x19b   : > { %v890_v45 = vrot.slane %v777_v41, 2  ;;  %v891_v25 = vrot.slane %v778_v2, 2  ;;  %v1018_v8 = vmul.f32 %v8053_v40, %v7838_v31  ;;  %4026 = vst.msk [vmem:[#allocation2 + $0x41] sm:$0xff] %vm3866_vm1, %v3985_v11  ;;  %v893_v27 = vrot.slane %v779_v30, 2 }
 0x19c   : > { %v895_v50 = vrot.slane %v780_v28, 2  ;;  %v896_v51 = vrot.slane %v781_v24, 2  ;;  %v898_v43 = vrot.slane %v782_v13, 2  ;;  %v1019_v6 = vmul.f32 %v8053_v40, %v7843_v14 }
 0x19d   : > { %v892_v60 = vsel %vm849_vm3, %v890_v45, %v891_v25  ;;  %v1020_v53 = vmul.f32 %v8053_v40, %v8059_v56  ;;  %v1021_v23 = vmul.f32 %v8053_v40, %v8062_v63  ;;  %v894_v19 = vsel %vm849_vm3, %v891_v25, %v893_v27 }
 0x19e   : > { %v897_v55 = vsel %vm849_vm3, %v895_v50, %v896_v51  ;;  %v899_v54 = vsel %vm849_vm3, %v896_v51, %v898_v43  ;;  %v978_v44 = vadd.f32 %v892_v60, %v729_v21  ;;  %v979_v16 = vadd.f32 %v894_v19, %v730_v15 }
 0x19f   : > { %v980_v61 = vadd.f32 %v897_v55, %v731_v36  ;;  %v981_v22 = vadd.f32 %v899_v54, %v732_v46  ;;  %v1098_v10 = vmul.f32 %v8077_v4, %v7838_v31  ;;  %v1099_v29 = vmul.f32 %v8077_v4, %v7843_v14  ;;  %v8131_v54 = vld [vmem:[#allocation4 + $0x6] ss:$0 sm:$0xff] }
 0x1a0   : > { %v1050_v62 = vadd.f32 %v1018_v8, %v978_v44  ;;  %v1100_v9 = vmul.f32 %v8077_v4, %v7862_v34  ;;  %v1101_v3 = vmul.f32 %v8077_v4, %v8059_v56  ;;  %v1051_v47 = vadd.f32 %v1019_v6, %v979_v16  ;;  %v8136_v16 = vld [vmem:[%s6857_s24 + $0x110] sm:$0xff] }
 0x1a1   : > { %v1052_v17 = vadd.f32 %v1020_v53, %v980_v61  ;;  %v1053_v7 = vadd.f32 %v1021_v23, %v981_v22  ;;  %v1102_v57 = vmul.f32 %v8077_v4, %v8062_v63  ;;  %v1103_v35 = vmul.f32 %v8077_v4, %v8075_v38  ;;  %v8129_v53 = vld [vmem:[%s6857_s24 + $0x108] sm:$0xff] }
 0x1a2   : > { %v1210_v0 = vrot.slane %v1098_v10, 1  ;;  %v1211_v32 = vrot.slane %v1099_v29, 1  ;;  %v1213_v18 = vrot.slane %v1100_v9, 1  ;;  %v8091_v21 = vld [vmem:[#allocation2 + $0x40] sm:$0xff]  ;;  %v4040_v26 = vld [vmem:[#allocation2 + $0x48] sm:$0x3]  ;;  %v1346_v15 = vmul.f32 %v8093_v33, %v7838_v31 }
 0x1a3   : > { %v1215_v52 = vrot.slane %v1101_v3, 1  ;;  %v1216_v42 = vrot.slane %v1102_v57, 1  ;;  %v1347_v37 = vmul.f32 %v8093_v33, %v7843_v14  ;;  %v6410_v36 = vpack.i.bf16 %v10278_v59, %v8091_v21 }
 0x1a4   : > { %v4079_v41 = vrot.slane %v8091_v21, 1  ;;  %v4080_v5 = vrot.slane %v4040_v26, 1  ;;  %v4103_v1 = vrot.slane %v8091_v21, 2  ;;  %v4104_v46 = vrot.slane %v4040_v26, 2 }
 0x1a5   : > { %v1212_v2 = vsel %vm600_vm2, %v1210_v0, %v1211_v32  ;;  %v1214_v30 = vsel %vm600_vm2, %v1211_v32, %v1213_v18  ;;  %v1217_v28 = vsel %vm600_vm2, %v1215_v52, %v1216_v42  ;;  %6411 = vrot.lane.b32.xlu1 %v6410_v36, %s6646_s28  ;;  %v1218_v14 = vrot.slane %v1103_v35, 1  ;;  %v8148_v35 = vld [vmem:[#allocation4 + $0x7] ss:$0 sm:$0xff] }
 0x1a6   : > { %v8108_v31 = vsel %vm600_vm2, %v4079_v41, %v4080_v5  ;;  %v1298_v24 = vadd.f32 %v1212_v2, %v1050_v62  ;;  %v1299_v13 = vadd.f32 %v1214_v30, %v1051_v47  ;;  %v8113_v45 = vsel %vm849_vm3, %v4103_v1, %v4104_v46  ;;  %10281 = vst [vmem:[#allocation22_spill] sm:$0xff] %v8148_v35 }
 0x1a7   : > { %10279 = vst [vmem:[#allocation18_spill] sm:$0xff] %v8108_v31  ;;  %v6415_v11 = vpack.i.bf16 %v7803_v20, %v8108_v31  ;;  %10280 = vst [vmem:[#allocation20_spill] sm:$0xff] %v8113_v45  ;;  %v1300_v25 = vadd.f32 %v1217_v28, %v1052_v17  ;;  %v1348_v8 = vmul.f32 %v8093_v33, %v7862_v34  ;;  %v1458_v6 = vrot.slane %v1346_v15, 2 }
 0x1a8   : > { %v6420_v27 = vpack.i.bf16 %v7818_v12, %v8113_v45  ;;  %v1219_v50 = vsel %vm600_vm2, %v1216_v42, %v1218_v14  ;;  %v1349_v51 = vmul.f32 %v8093_v33, %v8059_v56  ;;  %v1350_v43 = vmul.f32 %v8093_v33, %v8062_v63  ;;  %v8157_v42 = vld [vmem:[%s6857_s24 + $0x118] sm:$0x3]  ;;  %v8165_v14 = vld [vmem:[#allocation4 + $0x8] ss:$0 sm:$0xff] }
 0x1a9   : > { %6416 = vrot.lane.b32.xlu0 %v6415_v11, %s6647_s29  ;;  %v1301_v20 = vadd.f32 %v1219_v50, %v1053_v7  ;;  %v1351_v60 = vmul.f32 %v8093_v33, %v8075_v38  ;;  %v1459_v34 = vrot.slane %v1347_v37, 2  ;;  %v1461_v23 = vrot.slane %v1348_v8, 2  ;;  %10282 = vst [vmem:[#allocation15_spill] sm:$0xff] %v8165_v14 }
 0x1aa   : > { %6421 = vrot.lane.b32.xlu1 %v6420_v27, %s6648_s10  ;;  %v1463_v19 = vrot.slane %v1349_v51, 2  ;;  %v1464_v55 = vrot.slane %v1350_v43, 2  ;;  %v1586_v44 = vmul.f32 %v8131_v54, %v8059_v56  ;;  %v1587_v10 = vmul.f32 %v8131_v54, %v8062_v63 }
 0x1ab   : > { %v1460_v61 = vsel %vm849_vm3, %v1458_v6, %v1459_v34  ;;  %v1466_v22 = vrot.slane %v1351_v60, 2  ;;  %v1588_v62 = vmul.f32 %v8131_v54, %v8129_v53  ;;  %v1462_v29 = vsel %vm849_vm3, %v1459_v34, %v1461_v23 }
 0x1ac   : > { %v1465_v9 = vsel %vm849_vm3, %v1463_v19, %v1464_v55  ;;  %v1546_v3 = vadd.f32 %v1460_v61, %v1298_v24  ;;  %v1589_v47 = vmul.f32 %v8131_v54, %v8136_v16  ;;  %v1547_v7 = vadd.f32 %v1462_v29, %v1299_v13 }
 0x1ad   : > { %v1467_v17 = vsel %vm849_vm3, %v1464_v55, %v1466_v22  ;;  %v1548_v57 = vadd.f32 %v1465_v9, %v1300_v25  ;;  %v1666_v0 = vmul.f32 %v8148_v35, %v8059_v56  ;;  %v1667_v26 = vmul.f32 %v8148_v35, %v8062_v63 }
 0x1ae   : > { %v1549_v32 = vadd.f32 %v1467_v17, %v1301_v20  ;;  %v1618_v18 = vadd.f32 %v1586_v44, %v1546_v3  ;;  %v1668_v52 = vmul.f32 %v8148_v35, %v8075_v38  ;;  %v1619_v15 = vadd.f32 %v1587_v10, %v1547_v7 }
 0x1af   : > { %v1620_v37 = vadd.f32 %v1588_v62, %v1548_v57  ;;  %v1669_v59 = vmul.f32 %v8148_v35, %v8129_v53  ;;  %v1670_v36 = vmul.f32 %v8148_v35, %v8136_v16  ;;  %v1671_v5 = vmul.f32 %v8148_v35, %v8157_v42  ;;  %v8183_v62 = vld [vmem:[#allocation4] ss:$0 sm:$0xff] }
 0x1b0   : > { %v1621_v41 = vadd.f32 %v1589_v47, %v1549_v32  ;;  %v1778_v1 = vrot.slane %v1666_v0, 1  ;;  %v1779_v46 = vrot.slane %v1667_v26, 1  ;;  %v1781_v2 = vrot.slane %v1668_v52, 1  ;;  %10283 = vst [vmem:[#allocation19_spill] sm:$0xff] %v8183_v62 }
 0x1b1   : > { %v1783_v30 = vrot.slane %v1669_v59, 1  ;;  %v1784_v28 = vrot.slane %v1670_v36, 1  ;;  %v1914_v24 = vmul.f32 %v8165_v14, %v8059_v56  ;;  %v1786_v11 = vrot.slane %v1671_v5, 1  ;;  %v8214_v36 = vld [vmem:[%s10139_s2] ss:$0 sm:$0xff] }
 0x1b2   : > { %v1780_v13 = vsel %vm600_vm2, %v1778_v1, %v1779_v46  ;;  %v1915_v25 = vmul.f32 %v8165_v14, %v8062_v63  ;;  %v1916_v8 = vmul.f32 %v8165_v14, %v8075_v38  ;;  %v1782_v27 = vsel %vm600_vm2, %v1779_v46, %v1781_v2  ;;  %10285 = vst [vmem:[#allocation26_spill] sm:$0xff] %v8214_v36 }
 0x1b3   : > { %v1785_v50 = vsel %vm600_vm2, %v1783_v30, %v1784_v28  ;;  %v1866_v51 = vadd.f32 %v1780_v13, %v1618_v18  ;;  %v1917_v43 = vmul.f32 %v8165_v14, %v8129_v53  ;;  %v1787_v20 = vsel %vm600_vm2, %v1784_v28, %v1786_v11 }
 0x1b4   : > { %v1867_v60 = vadd.f32 %v1782_v27, %v1619_v15  ;;  %v1868_v6 = vadd.f32 %v1785_v50, %v1620_v37  ;;  %v1918_v34 = vmul.f32 %v8165_v14, %v8136_v16  ;;  %v1869_v23 = vadd.f32 %v1787_v20, %v1621_v41  ;;  %v8205_v15 = vld [vmem:[#allocation4 + $0x1] ss:$0 sm:$0xff] }
 0x1b5   : > { %v1919_v19 = vmul.f32 %v8165_v14, %v8157_v42  ;;  %v2026_v55 = vrot.slane %v1914_v24, 2  ;;  %v2027_v44 = vrot.slane %v1915_v25, 2  ;;  %v2029_v61 = vrot.slane %v1916_v8, 2  ;;  %10284 = vst [vmem:[#allocation24_spill] sm:$0xff] %v8205_v15 }
 0x1b6   : > { %v2031_v22 = vrot.slane %v1917_v43, 2  ;;  %v2032_v10 = vrot.slane %v1918_v34, 2  ;;  %v8187_v29 = vmul.f32 %v8183_v62, %v8059_v56  ;;  %v8192_v47 = vmul.f32 %v8183_v62, %v8062_v63 }
 0x1b7   : > { %v2028_v9 = vsel %vm849_vm3, %v2026_v55, %v2027_v44  ;;  %v2034_v3 = vrot.slane %v1919_v19, 2  ;;  %v8196_v17 = vmul.f32 %v8183_v62, %v8129_v53  ;;  %v2030_v7 = vsel %vm849_vm3, %v2027_v44, %v2029_v61 }
 0x1b8   : > { %v2033_v57 = vsel %vm849_vm3, %v2031_v22, %v2032_v10  ;;  %v2114_v0 = vadd.f32 %v2028_v9, %v1866_v51  ;;  %v8202_v32 = vmul.f32 %v8183_v62, %v8136_v16  ;;  %v2115_v26 = vadd.f32 %v2030_v7, %v1867_v60 }
 0x1b9   : > { %v2035_v18 = vsel %vm849_vm3, %v2032_v10, %v2034_v3  ;;  %v2116_v52 = vadd.f32 %v2033_v57, %v1868_v6  ;;  %v8209_v37 = vmul.f32 %v8205_v15, %v8059_v56  ;;  %v8219_v5 = vmul.f32 %v8205_v15, %v8062_v63 }
 0x1ba   : > { %v2117_v59 = vadd.f32 %v2035_v18, %v1869_v23  ;;  %v2153_v41 = vadd.f32 %v8214_v36, %v2114_v0  ;;  %v8223_v1 = vmul.f32 %v8205_v15, %v8075_v38  ;;  %v2154_v46 = vadd.f32 %v8214_v36, %v2115_v26 }
 0x1bb   : > { %v2155_v2 = vadd.f32 %v8214_v36, %v2116_v52  ;;  %v8229_v30 = vmul.f32 %v8205_v15, %v8129_v53  ;;  %v8233_v28 = vmul.f32 %v8205_v15, %v8136_v16  ;;  %v8238_v11 = vmul.f32 %v8205_v15, %v8157_v42 }
 0x1bc   : > { %v2156_v24 = vadd.f32 %v8214_v36, %v2117_v59  ;;  %v2185_v13 = vmax.f32 %v2153_v41, 0.0  ;;  %v2186_v8 = vmax.f32 %v2154_v46, 0.0 }
 0x1bd   : > { %v2187_v27 = vmax.f32 %v2155_v2, 0.0 }
 0x1be   : > { %v2188_v43 = vmax.f32 %v2156_v24, 0.0  ;;  %v2505_v20 = vcombine.high %v2185_v13, %v2185_v13  ;;  %v2512_v60 = vrot.slane %v2185_v13, %v10276_v49  ;;  %v2522_v34 = vcombine.high %v2186_v8, %v2186_v8 }
 0x1bf   : > { %v2529_v23 = vrot.slane %v2186_v8, %v10276_v49  ;;  %v2539_v19 = vcombine.high %v2187_v27, %v2187_v27  ;;  %v8247_v55 = vrot.slane %v2187_v27, %v10276_v49 }
 0x1c0   : > { %v2519_v44 = vrot.slane %v2505_v20, %v10276_v49  ;;  %v2520_v61 = vcombine.high %v2512_v60, %v2512_v60  ;;  %v2556_v22 = vcombine.high %v2188_v43, %v2188_v43  ;;  %v8251_v10 = vrot.slane %v2188_v43, %v10276_v49 }
 0x1c1   : > { %v2536_v9 = vrot.slane %v2522_v34, %v10276_v49  ;;  %v2537_v3 = vcombine.high %v2529_v23, %v2529_v23  ;;  %v8255_v7 = vrot.slane %v2539_v19, %v10276_v49  ;;  %v2554_v57 = vcombine.high %v8247_v55, %v8247_v55 }
 0x1c2   : > { %v2521_v0 = vcombine.high %v2519_v44, %v2519_v44  ;;  %v8260_v18 = vrot.slane %v2556_v22, %v10276_v49  ;;  %v3354_v52 = vsel %vm2905_vm0, %v2512_v60, -inf  ;;  %v3361_v2 = vsel %vm2905_vm0, %v2520_v61, -inf }
 0x1c3   : > { %v2538_v59 = vcombine.high %v2536_v9, %v2536_v9  ;;  %v2555_v41 = vcombine.high %v8255_v7, %v8255_v7  ;;  %v3355_v46 = vrot.slane %v3354_v52, 4  ;;  %v3362_v13 = vrot.slane %v3361_v2, 4 }
 0x1c4   : > { %v3368_v8 = vsel %vm2905_vm0, %v2519_v44, -inf  ;;  %v3375_v27 = vsel %vm2905_vm0, %v2521_v0, -inf  ;;  %v3382_v60 = vsel %vm2905_vm0, %v2529_v23, -inf  ;;  %v3389_v6 = vsel %vm2905_vm0, %v2537_v3, -inf }
 0x1c5   : > { %v3356_v43 = vmax.f32 %v3354_v52, %v3355_v46  ;;  %v3369_v20 = vrot.slane %v3368_v8, 4  ;;  %v3376_v34 = vrot.slane %v3375_v27, 4  ;;  %v3363_v19 = vmax.f32 %v3361_v2, %v3362_v13 }
 0x1c6   : > { %v3383_v22 = vrot.slane %v3382_v60, 4  ;;  %v3396_v51 = vsel %vm2905_vm0, %v2536_v9, -inf  ;;  %v3390_v24 = vrot.slane %v3389_v6, 4  ;;  %v3403_v0 = vsel %vm2905_vm0, %v2538_v59, -inf }
 0x1c7   : > { %v3357_v61 = vrot.slane %v3356_v43, 2  ;;  %v3370_v25 = vmax.f32 %v3368_v8, %v3369_v20  ;;  %v3377_v50 = vmax.f32 %v3375_v27, %v3376_v34  ;;  %v3364_v26 = vrot.slane %v3363_v19, 2 }
 0x1c8   : > { %v3384_v12 = vmax.f32 %v3382_v60, %v3383_v22  ;;  %v3397_v44 = vrot.slane %v3396_v51, 4  ;;  %v3391_v45 = vmax.f32 %v3389_v6, %v3390_v24  ;;  %v3404_v49 = vrot.slane %v3403_v0, 4 }
 0x1c9   : > { %v3358_v52 = vmax.f32 %v3356_v43, %v3357_v61  ;;  %v3371_v46 = vrot.slane %v3370_v25, 2  ;;  %v3378_v48 = vrot.slane %v3377_v50, 2  ;;  %v3365_v23 = vmax.f32 %v3363_v19, %v3364_v26 }
 0x1ca   : > { %v3385_v2 = vrot.slane %v3384_v12, 2  ;;  %v3398_v13 = vmax.f32 %v3396_v51, %v3397_v44  ;;  %v3392_v15 = vrot.slane %v3391_v45, 2  ;;  %v3405_v34 = vmax.f32 %v3403_v0, %v3404_v49 }
 0x1cb   : > { %v3359_v3 = vrot.slane %v3358_v52, 1  ;;  %v3372_v36 = vmax.f32 %v3370_v25, %v3371_v46  ;;  %v3379_v9 = vmax.f32 %v3377_v50, %v3378_v48  ;;  %v3366_v8 = vrot.slane %v3365_v23, 1 }
 0x1cc   : > { %v3386_v27 = vmax.f32 %v3384_v12, %v3385_v2  ;;  %v3399_v20 = vrot.slane %v3398_v13, 2  ;;  %v3393_v43 = vmax.f32 %v3391_v45, %v3392_v15  ;;  %v3406_v24 = vrot.slane %v3405_v34, 2 }
 0x1cd   : > { %v8276_v60 = vmax.f32 %v3358_v52, %v3359_v3  ;;  %v3373_v22 = vrot.slane %v3372_v36, 1  ;;  %v3380_v59 = vrot.slane %v3379_v9, 1  ;;  %v8278_v61 = vmax.f32 %v3365_v23, %v3366_v8 }
 0x1ce   : > { %v3387_v6 = vrot.slane %v3386_v27, 1  ;;  %v3400_v26 = vmax.f32 %v3398_v13, %v3399_v20  ;;  %v3394_v48 = vrot.slane %v3393_v43, 1  ;;  %v3410_v12 = vsel %vm2905_vm0, %v8247_v55, -inf }
 0x1cf   : > { %v8280_v51 = vmax.f32 %v3372_v36, %v3373_v22  ;;  %v8282_v19 = vmax.f32 %v3379_v9, %v3380_v59  ;;  %v3407_v50 = vmax.f32 %v3405_v34, %v3406_v24  ;;  %v3411_v44 = vrot.slane %v3410_v12, 4 }
 0x1d0   : > { %v8286_v25 = vmax.f32 %v3386_v27, %v3387_v6  ;;  %v3401_v49 = vrot.slane %v3400_v26, 1  ;;  %v8288_v0 = vmax.f32 %v3393_v43, %v3394_v48  ;;  %v3417_v45 = vsel %vm2905_vm0, %v2554_v57, -inf }
 0x1d1   : > { %v3424_v15 = vsel %vm2905_vm0, %v8255_v7, -inf  ;;  %v3431_v36 = vsel %vm2905_vm0, %v2555_v41, -inf  ;;  %v3408_v46 = vrot.slane %v3407_v50, 1  ;;  %v3412_v23 = vmax.f32 %v3410_v12, %v3411_v44 }
 0x1d2   : > { %v8294_v52 = vmax.f32 %v3400_v26, %v3401_v49  ;;  %v3418_v2 = vrot.slane %v3417_v45, 4  ;;  %v3425_v55 = vrot.slane %v3424_v15, 4  ;;  %v3432_v13 = vrot.slane %v3431_v36, 4 }
 0x1d3   : > { %v3438_v3 = vsel %vm2905_vm0, %v8251_v10, -inf  ;;  %v10286_v9 = vcombine.high %v8251_v10, %v8251_v10  ;;  %v8302_v8 = vmax.f32 %v3407_v50, %v3408_v46  ;;  %v3413_v7 = vrot.slane %v3412_v23, 2 }
 0x1d4   : > { %v3419_v27 = vmax.f32 %v3417_v45, %v3418_v2  ;;  %v3439_v41 = vrot.slane %v3438_v3, 4  ;;  %v3426_v20 = vmax.f32 %v3424_v15, %v3425_v55  ;;  %v3433_v34 = vmax.f32 %v3431_v36, %v3432_v13 }
 0x1d5   : > { %v3445_v57 = vsel %vm2905_vm0, %v10286_v9, -inf  ;;  %v3452_v59 = vsel %vm2905_vm0, %v8260_v18, -inf  ;;  %v3414_v43 = vmax.f32 %v3412_v23, %v3413_v7  ;;  %v10287_v49 = vcombine.high %v8260_v18, %v8260_v18 }
 0x1d6   : > { %v3446_v22 = vrot.slane %v3445_v57, 4  ;;  %v3420_v6 = vrot.slane %v3419_v27, 2  ;;  %v3440_v26 = vmax.f32 %v3438_v3, %v3439_v41  ;;  %v3453_v24 = vrot.slane %v3452_v59, 4 }
 0x1d7   : > { %v3427_v48 = vrot.slane %v3426_v20, 2  ;;  %v3434_v12 = vrot.slane %v3433_v34, 2  ;;  %v3459_v50 = vsel %vm2905_vm0, %v10287_v49, -inf  ;;  %v3415_v44 = vrot.slane %v3414_v43, 1 }
 0x1d8   : > { %v3447_v10 = vmax.f32 %v3445_v57, %v3446_v22  ;;  %v3421_v45 = vmax.f32 %v3419_v27, %v3420_v6  ;;  %v3441_v15 = vrot.slane %v3440_v26, 2  ;;  %v3454_v36 = vmax.f32 %v3452_v59, %v3453_v24 }
 0x1d9   : > { %v3428_v46 = vmax.f32 %v3426_v20, %v3427_v48  ;;  %v3435_v2 = vmax.f32 %v3433_v34, %v3434_v12  ;;  %v3460_v13 = vrot.slane %v3459_v50, 4  ;;  %v3416_v23 = vmax.f32 %v3414_v43, %v3415_v44 }
 0x1da   : > { %v3448_v55 = vrot.slane %v3447_v10, 2  ;;  %v3422_v9 = vrot.slane %v3421_v45, 1  ;;  %v3442_v3 = vmax.f32 %v3440_v26, %v3441_v15  ;;  %v3455_v7 = vrot.slane %v3454_v36, 2 }
 0x1db   : > { %v3429_v41 = vrot.slane %v3428_v46, 1  ;;  %v3436_v62 = vrot.slane %v3435_v2, 1  ;;  %v3461_v22 = vmax.f32 %v3459_v50, %v3460_v13  ;;  %v3834_v49 = vmax.f32 %v8276_v60, %v3416_v23 }
 0x1dc   : > { %v3449_v57 = vmax.f32 %v3447_v10, %v3448_v55  ;;  %v3423_v14 = vmax.f32 %v3421_v45, %v3422_v9  ;;  %v3443_v18 = vrot.slane %v3442_v3, 1  ;;  %v3456_v35 = vmax.f32 %v3454_v36, %v3455_v7 }
 0x1dd   : > { %v3430_v27 = vmax.f32 %v3428_v46, %v3429_v41  ;;  %v3437_v6 = vmax.f32 %v3435_v2, %v3436_v62  ;;  %v3462_v20 = vrot.slane %v3461_v22, 2  ;;  %v10288_v26 = vrot.slane %v8219_v5, 1 }
 0x1de   : > { %v3450_v59 = vrot.slane %v3449_v57, 1  ;;  %v3444_v34 = vmax.f32 %v3442_v3, %v3443_v18  ;;  %v3457_v24 = vrot.slane %v3456_v35, 1  ;;  %v3835_v43 = vmax.f32 %v8278_v61, %v3423_v14 }
 0x1df   : > { %v10289_v48 = vrot.slane %v8209_v37, 1  ;;  %v3463_v50 = vmax.f32 %v3461_v22, %v3462_v20  ;;  %v3836_v44 = vmax.f32 %v8280_v51, %v3430_v27  ;;  %v3837_v60 = vmax.f32 %v8282_v19, %v3437_v6 }
 0x1e0   : > { %v3451_v10 = vmax.f32 %v3449_v57, %v3450_v59  ;;  %v3458_v45 = vmax.f32 %v3456_v35, %v3457_v24  ;;  %v3838_v62 = vmax.f32 %v8286_v25, %v3444_v34  ;;  %v3986_v15 = vsel %vm3951_vm4, %v3835_v43, %v3834_v49 }
 0x1e1   : > { %v653_v12 = vsel %vm600_vm2, %v10289_v48, %v10288_v26  ;;  %v10290_v36 = vrot.slane %v8223_v1, 1  ;;  %v10291_v14 = vmov %v10288_v26  ;;  %v3464_v37 = vrot.slane %v3463_v50, 1 }
 0x1e2   : > { %v3839_v46 = vmax.f32 %v8288_v0, %v3451_v10  ;;  %v3987_v2 = vsel %vm3953_vm5, %v3836_v44, %v3986_v15  ;;  %v657_v51 = vrot.slane %v8233_v28, 1  ;;  %v3840_v19 = vmax.f32 %v8294_v52, %v3458_v45 }
 0x1e3   : > { %v655_v61 = vsel %vm600_vm2, %v10291_v14, %v10290_v36  ;;  %v3988_v35 = vsel %vm3955_vm6, %v3837_v60, %v3987_v2  ;;  %v659_v25 = vrot.slane %v8238_v11, 1  ;;  %v733_v1 = vadd.f32 %v653_v12, %v8187_v29  ;;  %v8377_v12 = vld [vmem:[%s6857_s24 + $0x130] sm:$0x3] }
 0x1e4   : > { %v3465_v55 = vmax.f32 %v3463_v50, %v3464_v37  ;;  %v3989_v5 = vsel %vm3957_vm7, %v3838_v62, %v3988_v35  ;;  %v10292_v13 = vrot.slane %v8229_v30, 1  ;;  %v734_v23 = vadd.f32 %v655_v61, %v8192_v47  ;;  %v8349_v47 = vld [vmem:[%s6857_s24 + $0x120] sm:$0xff] }
 0x1e5   : > { %v3990_v28 = vsel %vm3959_vm8, %v3839_v46, %v3989_v5  ;;  %v660_v52 = vsel %vm600_vm2, %v657_v51, %v659_v25  ;;  %v783_v11 = vmul.f32 %v8035_v58, %v8059_v56  ;;  %v784_v7 = vmul.f32 %v8035_v58, %v8062_v63 }
 0x1e6   : > { %v658_v0 = vsel %vm600_vm2, %v10292_v13, %v657_v51  ;;  %v3841_v29 = vmax.f32 %v8302_v8, %v3465_v55  ;;  %v3991_v3 = vsel %vm3961_vm9, %v3840_v19, %v3990_v28  ;;  %v736_v30 = vadd.f32 %v660_v52, %v8202_v32 }
 0x1e7   : > { %v735_v9 = vadd.f32 %v658_v0, %v8196_v17  ;;  %v785_v41 = vmul.f32 %v8035_v58, %v8075_v38  ;;  %v786_v17 = vmul.f32 %v8035_v58, %v8129_v53  ;;  %v787_v56 = vmul.f32 %v8035_v58, %v8136_v16  ;;  %v8364_v38 = vld [vmem:[%s6857_s24 + $0x128] sm:$0xff] }
 0x1e8   : > { %v788_v8 = vmul.f32 %v8035_v58, %v8157_v42  ;;  %v3992_v57 = vsel %vm3963_vm10, %v3841_v29, %v3991_v3  ;;  %v900_v32 = vrot.slane %v783_v11, 2  ;;  %v901_v22 = vrot.slane %v784_v7, 2 }
 0x1e9   : > { %v1022_v63 = vmul.f32 %v8053_v40, %v8129_v53  ;;  %4027 = vst.msk [vmem:[#allocation2 + $0x51] sm:$0xff] %vm3866_vm1, %v3992_v57  ;;  %v903_v18 = vrot.slane %v785_v41, 2  ;;  %v905_v49 = vrot.slane %v786_v17, 2  ;;  %v906_v27 = vrot.slane %v787_v56, 2 }
 0x1ea   : > { %v908_v6 = vrot.slane %v788_v8, 2  ;;  %v902_v59 = vsel %vm849_vm3, %v900_v32, %v901_v22  ;;  %v1023_v58 = vmul.f32 %v8053_v40, %v8136_v16  ;;  %v1024_v20 = vmul.f32 %v8053_v40, %v8349_v47 }
 0x1eb   : > { %v1025_v34 = vmul.f32 %v8053_v40, %v8364_v38  ;;  %v904_v24 = vsel %vm849_vm3, %v901_v22, %v903_v18  ;;  %v907_v43 = vsel %vm849_vm3, %v905_v49, %v906_v27  ;;  %v982_v48 = vadd.f32 %v902_v59, %v733_v1  ;;  %v8427_v49 = vld [vmem:[%s6857_s24 + $0x138] sm:$0xff] }
 0x1ec   : > { %v909_v26 = vsel %vm849_vm3, %v906_v27, %v908_v6  ;;  %v983_v10 = vadd.f32 %v904_v24, %v734_v23  ;;  %v984_v50 = vadd.f32 %v907_v43, %v735_v9  ;;  %v1104_v60 = vmul.f32 %v8077_v4, %v8129_v53 }
 0x1ed   : > { %v985_v44 = vadd.f32 %v909_v26, %v736_v30  ;;  %v1054_v45 = vadd.f32 %v1022_v63, %v982_v48  ;;  %v1105_v62 = vmul.f32 %v8077_v4, %v8136_v16  ;;  %v1106_v40 = vmul.f32 %v8077_v4, %v8157_v42 }
 0x1ee   : > { %v1107_v15 = vmul.f32 %v8077_v4, %v8349_v47  ;;  %v1055_v36 = vadd.f32 %v1023_v58, %v983_v10  ;;  %v1056_v14 = vadd.f32 %v1024_v20, %v984_v50  ;;  %v1108_v37 = vmul.f32 %v8077_v4, %v8364_v38  ;;  %v8432_v20 = vld [vmem:[%s6857_s24 + $0x140] sm:$0xff] }
 0x1ef   : > { %v1057_v61 = vadd.f32 %v1025_v34, %v985_v44  ;;  %v1109_v46 = vmul.f32 %v8077_v4, %v8377_v12  ;;  %v1220_v2 = vrot.slane %v1104_v60, 1  ;;  %v1221_v51 = vrot.slane %v1105_v62, 1  ;;  %v10294_v62 = vld [vmem:[#allocation22_spill] sm:$0xff] }
 0x1f0   : > { %v1223_v19 = vrot.slane %v1106_v40, 1  ;;  %v8391_v35 = vld [vmem:[#allocation2 + $0x50] sm:$0xff]  ;;  %v4042_v25 = vld [vmem:[#allocation2 + $0x58] sm:$0x3]  ;;  %v1225_v1 = vrot.slane %v1107_v15, 1  ;;  %v1226_v55 = vrot.slane %v1108_v37, 1  ;;  %v1352_v5 = vmul.f32 %v8093_v33, %v8129_v53 }
 0x1f1   : > { %v1353_v13 = vmul.f32 %v8093_v33, %v8136_v16  ;;  %v6425_v0 = vpack.i.bf16 %v7822_v39, %v8391_v35  ;;  %v4082_v23 = vrot.slane %v8391_v35, 1  ;;  %v4083_v4 = vrot.slane %v4042_v25, 1  ;;  %v8451_v37 = vld [vmem:[%s6857_s24 + $0x148] sm:$0x3] }
 0x1f2   : > { %v4106_v28 = vrot.slane %v8391_v35, 2  ;;  %v4107_v52 = vrot.slane %v4042_v25, 2  ;;  %v1222_v9 = vsel %vm600_vm2, %v1220_v2, %v1221_v51  ;;  %v1224_v11 = vsel %vm600_vm2, %v1221_v51, %v1223_v19 }
 0x1f3   : > { %v1227_v29 = vsel %vm600_vm2, %v1225_v1, %v1226_v55  ;;  %6426 = vrot.lane.b32.xlu0 %v6425_v0, %s6646_s28  ;;  %v8406_v53 = vsel %vm600_vm2, %v4082_v23, %v4083_v4  ;;  %v1228_v16 = vrot.slane %v1109_v46, 1  ;;  %v1302_v3 = vadd.f32 %v1222_v9, %v1054_v45  ;;  %v10295_v23 = vld [vmem:[#allocation15_spill] sm:$0xff] }
 0x1f4   : > { %10293 = vst [vmem:[#allocation13_spill] sm:$0xff] %v8406_v53  ;;  %v1303_v30 = vadd.f32 %v1224_v11, %v1055_v36  ;;  %v6430_v7 = vpack.i.bf16 %v8091_v21, %v8406_v53  ;;  %v8411_v41 = vsel %vm849_vm3, %v4106_v28, %v4107_v52  ;;  %v1304_v17 = vadd.f32 %v1227_v29, %v1056_v14 }
 0x1f5   : > { %v1354_v56 = vmul.f32 %v8093_v33, %v8157_v42  ;;  %v6435_v8 = vpack.i.bf16 %v8108_v31, %v8411_v41  ;;  %v1229_v57 = vsel %vm600_vm2, %v1226_v55, %v1228_v16  ;;  %v1355_v32 = vmul.f32 %v8093_v33, %v8349_v47 }
 0x1f6   : > { %v1356_v22 = vmul.f32 %v8093_v33, %v8364_v38  ;;  %6431 = vrot.lane.b32.xlu1 %v6430_v7, %s6647_s29  ;;  %v1305_v21 = vadd.f32 %v1229_v57, %v1057_v61  ;;  %v1357_v63 = vmul.f32 %v8093_v33, %v8377_v12  ;;  %v1468_v18 = vrot.slane %v1352_v5, 2 }
 0x1f7   : > { %v1469_v42 = vrot.slane %v1353_v13, 2  ;;  %6436 = vrot.lane.b32.xlu0 %v6435_v8, %s6648_s10  ;;  %v1471_v27 = vrot.slane %v1354_v56, 2  ;;  %v1473_v6 = vrot.slane %v1355_v32, 2  ;;  %v1590_v58 = vmul.f32 %v8131_v54, %v8349_v47 }
 0x1f8   : > { %v1474_v59 = vrot.slane %v1356_v22, 2  ;;  %v1476_v24 = vrot.slane %v1357_v63, 2  ;;  %v1591_v33 = vmul.f32 %v8131_v54, %v8364_v38  ;;  %v1592_v43 = vmul.f32 %v8131_v54, %v8427_v49 }
 0x1f9   : > { %v1470_v34 = vsel %vm849_vm3, %v1468_v18, %v1469_v42  ;;  %v1472_v26 = vsel %vm849_vm3, %v1469_v42, %v1471_v27  ;;  %v1593_v50 = vmul.f32 %v8131_v54, %v8432_v20  ;;  %v1672_v40 = vmul.f32 %v10294_v62, %v8349_v47  ;;  %v10296_v27 = vld [vmem:[#allocation19_spill] sm:$0xff] }
 0x1fa   : > { %v1475_v48 = vsel %vm849_vm3, %v1473_v6, %v1474_v59  ;;  %v1550_v10 = vadd.f32 %v1470_v34, %v1302_v3  ;;  %v1477_v44 = vsel %vm849_vm3, %v1474_v59, %v1476_v24  ;;  %v1551_v60 = vadd.f32 %v1472_v26, %v1303_v30 }
 0x1fb   : > { %v1552_v45 = vadd.f32 %v1475_v48, %v1304_v17  ;;  %v1553_v15 = vadd.f32 %v1477_v44, %v1305_v21  ;;  %v1673_v14 = vmul.f32 %v10294_v62, %v8364_v38  ;;  %v1674_v61 = vmul.f32 %v10294_v62, %v8377_v12 }
 0x1fc   : > { %v1622_v36 = vadd.f32 %v1590_v58, %v1550_v10  ;;  %v1623_v46 = vadd.f32 %v1591_v33, %v1551_v60  ;;  %v1675_v54 = vmul.f32 %v10294_v62, %v8427_v49  ;;  %v1676_v51 = vmul.f32 %v10294_v62, %v8432_v20  ;;  %v10297_v60 = vld [vmem:[#allocation24_spill] sm:$0xff] }
 0x1fd   : > { %v1624_v2 = vadd.f32 %v1592_v43, %v1552_v45  ;;  %v1625_v19 = vadd.f32 %v1593_v50, %v1553_v15  ;;  %v1677_v25 = vmul.f32 %v10294_v62, %v8451_v37  ;;  %v1788_v1 = vrot.slane %v1672_v40, 1  ;;  %v10298_v40 = vld [vmem:[#allocation26_spill] sm:$0xff] }
 0x1fe   : > { %v1789_v55 = vrot.slane %v1673_v14, 1  ;;  %v1791_v5 = vrot.slane %v1674_v61, 1  ;;  %v1793_v13 = vrot.slane %v1675_v54, 1  ;;  %v1794_v0 = vrot.slane %v1676_v51, 1 }
 0x1ff   : > { %v1920_v4 = vmul.f32 %v10295_v23, %v8349_v47  ;;  %v1796_v52 = vrot.slane %v1677_v25, 1  ;;  %v1921_v9 = vmul.f32 %v10295_v23, %v8364_v38  ;;  %v1922_v11 = vmul.f32 %v10295_v23, %v8377_v12 }
 0x200   : > { %v1790_v28 = vsel %vm600_vm2, %v1788_v1, %v1789_v55  ;;  %v1792_v29 = vsel %vm600_vm2, %v1789_v55, %v1791_v5  ;;  %v1795_v16 = vsel %vm600_vm2, %v1793_v13, %v1794_v0  ;;  %v1923_v30 = vmul.f32 %v10295_v23, %v8427_v49 }
 0x201   : > { %v1870_v3 = vadd.f32 %v1790_v28, %v1622_v36  ;;  %v1797_v7 = vsel %vm600_vm2, %v1794_v0, %v1796_v52  ;;  %v1871_v17 = vadd.f32 %v1792_v29, %v1623_v46  ;;  %v1872_v56 = vadd.f32 %v1795_v16, %v1624_v2  ;;  %v10299_v28 = vld [vmem:[#allocation16_spill] sm:$0xff] }
 0x202   : > { %v1924_v8 = vmul.f32 %v10295_v23, %v8432_v20  ;;  %v1873_v57 = vadd.f32 %v1797_v7, %v1625_v19  ;;  %v1925_v32 = vmul.f32 %v10295_v23, %v8451_v37  ;;  %v2036_v22 = vrot.slane %v1920_v4, 2 }
 0x203   : > { %v2037_v21 = vrot.slane %v1921_v9, 2  ;;  %v2039_v63 = vrot.slane %v1922_v11, 2  ;;  %v2041_v18 = vrot.slane %v1923_v30, 2  ;;  %v8477_v6 = vmul.f32 %v10296_v27, %v8349_v47 }
 0x204   : > { %v2042_v42 = vrot.slane %v1924_v8, 2  ;;  %v2044_v58 = vrot.slane %v1925_v32, 2  ;;  %v8482_v34 = vmul.f32 %v10296_v27, %v8364_v38  ;;  %v8486_v24 = vmul.f32 %v10296_v27, %v8427_v49 }
 0x205   : > { %v2038_v59 = vsel %vm849_vm3, %v2036_v22, %v2037_v21  ;;  %v2040_v33 = vsel %vm849_vm3, %v2037_v21, %v2039_v63  ;;  %v8492_v48 = vmul.f32 %v10296_v27, %v8432_v20  ;;  %v8497_v45 = vmul.f32 %v10297_v60, %v8349_v47 }
 0x206   : > { %v2043_v43 = vsel %vm849_vm3, %v2041_v18, %v2042_v42  ;;  %v2118_v26 = vadd.f32 %v2038_v59, %v1870_v3  ;;  %v2045_v10 = vsel %vm849_vm3, %v2042_v42, %v2044_v58  ;;  %v2119_v50 = vadd.f32 %v2040_v33, %v1871_v17 }
 0x207   : > { %v2120_v44 = vadd.f32 %v2043_v43, %v1872_v56  ;;  %v2121_v62 = vadd.f32 %v2045_v10, %v1873_v57  ;;  %v8502_v36 = vmul.f32 %v10297_v60, %v8364_v38  ;;  %v8506_v14 = vmul.f32 %v10297_v60, %v8377_v12 }
 0x208   : > { %v2157_v15 = vadd.f32 %v10298_v40, %v2118_v26  ;;  %v2158_v61 = vadd.f32 %v10298_v40, %v2119_v50  ;;  %v8512_v2 = vmul.f32 %v10297_v60, %v8427_v49  ;;  %v8516_v54 = vmul.f32 %v10297_v60, %v8432_v20 }
 0x209   : > { %v2159_v46 = vadd.f32 %v10298_v40, %v2120_v44  ;;  %v2160_v51 = vadd.f32 %v10298_v40, %v2121_v62  ;;  %v8521_v25 = vmul.f32 %v10297_v60, %v8451_v37  ;;  %v661_v1 = vrot.slane %v8497_v45, 1 }
 0x20a   : > { %v2189_v19 = vmax.f32 %v2157_v15, 0.0  ;;  %v2190_v55 = vmax.f32 %v2158_v61, 0.0  ;;  %v662_v13 = vrot.slane %v8502_v36, 1 }
 0x20b   : > { %v2191_v5 = vmax.f32 %v2159_v46, 0.0  ;;  %v2192_v23 = vmax.f32 %v2160_v51, 0.0 }
 0x20c   : > { %v2573_v4 = vcombine.high %v2189_v19, %v2189_v19  ;;  %v2580_v52 = vrot.slane %v2189_v19, %v10299_v28  ;;  %v2590_v11 = vcombine.high %v2190_v55, %v2190_v55  ;;  %v2597_v29 = vrot.slane %v2190_v55, %v10299_v28 }
 0x20d   : > { %v2607_v16 = vcombine.high %v2191_v5, %v2191_v5  ;;  %v8530_v3 = vrot.slane %v2191_v5, %v10299_v28  ;;  %v2624_v17 = vcombine.high %v2192_v23, %v2192_v23  ;;  %v8534_v56 = vrot.slane %v2192_v23, %v10299_v28 }
 0x20e   : > { %v2587_v30 = vrot.slane %v2573_v4, %v10299_v28  ;;  %v2588_v7 = vcombine.high %v2580_v52, %v2580_v52  ;;  %v2604_v8 = vrot.slane %v2590_v11, %v10299_v28  ;;  %v2605_v57 = vcombine.high %v2597_v29, %v2597_v29 }
 0x20f   : > { %v8538_v32 = vrot.slane %v2607_v16, %v10299_v28  ;;  %v2622_v22 = vcombine.high %v8530_v3, %v8530_v3  ;;  %v8543_v63 = vrot.slane %v2624_v17, %v10299_v28  ;;  %v2639_v18 = vcombine.high %v8534_v56, %v8534_v56 }
 0x210   : > { %v2589_v21 = vcombine.high %v2587_v30, %v2587_v30  ;;  %v3466_v42 = vsel %vm2905_vm0, %v2580_v52, -inf  ;;  %v2606_v27 = vcombine.high %v2604_v8, %v2604_v8  ;;  %v3473_v33 = vsel %vm2905_vm0, %v2588_v7, -inf }
 0x211   : > { %v2623_v59 = vcombine.high %v8538_v32, %v8538_v32  ;;  %v3467_v58 = vrot.slane %v3466_v42, 4  ;;  %v2640_v43 = vcombine.high %v8543_v63, %v8543_v63  ;;  %v3474_v26 = vrot.slane %v3473_v33, 4 }
 0x212   : > { %v3480_v10 = vsel %vm2905_vm0, %v2587_v30, -inf  ;;  %v3487_v50 = vsel %vm2905_vm0, %v2589_v21, -inf  ;;  %v3494_v40 = vsel %vm2905_vm0, %v2597_v29, -inf  ;;  %v3501_v46 = vsel %vm2905_vm0, %v2605_v57, -inf }
 0x213   : > { %v3468_v44 = vmax.f32 %v3466_v42, %v3467_v58  ;;  %v3481_v60 = vrot.slane %v3480_v10, 4  ;;  %v3488_v62 = vrot.slane %v3487_v50, 4  ;;  %v3475_v15 = vmax.f32 %v3473_v33, %v3474_v26 }
 0x214   : > { %v3495_v61 = vrot.slane %v3494_v40, 4  ;;  %v3508_v51 = vsel %vm2905_vm0, %v2604_v8, -inf  ;;  %v3502_v23 = vrot.slane %v3501_v46, 4  ;;  %v3515_v16 = vsel %vm2905_vm0, %v2606_v27, -inf }
 0x215   : > { %v3469_v19 = vrot.slane %v3468_v44, 2  ;;  %v3482_v55 = vmax.f32 %v3480_v10, %v3481_v60  ;;  %v3489_v5 = vmax.f32 %v3487_v50, %v3488_v62  ;;  %v3476_v4 = vrot.slane %v3475_v15, 2 }
 0x216   : > { %v3496_v52 = vmax.f32 %v3494_v40, %v3495_v61  ;;  %v3509_v11 = vrot.slane %v3508_v51, 4  ;;  %v3503_v21 = vmax.f32 %v3501_v46, %v3502_v23  ;;  %v3516_v33 = vrot.slane %v3515_v16, 4 }
 0x217   : > { %v3470_v30 = vmax.f32 %v3468_v44, %v3469_v19  ;;  %v3483_v7 = vrot.slane %v3482_v55, 2  ;;  %v3490_v17 = vrot.slane %v3489_v5, 2  ;;  %v3477_v29 = vmax.f32 %v3475_v15, %v3476_v4 }
 0x218   : > { %v3497_v42 = vrot.slane %v3496_v52, 2  ;;  %v3510_v58 = vmax.f32 %v3508_v51, %v3509_v11  ;;  %v3504_v9 = vrot.slane %v3503_v21, 2  ;;  %v3517_v62 = vmax.f32 %v3515_v16, %v3516_v33 }
 0x219   : > { %v3471_v57 = vrot.slane %v3470_v30, 1  ;;  %v3484_v26 = vmax.f32 %v3482_v55, %v3483_v7  ;;  %v3491_v8 = vmax.f32 %v3489_v5, %v3490_v17  ;;  %v3478_v10 = vrot.slane %v3477_v29, 1 }
 0x21a   : > { %v3498_v50 = vmax.f32 %v3496_v52, %v3497_v42  ;;  %v3511_v60 = vrot.slane %v3510_v58, 2  ;;  %v3505_v44 = vmax.f32 %v3503_v21, %v3504_v9  ;;  %v3518_v23 = vrot.slane %v3517_v62, 2 }
 0x21b   : > { %v8559_v40 = vmax.f32 %v3470_v30, %v3471_v57  ;;  %v3485_v61 = vrot.slane %v3484_v26, 1  ;;  %v3492_v27 = vrot.slane %v3491_v8, 1  ;;  %v8561_v19 = vmax.f32 %v3477_v29, %v3478_v10 }
 0x21c   : > { %v3499_v46 = vrot.slane %v3498_v50, 1  ;;  %v3512_v15 = vmax.f32 %v3510_v58, %v3511_v60  ;;  %v3506_v55 = vrot.slane %v3505_v44, 1  ;;  %v3522_v5 = vsel %vm2905_vm0, %v8530_v3, -inf }
 0x21d   : > { %v8563_v51 = vmax.f32 %v3484_v26, %v3485_v61  ;;  %v8565_v4 = vmax.f32 %v3491_v8, %v3492_v27  ;;  %v3519_v16 = vmax.f32 %v3517_v62, %v3518_v23  ;;  %v3523_v30 = vrot.slane %v3522_v5, 4 }
 0x21e   : > { %v8569_v52 = vmax.f32 %v3498_v50, %v3499_v46  ;;  %v3513_v11 = vrot.slane %v3512_v15, 1  ;;  %v8571_v7 = vmax.f32 %v3505_v44, %v3506_v55  ;;  %v3529_v9 = vsel %vm2905_vm0, %v2622_v22, -inf }
 0x21f   : > { %v3536_v17 = vsel %vm2905_vm0, %v8538_v32, -inf  ;;  %v3543_v21 = vsel %vm2905_vm0, %v2623_v59, -inf  ;;  %v3520_v42 = vrot.slane %v3519_v16, 1  ;;  %v3524_v58 = vmax.f32 %v3522_v5, %v3523_v30 }
 0x220   : > { %v8577_v29 = vmax.f32 %v3512_v15, %v3513_v11  ;;  %v3530_v33 = vrot.slane %v3529_v9, 4  ;;  %v3537_v3 = vrot.slane %v3536_v17, 4  ;;  %v3544_v57 = vrot.slane %v3543_v21, 4 }
 0x221   : > { %v3550_v26 = vsel %vm2905_vm0, %v8534_v56, -inf  ;;  %v3557_v22 = vsel %vm2905_vm0, %v2639_v18, -inf  ;;  %v8585_v8 = vmax.f32 %v3519_v16, %v3520_v42  ;;  %v3525_v32 = vrot.slane %v3524_v58, 2 }
 0x222   : > { %v3531_v10 = vmax.f32 %v3529_v9, %v3530_v33  ;;  %v3551_v59 = vrot.slane %v3550_v26, 4  ;;  %v3538_v50 = vmax.f32 %v3536_v17, %v3537_v3  ;;  %v3545_v60 = vmax.f32 %v3543_v21, %v3544_v57 }
 0x223   : > { %v3558_v62 = vrot.slane %v3557_v22, 4  ;;  %v3564_v61 = vsel %vm2905_vm0, %v8543_v63, -inf  ;;  %v3526_v27 = vmax.f32 %v3524_v58, %v3525_v32  ;;  %v3571_v18 = vsel %vm2905_vm0, %v2640_v43, -inf }
 0x224   : > { %v3532_v44 = vrot.slane %v3531_v10, 2  ;;  %v3552_v46 = vmax.f32 %v3550_v26, %v3551_v59  ;;  %v3565_v15 = vrot.slane %v3564_v61, 4  ;;  %v3539_v23 = vrot.slane %v3538_v50, 2 }
 0x225   : > { %v3546_v55 = vrot.slane %v3545_v60, 2  ;;  %v3559_v56 = vmax.f32 %v3557_v22, %v3558_v62  ;;  %v3527_v5 = vrot.slane %v3526_v27, 1  ;;  %v3572_v42 = vrot.slane %v3571_v18, 4 }
 0x226   : > { %v3533_v11 = vmax.f32 %v3531_v10, %v3532_v44  ;;  %v3553_v16 = vrot.slane %v3552_v46, 2  ;;  %v3566_v30 = vmax.f32 %v3564_v61, %v3565_v15  ;;  %v3540_v9 = vmax.f32 %v3538_v50, %v3539_v23 }
 0x227   : > { %v3547_v17 = vmax.f32 %v3545_v60, %v3546_v55  ;;  %v3560_v21 = vrot.slane %v3559_v56, 2  ;;  %v3528_v58 = vmax.f32 %v3526_v27, %v3527_v5  ;;  %v3573_v59 = vmax.f32 %v3571_v18, %v3572_v42  ;;  %v8624_v42 = vld [vmem:[#allocation4 + $0x2] ss:$0 sm:$0xff] }
 0x228   : > { %v3534_v33 = vrot.slane %v3533_v11, 1  ;;  %v3554_v3 = vmax.f32 %v3552_v46, %v3553_v16  ;;  %v3567_v57 = vrot.slane %v3566_v30, 2  ;;  %v3541_v26 = vrot.slane %v3540_v9, 1 }
 0x229   : > { %v3548_v32 = vrot.slane %v3547_v17, 1  ;;  %v3561_v22 = vmax.f32 %v3559_v56, %v3560_v21  ;;  %v3842_v43 = vmax.f32 %v8559_v40, %v3528_v58  ;;  %v3574_v50 = vrot.slane %v3573_v59, 2 }
 0x22a   : > { %v3535_v62 = vmax.f32 %v3533_v11, %v3534_v33  ;;  %v3555_v63 = vrot.slane %v3554_v3, 1  ;;  %v3568_v0 = vmax.f32 %v3566_v30, %v3567_v57  ;;  %v3542_v10 = vmax.f32 %v3540_v9, %v3541_v26 }
 0x22b   : > { %v3549_v44 = vmax.f32 %v3547_v17, %v3548_v32  ;;  %v3562_v61 = vrot.slane %v3561_v22, 1  ;;  %v663_v46 = vsel %vm600_vm2, %v661_v1, %v662_v13  ;;  %v3575_v55 = vmax.f32 %v3573_v59, %v3574_v50  ;;  %v8651_v32 = vld [vmem:[%s6857_s24 + $0x158] sm:$0xff] }
 0x22c   : > { %v3556_v60 = vmax.f32 %v3554_v3, %v3555_v63  ;;  %v3569_v15 = vrot.slane %v3568_v0, 1  ;;  %v3843_v27 = vmax.f32 %v8561_v19, %v3535_v62  ;;  %v3844_v56 = vmax.f32 %v8563_v51, %v3542_v10 }
 0x22d   : > { %v3563_v23 = vmax.f32 %v3561_v22, %v3562_v61  ;;  %v3845_v40 = vmax.f32 %v8565_v4, %v3549_v44  ;;  %v10300_v16 = vrot.slane %v8506_v14, 1  ;;  %v3576_v45 = vrot.slane %v3575_v55, 1 }
 0x22e   : > { %v3570_v18 = vmax.f32 %v3568_v0, %v3569_v15  ;;  %v3846_v5 = vmax.f32 %v8569_v52, %v3556_v60  ;;  %v3993_v11 = vsel %vm3951_vm4, %v3843_v27, %v3842_v43  ;;  %v667_v51 = vrot.slane %v8516_v54, 1 }
 0x22f   : > { %v665_v19 = vsel %vm600_vm2, %v662_v13, %v10300_v16  ;;  %v3847_v1 = vmax.f32 %v8571_v7, %v3563_v23  ;;  %v3994_v30 = vsel %vm3953_vm5, %v3844_v56, %v3993_v11  ;;  %v669_v52 = vrot.slane %v8521_v25, 1 }
 0x230   : > { %v3848_v4 = vmax.f32 %v8577_v29, %v3570_v18  ;;  %v3995_v0 = vsel %vm3955_vm6, %v3845_v40, %v3994_v30  ;;  %v737_v9 = vadd.f32 %v663_v46, %v8477_v6  ;;  %v3577_v14 = vmax.f32 %v3575_v55, %v3576_v45  ;;  %v8664_v46 = vld [vmem:[%s6857_s24 + $0x160] sm:$0x3]  ;;  %v8666_v40 = vld [vmem:[#allocation4 + $0x4] ss:$0 sm:$0xff] }
 0x231   : > { %v3996_v36 = vsel %vm3957_vm7, %v3846_v5, %v3995_v0  ;;  %v10301_v13 = vrot.slane %v8512_v2, 1  ;;  %v738_v7 = vadd.f32 %v665_v19, %v8482_v34  ;;  %v670_v54 = vsel %vm600_vm2, %v667_v51, %v669_v52 }
 0x232   : > { %v3997_v21 = vsel %vm3959_vm8, %v3847_v1, %v3996_v36  ;;  %v789_v6 = vmul.f32 %v8624_v42, %v8349_v47  ;;  %v3849_v25 = vmax.f32 %v8585_v8, %v3577_v14  ;;  %v740_v58 = vadd.f32 %v670_v54, %v8492_v48  ;;  %v8642_v48 = vld [vmem:[#allocation4 + $0x3] ss:$0 sm:$0xff] }
 0x233   : > { %v668_v17 = vsel %vm600_vm2, %v10301_v13, %v667_v51  ;;  %v3998_v2 = vsel %vm3961_vm9, %v3848_v4, %v3997_v21  ;;  %v790_v34 = vmul.f32 %v8624_v42, %v8364_v38  ;;  %v791_v33 = vmul.f32 %v8624_v42, %v8377_v12  ;;  %v8648_v12 = vld [vmem:[%s6857_s24 + $0x150] sm:$0xff] }
 0x234   : > { %v739_v29 = vadd.f32 %v668_v17, %v8486_v24  ;;  %v792_v24 = vmul.f32 %v8624_v42, %v8427_v49  ;;  %v793_v3 = vmul.f32 %v8624_v42, %v8432_v20  ;;  %v794_v47 = vmul.f32 %v8624_v42, %v8451_v37 }
 0x235   : > { %v3999_v8 = vsel %vm3963_vm10, %v3849_v25, %v3998_v2  ;;  %v910_v57 = vrot.slane %v789_v6, 2  ;;  %v911_v26 = vrot.slane %v790_v34, 2  ;;  %v1026_v38 = vmul.f32 %v8642_v48, %v8427_v49 }
 0x236   : > { %4028 = vst.msk [vmem:[#allocation2 + $0x61] sm:$0xff] %vm3866_vm1, %v3999_v8  ;;  %v913_v22 = vrot.slane %v791_v33, 2  ;;  %v915_v59 = vrot.slane %v792_v24, 2  ;;  %v916_v62 = vrot.slane %v793_v3, 2  ;;  %v918_v63 = vrot.slane %v794_v47, 2 }
 0x237   : > { %v912_v43 = vsel %vm849_vm3, %v910_v57, %v911_v26  ;;  %v1027_v10 = vmul.f32 %v8642_v48, %v8432_v20  ;;  %v1028_v44 = vmul.f32 %v8642_v48, %v8648_v12  ;;  %v1029_v61 = vmul.f32 %v8642_v48, %v8651_v32 }
 0x238   : > { %v914_v50 = vsel %vm849_vm3, %v911_v26, %v913_v22  ;;  %v917_v60 = vsel %vm849_vm3, %v915_v59, %v916_v62  ;;  %v919_v15 = vsel %vm849_vm3, %v916_v62, %v918_v63  ;;  %v986_v27 = vadd.f32 %v912_v43, %v737_v9 }
 0x239   : > { %v987_v23 = vadd.f32 %v914_v50, %v738_v7  ;;  %v988_v55 = vadd.f32 %v917_v60, %v739_v29  ;;  %v989_v56 = vadd.f32 %v919_v15, %v740_v58  ;;  %v1110_v18 = vmul.f32 %v8666_v40, %v8427_v49  ;;  %v8682_v7 = vld [vmem:[#allocation4 + $0x5] ss:$0 sm:$0xff]  ;;  %v10302_v29 = vld [vmem:[#allocation20_spill] sm:$0xff] }
 0x23a   : > { %v1058_v5 = vadd.f32 %v1026_v38, %v986_v27  ;;  %v1111_v11 = vmul.f32 %v8666_v40, %v8432_v20  ;;  %v1112_v16 = vmul.f32 %v8666_v40, %v8451_v37  ;;  %v1113_v19 = vmul.f32 %v8666_v40, %v8648_v12  ;;  %v8720_v27 = vld [vmem:[#allocation4 + $0x6] ss:$0 sm:$0xff] }
 0x23b   : > { %v1059_v45 = vadd.f32 %v1027_v10, %v987_v23  ;;  %v1060_v1 = vadd.f32 %v1028_v44, %v988_v55  ;;  %v1061_v30 = vadd.f32 %v1029_v61, %v989_v56  ;;  %v1114_v51 = vmul.f32 %v8666_v40, %v8651_v32  ;;  %v8718_v61 = vld [vmem:[%s6857_s24 + $0x168] sm:$0xff]  ;;  %v8725_v55 = vld [vmem:[%s6857_s24 + $0x170] sm:$0xff] }
 0x23c   : > { %v1115_v4 = vmul.f32 %v8666_v40, %v8664_v46  ;;  %v1230_v0 = vrot.slane %v1110_v18, 1  ;;  %v1231_v52 = vrot.slane %v1111_v11, 1  ;;  %v1233_v9 = vrot.slane %v1112_v16, 1 }
 0x23d   : > { %v8680_v14 = vld [vmem:[#allocation2 + $0x60] sm:$0xff]  ;;  %v4044_v36 = vld [vmem:[#allocation2 + $0x68] sm:$0x3]  ;;  %v1235_v13 = vrot.slane %v1113_v19, 1  ;;  %v1236_v17 = vrot.slane %v1114_v51, 1  ;;  %v1358_v21 = vmul.f32 %v8682_v7, %v8427_v49  ;;  %v1359_v54 = vmul.f32 %v8682_v7, %v8432_v20 }
 0x23e   : > { %v6440_v6 = vpack.i.bf16 %v10302_v29, %v8680_v14  ;;  %v4085_v25 = vrot.slane %v8680_v14, 1  ;;  %v4086_v2 = vrot.slane %v4044_v36, 1  ;;  %v4109_v58 = vrot.slane %v8680_v14, 2 }
 0x23f   : > { %v4110_v34 = vrot.slane %v4044_v36, 2  ;;  %v1232_v33 = vsel %vm600_vm2, %v1230_v0, %v1231_v52  ;;  %v1234_v24 = vsel %vm600_vm2, %v1231_v52, %v1233_v9  ;;  %v1237_v3 = vsel %vm600_vm2, %v1235_v13, %v1236_v17  ;;  %v8737_v0 = vld [vmem:[#allocation4 + $0x7] ss:$0 sm:$0xff] }
 0x240   : > { %6441 = vrot.lane.b32.xlu1 %v6440_v6, %s6646_s28  ;;  %v8697_v49 = vsel %vm600_vm2, %v4085_v25, %v4086_v2  ;;  %v1238_v20 = vrot.slane %v1115_v4, 1  ;;  %v1306_v47 = vadd.f32 %v1232_v33, %v1058_v5  ;;  %v1307_v8 = vadd.f32 %v1234_v24, %v1059_v45  ;;  %10304 = vst [vmem:[#allocation21_spill] sm:$0xff] %v8737_v0 }
 0x241   : > { %v6445_v57 = vpack.i.bf16 %v8391_v35, %v8697_v49  ;;  %v8702_v26 = vsel %vm849_vm3, %v4109_v58, %v4110_v34  ;;  %v1308_v38 = vadd.f32 %v1237_v3, %v1060_v1  ;;  %v1360_v22 = vmul.f32 %v8682_v7, %v8451_v37 }
 0x242   : > { %10303 = vst [vmem:[#allocation25_spill] sm:$0xff] %v8702_v26  ;;  %v6450_v59 = vpack.i.bf16 %v8406_v53, %v8702_v26  ;;  %v1239_v62 = vsel %vm600_vm2, %v1236_v17, %v1238_v20  ;;  %v1361_v63 = vmul.f32 %v8682_v7, %v8648_v12  ;;  %v1362_v43 = vmul.f32 %v8682_v7, %v8651_v32 }
 0x243   : > { %6446 = vrot.lane.b32.xlu0 %v6445_v57, %s6647_s29  ;;  %v1309_v35 = vadd.f32 %v1239_v62, %v1061_v30  ;;  %v1363_v10 = vmul.f32 %v8682_v7, %v8664_v46  ;;  %v1478_v44 = vrot.slane %v1358_v21, 2  ;;  %v1479_v37 = vrot.slane %v1359_v54, 2  ;;  %v8746_v21 = vld [vmem:[%s6857_s24 + $0x178] sm:$0x3] }
 0x244   : > { %6451 = vrot.lane.b32.xlu1 %v6450_v59, %s6648_s10  ;;  %v1481_v50 = vrot.slane %v1360_v22, 2  ;;  %v1483_v60 = vrot.slane %v1361_v63, 2  ;;  %v1484_v15 = vrot.slane %v1362_v43, 2  ;;  %v1594_v23 = vmul.f32 %v8720_v27, %v8648_v12 }
 0x245   : > { %v1480_v56 = vsel %vm849_vm3, %v1478_v44, %v1479_v37  ;;  %v1486_v18 = vrot.slane %v1363_v10, 2  ;;  %v1595_v5 = vmul.f32 %v8720_v27, %v8651_v32  ;;  %v1596_v11 = vmul.f32 %v8720_v27, %v8718_v61 }
 0x246   : > { %v1482_v16 = vsel %vm849_vm3, %v1479_v37, %v1481_v50  ;;  %v1485_v19 = vsel %vm849_vm3, %v1483_v60, %v1484_v15  ;;  %v1554_v45 = vadd.f32 %v1480_v56, %v1306_v47  ;;  %v1597_v1 = vmul.f32 %v8720_v27, %v8725_v55 }
 0x247   : > { %v1487_v30 = vsel %vm849_vm3, %v1484_v15, %v1486_v18  ;;  %v1555_v51 = vadd.f32 %v1482_v16, %v1307_v8  ;;  %v1556_v4 = vadd.f32 %v1485_v19, %v1308_v38  ;;  %v1678_v52 = vmul.f32 %v8737_v0, %v8648_v12  ;;  %v8754_v8 = vld [vmem:[#allocation4 + $0x8] ss:$0 sm:$0xff]  ;;  %v6529_v19 = vld [vmem:[#allocation4] ss:$0 sm:$0xff] }
 0x248   : > { %v1557_v9 = vadd.f32 %v1487_v30, %v1309_v35  ;;  %v1626_v36 = vadd.f32 %v1594_v23, %v1554_v45  ;;  %v1679_v13 = vmul.f32 %v8737_v0, %v8651_v32  ;;  %v1680_v17 = vmul.f32 %v8737_v0, %v8664_v46  ;;  %10305 = vst [vmem:[#allocation22_spill] sm:$0xff] %v8754_v8 }
 0x249   : > { %v1627_v54 = vadd.f32 %v1595_v5, %v1555_v51  ;;  %v1628_v6 = vadd.f32 %v1596_v11, %v1556_v4  ;;  %v1681_v25 = vmul.f32 %v8737_v0, %v8718_v61  ;;  %v1682_v2 = vmul.f32 %v8737_v0, %v8725_v55 }
 0x24a   : > { %v1629_v58 = vadd.f32 %v1597_v1, %v1557_v9  ;;  %v1683_v34 = vmul.f32 %v8737_v0, %v8746_v21  ;;  %v1798_v33 = vrot.slane %v1678_v52, 1  ;;  %v1799_v24 = vrot.slane %v1679_v13, 1 }
 0x24b   : > { %v1801_v3 = vrot.slane %v1680_v17, 1  ;;  %v1803_v20 = vrot.slane %v1681_v25, 1  ;;  %v1804_v47 = vrot.slane %v1682_v2, 1  ;;  %v1926_v57 = vmul.f32 %v8754_v8, %v8648_v12  ;;  %v6530_v25 = vld [vmem:[#allocation4 + $0x1] ss:$0 sm:$0xff] }
 0x24c   : > { %v1800_v38 = vsel %vm600_vm2, %v1798_v33, %v1799_v24  ;;  %v1806_v22 = vrot.slane %v1683_v34, 1  ;;  %v1927_v59 = vmul.f32 %v8754_v8, %v8651_v32  ;;  %v1928_v62 = vmul.f32 %v8754_v8, %v8664_v46  ;;  %v8794_v34 = vld [vmem:[%s10139_s2] ss:$0 sm:$0xff] }
 0x24d   : > { %v1802_v63 = vsel %vm600_vm2, %v1799_v24, %v1801_v3  ;;  %v1805_v43 = vsel %vm600_vm2, %v1803_v20, %v1804_v47  ;;  %v1874_v35 = vadd.f32 %v1800_v38, %v1626_v36  ;;  %v1929_v10 = vmul.f32 %v8754_v8, %v8718_v61  ;;  %10306 = vst [vmem:[#allocation15_spill] sm:$0xff] %v8794_v34 }
 0x24e   : > { %v1807_v44 = vsel %vm600_vm2, %v1804_v47, %v1806_v22  ;;  %v1875_v37 = vadd.f32 %v1802_v63, %v1627_v54  ;;  %v1876_v50 = vadd.f32 %v1805_v43, %v1628_v6  ;;  %v1930_v60 = vmul.f32 %v8754_v8, %v8725_v55 }
 0x24f   : > { %v1877_v15 = vadd.f32 %v1807_v44, %v1629_v58  ;;  %v1931_v23 = vmul.f32 %v8754_v8, %v8746_v21  ;;  %v2046_v56 = vrot.slane %v1926_v57, 2  ;;  %v2047_v18 = vrot.slane %v1927_v59, 2 }
 0x250   : > { %v2049_v5 = vrot.slane %v1928_v62, 2  ;;  %v2051_v11 = vrot.slane %v1929_v10, 2  ;;  %v2052_v16 = vrot.slane %v1930_v60, 2  ;;  %v8773_v45 = vmul.f32 %v6529_v19, %v8648_v12 }
 0x251   : > { %v2048_v1 = vsel %vm849_vm3, %v2046_v56, %v2047_v18  ;;  %v2054_v30 = vrot.slane %v1931_v23, 2  ;;  %v8777_v51 = vmul.f32 %v6529_v19, %v8651_v32  ;;  %v8780_v4 = vmul.f32 %v6529_v19, %v8718_v61 }
 0x252   : > { %v2050_v52 = vsel %vm849_vm3, %v2047_v18, %v2049_v5  ;;  %v2053_v9 = vsel %vm849_vm3, %v2051_v11, %v2052_v16  ;;  %v2122_v36 = vadd.f32 %v2048_v1, %v1874_v35  ;;  %v8785_v13 = vmul.f32 %v6529_v19, %v8725_v55 }
 0x253   : > { %v2055_v17 = vsel %vm849_vm3, %v2052_v16, %v2054_v30  ;;  %v2123_v54 = vadd.f32 %v2050_v52, %v1875_v37  ;;  %v2124_v6 = vadd.f32 %v2053_v9, %v1876_v50  ;;  %v8789_v2 = vmul.f32 %v6530_v25, %v8648_v12 }
 0x254   : > { %v2125_v58 = vadd.f32 %v2055_v17, %v1877_v15  ;;  %v2161_v33 = vadd.f32 %v8794_v34, %v2122_v36  ;;  %v8798_v24 = vmul.f32 %v6530_v25, %v8651_v32  ;;  %v8801_v3 = vmul.f32 %v6530_v25, %v8664_v46 }
 0x255   : > { %v2162_v20 = vadd.f32 %v8794_v34, %v2123_v54  ;;  %v2163_v47 = vadd.f32 %v8794_v34, %v2124_v6  ;;  %v8806_v57 = vmul.f32 %v6530_v25, %v8718_v61  ;;  %v8809_v38 = vmul.f32 %v6530_v25, %v8725_v55 }
 0x256   : > { %v2164_v22 = vadd.f32 %v8794_v34, %v2125_v58  ;;  %v2193_v59 = vmax.f32 %v2161_v33, 0.0  ;;  %v8813_v62 = vmul.f32 %v6530_v25, %v8746_v21 }
 0x257   : > { %v2194_v43 = vmax.f32 %v2162_v20, 0.0  ;;  %v2195_v35 = vmax.f32 %v2163_v47, 0.0 }
 0x258   : > { %v2196_v37 = vmax.f32 %v2164_v22, 0.0  ;;  %v2641_v50 = vcombine.high %v2193_v59, %v2193_v59  ;;  %v2648_v60 = vrot.slane %v2193_v59, %v10299_v28 }
 0x259   : > { %v2658_v23 = vcombine.high %v2194_v43, %v2194_v43  ;;  %v2665_v56 = vrot.slane %v2194_v43, %v10299_v28  ;;  %v2675_v18 = vcombine.high %v2195_v35, %v2195_v35  ;;  %v8822_v5 = vrot.slane %v2195_v35, %v10299_v28 }
 0x25a   : > { %v2655_v11 = vrot.slane %v2641_v50, %v10299_v28  ;;  %v2656_v16 = vcombine.high %v2648_v60, %v2648_v60  ;;  %v2692_v19 = vcombine.high %v2196_v37, %v2196_v37  ;;  %v8826_v1 = vrot.slane %v2196_v37, %v10299_v28 }
 0x25b   : > { %v2672_v30 = vrot.slane %v2658_v23, %v10299_v28  ;;  %v2673_v52 = vcombine.high %v2665_v56, %v2665_v56  ;;  %v8830_v9 = vrot.slane %v2675_v18, %v10299_v28  ;;  %v2690_v36 = vcombine.high %v8822_v5, %v8822_v5 }
 0x25c   : > { %v2657_v17 = vcombine.high %v2655_v11, %v2655_v11  ;;  %v8835_v54 = vrot.slane %v2692_v19, %v10299_v28  ;;  %v3578_v25 = vsel %vm2905_vm0, %v2648_v60, -inf  ;;  %v3585_v47 = vsel %vm2905_vm0, %v2656_v16, -inf }
 0x25d   : > { %v2674_v58 = vcombine.high %v2672_v30, %v2672_v30  ;;  %v2691_v33 = vcombine.high %v8830_v9, %v8830_v9  ;;  %v3579_v20 = vrot.slane %v3578_v25, 4  ;;  %v3586_v59 = vrot.slane %v3585_v47, 4 }
 0x25e   : > { %v3592_v43 = vsel %vm2905_vm0, %v2655_v11, -inf  ;;  %v3599_v35 = vsel %vm2905_vm0, %v2657_v17, -inf  ;;  %v3606_v60 = vsel %vm2905_vm0, %v2665_v56, -inf  ;;  %v3613_v15 = vsel %vm2905_vm0, %v2673_v52, -inf }
 0x25f   : > { %v3580_v37 = vmax.f32 %v3578_v25, %v3579_v20  ;;  %v3593_v50 = vrot.slane %v3592_v43, 4  ;;  %v3600_v23 = vrot.slane %v3599_v35, 4  ;;  %v3587_v18 = vmax.f32 %v3585_v47, %v3586_v59 }
 0x260   : > { %v3607_v19 = vrot.slane %v3606_v60, 4  ;;  %v3620_v44 = vsel %vm2905_vm0, %v2672_v30, -inf  ;;  %v3614_v22 = vrot.slane %v3613_v15, 4  ;;  %v3627_v17 = vsel %vm2905_vm0, %v2674_v58, -inf }
 0x261   : > { %v3581_v16 = vrot.slane %v3580_v37, 2  ;;  %v3594_v63 = vmax.f32 %v3592_v43, %v3593_v50  ;;  %v3601_v10 = vmax.f32 %v3599_v35, %v3600_v23  ;;  %v3588_v6 = vrot.slane %v3587_v18, 2 }
 0x262   : > { %v3608_v53 = vmax.f32 %v3606_v60, %v3607_v19  ;;  %v3621_v11 = vrot.slane %v3620_v44, 4  ;;  %v3615_v29 = vmax.f32 %v3613_v15, %v3614_v22  ;;  %v3628_v26 = vrot.slane %v3627_v17, 4 }
 0x263   : > { %v3582_v25 = vmax.f32 %v3580_v37, %v3581_v16  ;;  %v3595_v20 = vrot.slane %v3594_v63, 2  ;;  %v3602_v31 = vrot.slane %v3601_v10, 2  ;;  %v3589_v56 = vmax.f32 %v3587_v18, %v3588_v6 }
 0x264   : > { %v3609_v47 = vrot.slane %v3608_v53, 2  ;;  %v3622_v59 = vmax.f32 %v3620_v44, %v3621_v11  ;;  %v3616_v28 = vrot.slane %v3615_v29, 2  ;;  %v3629_v23 = vmax.f32 %v3627_v17, %v3628_v26 }
 0x265   : > { %v3583_v52 = vrot.slane %v3582_v25, 1  ;;  %v3596_v39 = vmax.f32 %v3594_v63, %v3595_v20  ;;  %v3603_v30 = vmax.f32 %v3601_v10, %v3602_v31  ;;  %v3590_v43 = vrot.slane %v3589_v56, 1 }
 0x266   : > { %v3610_v35 = vmax.f32 %v3608_v53, %v3609_v47  ;;  %v3623_v50 = vrot.slane %v3622_v59, 2  ;;  %v3617_v37 = vmax.f32 %v3615_v29, %v3616_v28  ;;  %v3630_v22 = vrot.slane %v3629_v23, 2 }
 0x267   : > { %v8851_v60 = vmax.f32 %v3582_v25, %v3583_v52  ;;  %v3597_v19 = vrot.slane %v3596_v39, 1  ;;  %v3604_v58 = vrot.slane %v3603_v30, 1  ;;  %v8853_v16 = vmax.f32 %v3589_v56, %v3590_v43 }
 0x268   : > { %v3611_v15 = vrot.slane %v3610_v35, 1  ;;  %v3624_v6 = vmax.f32 %v3622_v59, %v3623_v50  ;;  %v3618_v31 = vrot.slane %v3617_v37, 1  ;;  %v3634_v53 = vsel %vm2905_vm0, %v8822_v5, -inf }
 0x269   : > { %v8855_v44 = vmax.f32 %v3596_v39, %v3597_v19  ;;  %v8857_v18 = vmax.f32 %v3603_v30, %v3604_v58  ;;  %v3631_v10 = vmax.f32 %v3629_v23, %v3630_v22  ;;  %v3635_v11 = vrot.slane %v3634_v53, 4 }
 0x26a   : > { %v8861_v63 = vmax.f32 %v3610_v35, %v3611_v15  ;;  %v3625_v26 = vrot.slane %v3624_v6, 1  ;;  %v8863_v17 = vmax.f32 %v3617_v37, %v3618_v31  ;;  %v3641_v28 = vsel %vm2905_vm0, %v2690_v36, -inf }
 0x26b   : > { %v3648_v29 = vsel %vm2905_vm0, %v8830_v9, -inf  ;;  %v3655_v39 = vsel %vm2905_vm0, %v2691_v33, -inf  ;;  %v3632_v20 = vrot.slane %v3631_v10, 1  ;;  %v3636_v56 = vmax.f32 %v3634_v53, %v3635_v11 }
 0x26c   : > { %v8869_v25 = vmax.f32 %v3624_v6, %v3625_v26  ;;  %v3642_v47 = vrot.slane %v3641_v28, 4  ;;  %v3649_v5 = vrot.slane %v3648_v29, 4  ;;  %v3656_v59 = vrot.slane %v3655_v39, 4 }
 0x26d   : > { %v3662_v52 = vsel %vm2905_vm0, %v8826_v1, -inf  ;;  %v10307_v30 = vcombine.high %v8826_v1, %v8826_v1  ;;  %v8877_v43 = vmax.f32 %v3631_v10, %v3632_v20  ;;  %v3637_v9 = vrot.slane %v3636_v56, 2 }
 0x26e   : > { %v3643_v35 = vmax.f32 %v3641_v28, %v3642_v47  ;;  %v3663_v33 = vrot.slane %v3662_v52, 4  ;;  %v3650_v50 = vmax.f32 %v3648_v29, %v3649_v5  ;;  %v3657_v23 = vmax.f32 %v3655_v39, %v3656_v59 }
 0x26f   : > { %v3669_v36 = vsel %vm2905_vm0, %v10307_v30, -inf  ;;  %v3676_v58 = vsel %vm2905_vm0, %v8835_v54, -inf  ;;  %v3638_v37 = vmax.f32 %v3636_v56, %v3637_v9  ;;  %v10308_v26 = vcombine.high %v8835_v54, %v8835_v54 }
 0x270   : > { %v3670_v19 = vrot.slane %v3669_v36, 4  ;;  %v3644_v15 = vrot.slane %v3643_v35, 2  ;;  %v3664_v6 = vmax.f32 %v3662_v52, %v3663_v33  ;;  %v3677_v22 = vrot.slane %v3676_v58, 4 }
 0x271   : > { %v3651_v31 = vrot.slane %v3650_v50, 2  ;;  %v3658_v53 = vrot.slane %v3657_v23, 2  ;;  %v3683_v10 = vsel %vm2905_vm0, %v10308_v26, -inf  ;;  %v3639_v11 = vrot.slane %v3638_v37, 1 }
 0x272   : > { %v3671_v1 = vmax.f32 %v3669_v36, %v3670_v19  ;;  %v3645_v28 = vmax.f32 %v3643_v35, %v3644_v15  ;;  %v3665_v29 = vrot.slane %v3664_v6, 2  ;;  %v3678_v39 = vmax.f32 %v3676_v58, %v3677_v22 }
 0x273   : > { %v3652_v20 = vmax.f32 %v3650_v50, %v3651_v31  ;;  %v3659_v47 = vmax.f32 %v3657_v23, %v3658_v53  ;;  %v3684_v59 = vrot.slane %v3683_v10, 4  ;;  %v3640_v56 = vmax.f32 %v3638_v37, %v3639_v11 }
 0x274   : > { %v3672_v5 = vrot.slane %v3671_v1, 2  ;;  %v3646_v30 = vrot.slane %v3645_v28, 1  ;;  %v3666_v52 = vmax.f32 %v3664_v6, %v3665_v29  ;;  %v3679_v9 = vrot.slane %v3678_v39, 2 }
 0x275   : > { %v3653_v33 = vrot.slane %v3652_v20, 1  ;;  %v3660_v34 = vrot.slane %v3659_v47, 1  ;;  %v3685_v19 = vmax.f32 %v3683_v10, %v3684_v59  ;;  %v3850_v26 = vmax.f32 %v8851_v60, %v3640_v56 }
 0x276   : > { %v3673_v36 = vmax.f32 %v3671_v1, %v3672_v5  ;;  %v3647_v8 = vmax.f32 %v3645_v28, %v3646_v30  ;;  %v3667_v54 = vrot.slane %v3666_v52, 1  ;;  %v3680_v0 = vmax.f32 %v3678_v39, %v3679_v9 }
 0x277   : > { %v3654_v35 = vmax.f32 %v3652_v20, %v3653_v33  ;;  %v3661_v15 = vmax.f32 %v3659_v47, %v3660_v34  ;;  %v3686_v50 = vrot.slane %v3685_v19, 2  ;;  %v10309_v6 = vrot.slane %v8798_v24, 1 }
 0x278   : > { %v3674_v58 = vrot.slane %v3673_v36, 1  ;;  %v3668_v23 = vmax.f32 %v3666_v52, %v3667_v54  ;;  %v3681_v22 = vrot.slane %v3680_v0, 1  ;;  %v3851_v37 = vmax.f32 %v8853_v16, %v3647_v8 }
 0x279   : > { %v10310_v31 = vrot.slane %v8789_v2, 1  ;;  %v3687_v10 = vmax.f32 %v3685_v19, %v3686_v50  ;;  %v3852_v11 = vmax.f32 %v8855_v44, %v3654_v35  ;;  %v3853_v60 = vmax.f32 %v8857_v18, %v3661_v15 }
 0x27a   : > { %v3675_v1 = vmax.f32 %v3673_v36, %v3674_v58  ;;  %v3682_v28 = vmax.f32 %v3680_v0, %v3681_v22  ;;  %v3854_v34 = vmax.f32 %v8861_v63, %v3668_v23  ;;  %v4000_v29 = vsel %vm3951_vm4, %v3851_v37, %v3850_v26 }
 0x27b   : > { %v673_v53 = vsel %vm600_vm2, %v10310_v31, %v10309_v6  ;;  %v10311_v39 = vrot.slane %v8801_v3, 1  ;;  %v10312_v8 = vmov %v10309_v6  ;;  %v3688_v2 = vrot.slane %v3687_v10, 1 }
 0x27c   : > { %v3855_v20 = vmax.f32 %v8863_v17, %v3675_v1  ;;  %v4001_v47 = vsel %vm3953_vm5, %v3852_v11, %v4000_v29  ;;  %v677_v44 = vrot.slane %v8809_v38, 1  ;;  %v3856_v18 = vmax.f32 %v8869_v25, %v3682_v28 }
 0x27d   : > { %v675_v16 = vsel %vm600_vm2, %v10312_v8, %v10311_v39  ;;  %v4002_v0 = vsel %vm3955_vm6, %v3853_v60, %v4001_v47  ;;  %v679_v63 = vrot.slane %v8813_v62, 1  ;;  %v741_v3 = vadd.f32 %v673_v53, %v8773_v45  ;;  %v8952_v53 = vld [vmem:[%s6857_s24 + $0x190] sm:$0x3] }
 0x27e   : > { %v3689_v5 = vmax.f32 %v3687_v10, %v3688_v2  ;;  %v4003_v24 = vsel %vm3957_vm7, %v3854_v34, %v4002_v0  ;;  %v10313_v59 = vrot.slane %v8806_v57, 1  ;;  %v742_v56 = vadd.f32 %v675_v16, %v8777_v51  ;;  %v8924_v51 = vld [vmem:[%s6857_s24 + $0x180] sm:$0xff] }
 0x27f   : > { %v4004_v38 = vsel %vm3959_vm8, %v3855_v20, %v4003_v24  ;;  %v680_v25 = vsel %vm600_vm2, %v677_v44, %v679_v63  ;;  %v795_v62 = vmul.f32 %v8624_v42, %v8648_v12  ;;  %v796_v9 = vmul.f32 %v8624_v42, %v8651_v32 }
 0x280   : > { %v678_v17 = vsel %vm600_vm2, %v10313_v59, %v677_v44  ;;  %v3857_v45 = vmax.f32 %v8877_v43, %v3689_v5  ;;  %v4005_v52 = vsel %vm3961_vm9, %v3856_v18, %v4004_v38  ;;  %v744_v57 = vadd.f32 %v680_v25, %v8785_v13 }
 0x281   : > { %v743_v30 = vadd.f32 %v678_v17, %v8780_v4  ;;  %v797_v33 = vmul.f32 %v8624_v42, %v8664_v46  ;;  %v798_v4 = vmul.f32 %v8624_v42, %v8718_v61  ;;  %v799_v12 = vmul.f32 %v8624_v42, %v8725_v55  ;;  %v8939_v46 = vld [vmem:[%s6857_s24 + $0x188] sm:$0xff] }
 0x282   : > { %v800_v43 = vmul.f32 %v8624_v42, %v8746_v21  ;;  %v4006_v36 = vsel %vm3963_vm10, %v3857_v45, %v4005_v52  ;;  %v920_v13 = vrot.slane %v795_v62, 2  ;;  %v921_v19 = vrot.slane %v796_v9, 2 }
 0x283   : > { %v1030_v32 = vmul.f32 %v8642_v48, %v8718_v61  ;;  %4029 = vst.msk [vmem:[#allocation2 + $0x71] sm:$0xff] %vm3866_vm1, %v4006_v36  ;;  %v923_v54 = vrot.slane %v797_v33, 2  ;;  %v925_v26 = vrot.slane %v798_v4, 2  ;;  %v926_v35 = vrot.slane %v799_v12, 2  ;;  %v422_v36 = vld [vmem:[%s6857_s24 + $0x198] sm:$0xff] }
 0x284   : > { %v928_v15 = vrot.slane %v800_v43, 2  ;;  %v922_v58 = vsel %vm849_vm3, %v920_v13, %v921_v19  ;;  %v1031_v42 = vmul.f32 %v8642_v48, %v8725_v55  ;;  %v1032_v50 = vmul.f32 %v8642_v48, %v8924_v51 }
 0x285   : > { %v1033_v23 = vmul.f32 %v8642_v48, %v8939_v46  ;;  %v924_v22 = vsel %vm849_vm3, %v921_v19, %v923_v54  ;;  %v927_v37 = vsel %vm849_vm3, %v925_v26, %v926_v35  ;;  %v990_v31 = vadd.f32 %v922_v58, %v741_v3 }
 0x286   : > { %v929_v6 = vsel %vm849_vm3, %v926_v35, %v928_v15  ;;  %v991_v1 = vadd.f32 %v924_v22, %v742_v56  ;;  %v992_v10 = vadd.f32 %v927_v37, %v743_v30  ;;  %v1116_v60 = vmul.f32 %v8666_v40, %v8718_v61 }
 0x287   : > { %v993_v11 = vadd.f32 %v929_v6, %v744_v57  ;;  %v1062_v28 = vadd.f32 %v1030_v32, %v990_v31  ;;  %v1117_v34 = vmul.f32 %v8666_v40, %v8725_v55  ;;  %v1118_v48 = vmul.f32 %v8666_v40, %v8746_v21 }
 0x288   : > { %v1119_v29 = vmul.f32 %v8666_v40, %v8924_v51  ;;  %v1063_v39 = vadd.f32 %v1031_v42, %v991_v1  ;;  %v1064_v8 = vadd.f32 %v1032_v50, %v992_v10  ;;  %v1120_v2 = vmul.f32 %v8666_v40, %v8939_v46  ;;  %v423_v50 = vld [vmem:[%s6857_s24 + $0x1a0] sm:$0xff] }
 0x289   : > { %v1065_v16 = vadd.f32 %v1033_v23, %v993_v11  ;;  %v1121_v20 = vmul.f32 %v8666_v40, %v8952_v53  ;;  %v1240_v47 = vrot.slane %v1116_v60, 1  ;;  %v1241_v44 = vrot.slane %v1117_v34, 1  ;;  %v424_v11 = vld [vmem:[%s6857_s24 + $0x1a8] sm:$0x3] }
 0x28a   : > { %v1243_v18 = vrot.slane %v1118_v48, 1  ;;  %v8966_v0 = vld [vmem:[#allocation2 + $0x70] sm:$0xff]  ;;  %v4046_v63 = vld [vmem:[#allocation2 + $0x78] sm:$0x3]  ;;  %v1245_v3 = vrot.slane %v1119_v29, 1  ;;  %v1246_v5 = vrot.slane %v1120_v2, 1  ;;  %v1364_v24 = vmul.f32 %v8682_v7, %v8718_v61 }
 0x28b   : > { %v1365_v59 = vmul.f32 %v8682_v7, %v8725_v55  ;;  %v6455_v17 = vpack.i.bf16 %v8411_v41, %v8966_v0  ;;  %v4088_v56 = vrot.slane %v8966_v0, 1  ;;  %v4089_v40 = vrot.slane %v4046_v63, 1  ;;  %v10314_v48 = vld [vmem:[#allocation21_spill] sm:$0xff] }
 0x28c   : > { %v4112_v38 = vrot.slane %v8966_v0, 2  ;;  %v4113_v25 = vrot.slane %v4046_v63, 2  ;;  %v1242_v30 = vsel %vm600_vm2, %v1240_v47, %v1241_v44  ;;  %v1244_v62 = vsel %vm600_vm2, %v1241_v44, %v1243_v18 }
 0x28d   : > { %v1247_v45 = vsel %vm600_vm2, %v1245_v3, %v1246_v5  ;;  %6456 = vrot.lane.b32.xlu0 %v6455_v17, %s6646_s28  ;;  %v8981_v61 = vsel %vm600_vm2, %v4088_v56, %v4089_v40  ;;  %v1248_v55 = vrot.slane %v1121_v20, 1  ;;  %v1310_v52 = vadd.f32 %v1242_v30, %v1062_v28  ;;  %v10315_v56 = vld [vmem:[#allocation22_spill] sm:$0xff] }
 0x28e   : > { %v1311_v57 = vadd.f32 %v1244_v62, %v1063_v39  ;;  %v6460_v9 = vpack.i.bf16 %v8680_v14, %v8981_v61  ;;  %v8986_v33 = vsel %vm849_vm3, %v4112_v38, %v4113_v25  ;;  %v1312_v4 = vadd.f32 %v1247_v45, %v1064_v8 }
 0x28f   : > { %v1366_v12 = vmul.f32 %v8682_v7, %v8746_v21  ;;  %v6465_v43 = vpack.i.bf16 %v8697_v49, %v8986_v33  ;;  %v1249_v13 = vsel %vm600_vm2, %v1246_v5, %v1248_v55  ;;  %v1367_v19 = vmul.f32 %v8682_v7, %v8924_v51 }
 0x290   : > { %v1368_v14 = vmul.f32 %v8682_v7, %v8939_v46  ;;  %6461 = vrot.lane.b32.xlu1 %v6460_v9, %s6647_s29  ;;  %v1313_v32 = vadd.f32 %v1249_v13, %v1065_v16  ;;  %v1369_v54 = vmul.f32 %v8682_v7, %v8952_v53  ;;  %v1488_v21 = vrot.slane %v1364_v24, 2 }
 0x291   : > { %v1489_v26 = vrot.slane %v1365_v59, 2  ;;  %6466 = vrot.lane.b32.xlu0 %v6465_v43, %s6648_s10  ;;  %v1491_v35 = vrot.slane %v1366_v12, 2  ;;  %v1493_v15 = vrot.slane %v1367_v19, 2  ;;  %v1598_v42 = vmul.f32 %v8720_v27, %v8924_v51  ;;  %v9035_v12 = vld [vmem:[#allocation2 + $0x90] sm:$0xff] }
 0x292   : > { %v1494_v58 = vrot.slane %v1368_v14, 2  ;;  %v1496_v22 = vrot.slane %v1369_v54, 2  ;;  %v1599_v37 = vmul.f32 %v8720_v27, %v8939_v46  ;;  %v1600_v7 = vmul.f32 %v8720_v27, %v422_v36 }
 0x293   : > { %v1490_v23 = vsel %vm849_vm3, %v1488_v21, %v1489_v26  ;;  %v1492_v6 = vsel %vm849_vm3, %v1489_v26, %v1491_v35  ;;  %v1601_v10 = vmul.f32 %v8720_v27, %v423_v50  ;;  %v1684_v29 = vmul.f32 %v10314_v48, %v8924_v51  ;;  %v9044_v26 = vld [vmem:[#allocation2 + $0x98] sm:$0x3]  ;;  %v4333_v35 = vld [vmem:[%s10140_s3] sm:$0xff] }
 0x294   : > { %v1495_v31 = vsel %vm849_vm3, %v1493_v15, %v1494_v58  ;;  %v1558_v1 = vadd.f32 %v1490_v23, %v1310_v52  ;;  %v1497_v60 = vsel %vm849_vm3, %v1494_v58, %v1496_v22  ;;  %v1559_v28 = vadd.f32 %v1492_v6, %v1311_v57  ;;  %v4334_v15 = vld [vmem:[%s10140_s3 + $0x8] sm:$0xff]  ;;  %v4351_v23 = vld [vmem:[%s10140_s3 + $0x90] sm:$0xff]  ;;  %v4352_v22 = vld [vmem:[%s10140_s3 + $0x98] sm:$0xff] }
 0x295   : > { %v1560_v34 = vadd.f32 %v1495_v31, %v1312_v4  ;;  %v1561_v39 = vadd.f32 %v1497_v60, %v1313_v32  ;;  %v1685_v16 = vmul.f32 %v10314_v48, %v8939_v46  ;;  %v1686_v2 = vmul.f32 %v10314_v48, %v8952_v53  ;;  %v4354_v60 = vld [vmem:[%s10140_s3 + $0xa8] sm:$0xff] }
 0x296   : > { %v1630_v8 = vadd.f32 %v1598_v42, %v1558_v1  ;;  %v1631_v20 = vadd.f32 %v1599_v37, %v1559_v28  ;;  %v1687_v27 = vmul.f32 %v10314_v48, %v422_v36  ;;  %v1688_v44 = vmul.f32 %v10314_v48, %v423_v50  ;;  %v4335_v37 = vld [vmem:[%s10140_s3 + $0x10] sm:$0xff] }
 0x297   : > { %v1632_v47 = vadd.f32 %v1600_v7, %v1560_v34  ;;  %v1633_v18 = vadd.f32 %v1601_v10, %v1561_v39  ;;  %v1689_v63 = vmul.f32 %v10314_v48, %v424_v11  ;;  %v1808_v3 = vrot.slane %v1684_v29, 1  ;;  %v4336_v10 = vld [vmem:[%s10140_s3 + $0x18] sm:$0xff]  ;;  %v4337_v39 = vld [vmem:[%s10140_s3 + $0x20] sm:$0xff] }
 0x298   : > { %v1809_v5 = vrot.slane %v1685_v16, 1  ;;  %v1811_v24 = vrot.slane %v1686_v2, 1  ;;  %v1813_v59 = vrot.slane %v1687_v27, 1  ;;  %v1814_v17 = vrot.slane %v1688_v44, 1  ;;  %v4355_v16 = vld [vmem:[%s10140_s3 + $0xb0] sm:$0xff] }
 0x299   : > { %v1932_v40 = vmul.f32 %v10315_v56, %v8924_v51  ;;  %v1816_v25 = vrot.slane %v1689_v63, 1  ;;  %v1933_v30 = vmul.f32 %v10315_v56, %v8939_v46  ;;  %v1934_v62 = vmul.f32 %v10315_v56, %v8952_v53  ;;  %v4349_v53 = vld [vmem:[%s10140_s3 + $0x80] sm:$0xff]  ;;  %v9093_v63 = vld [vmem:[%s10140_s3 + $0x30] sm:$0xff] }
 0x29a   : > { %v1810_v38 = vsel %vm600_vm2, %v1808_v3, %v1809_v5  ;;  %v1812_v45 = vsel %vm600_vm2, %v1809_v5, %v1811_v24  ;;  %v1815_v55 = vsel %vm600_vm2, %v1813_v59, %v1814_v17  ;;  %v1935_v52 = vmul.f32 %v10315_v56, %v422_v36  ;;  %v4350_v36 = vld [vmem:[%s10140_s3 + $0x88] sm:$0xff]  ;;  %v9098_v3 = vld [vmem:[%s10140_s3 + $0x38] sm:$0xff] }
 0x29b   : > { %v1817_v57 = vsel %vm600_vm2, %v1814_v17, %v1816_v25  ;;  %v1878_v9 = vadd.f32 %v1810_v38, %v1630_v8  ;;  %v1879_v4 = vadd.f32 %v1812_v45, %v1631_v20  ;;  %v1936_v51 = vmul.f32 %v10315_v56, %v423_v50  ;;  %v4338_v8 = vld [vmem:[%s10140_s3 + $0x28] sm:$0xff]  ;;  %v10316_v20 = vld [vmem:[#allocation15_spill] sm:$0xff] }
 0x29c   : > { %v1880_v43 = vadd.f32 %v1815_v55, %v1632_v47  ;;  %v1937_v46 = vmul.f32 %v10315_v56, %v424_v11  ;;  %v2056_v13 = vrot.slane %v1932_v40, 2  ;;  %v2057_v19 = vrot.slane %v1933_v30, 2  ;;  %v4353_v11 = vld [vmem:[%s10140_s3 + $0xa0] sm:$0xff]  ;;  %v9111_v40 = vld [vmem:[%s10140_s3 + $0xc8] sm:$0xff] }
 0x29d   : > { %v1881_v14 = vadd.f32 %v1817_v57, %v1633_v18  ;;  %v2059_v32 = vrot.slane %v1934_v62, 2  ;;  %v2061_v54 = vrot.slane %v1935_v52, 2  ;;  %v2062_v21 = vrot.slane %v1936_v51, 2  ;;  %v4356_v18 = vld [vmem:[%s10140_s3 + $0xb8] sm:$0xff]  ;;  %v9106_v56 = vld [vmem:[%s10140_s3 + $0xc0] sm:$0xff] }
 0x29e   : > { %v2058_v58 = vsel %vm849_vm3, %v2056_v13, %v2057_v19  ;;  %v2064_v42 = vrot.slane %v1937_v46, 2  ;;  %v4133_v50 = vrot.slane %v9035_v12, 1  ;;  %v6127_v1 = vpack.c.bf16 %v4350_v36, %v4349_v53  ;;  %v10317_v51 = vld [vmem:[#allocation16_spill] sm:$0xff] }
 0x29f   : > { %v2060_v7 = vsel %vm849_vm3, %v2057_v19, %v2059_v32  ;;  %v2063_v6 = vsel %vm849_vm3, %v2061_v54, %v2062_v21  ;;  %v2126_v31 = vadd.f32 %v2058_v58, %v1878_v9  ;;  %v6485_v29 = vpack.i.bf16 %v8986_v33, %v9035_v12  ;;  %v9122_v13 = vld [vmem:[%s10140_s3 + $0x40] sm:$0xff]  ;;  %v9127_v19 = vld [vmem:[%s10140_s3 + $0x48] sm:$0xff] }
 0x2a0   : > { %v2065_v28 = vsel %vm849_vm3, %v2062_v21, %v2064_v42  ;;  %v2127_v34 = vadd.f32 %v2060_v7, %v1879_v4  ;;  %v2128_v48 = vadd.f32 %v2063_v6, %v1880_v43  ;;  %6128 = vmatprep.subr.bf16.mxu0 %v6127_v1  ;;  %v6129_v27 = vpack.c.bf16 %v4334_v15, %v4333_v35 }
 0x2a1   : > { %v2129_v2 = vadd.f32 %v2065_v28, %v1881_v14  ;;  %v2165_v47 = vadd.f32 %v10316_v20, %v2126_v31  ;;  %v6131_v44 = vpack.c.bf16 %v4352_v22, %v4351_v23  ;;  %v4134_v59 = vrot.slane %v9044_v26, 1 }
 0x2a2   : > { %v2166_v5 = vadd.f32 %v10316_v20, %v2127_v34  ;;  %v2167_v24 = vadd.f32 %v10316_v20, %v2128_v48  ;;  %v6133_v17 = vpack.c.bf16 %v4336_v10, %v4335_v37  ;;  %6130 = vmatpush3.bf16.msra.mxu0 %v6129_v27  ;;  %v6135_v30 = vpack.c.bf16 %v4354_v60, %v4353_v11 }
 0x2a3   : > { %v2168_v38 = vadd.f32 %v10316_v20, %v2129_v2  ;;  %v2197_v25 = vmax.f32 %v2165_v47, 0.0  ;;  %v6137_v62 = vpack.c.bf16 %v4338_v8, %v4337_v39  ;;  %6132 = vmatprep.subr.bf16.mxu0 %v6131_v44  ;;  %v6139_v52 = vpack.c.bf16 %v4356_v18, %v4355_v16 }
 0x2a4   : > { %v2198_v45 = vmax.f32 %v2166_v5, 0.0  ;;  %v2199_v55 = vmax.f32 %v2167_v24, 0.0  ;;  %v6141_v57 = vpack.c.bf16 %v9098_v3, %v9093_v63  ;;  %v6143_v46 = vpack.c.bf16 %v9111_v40, %v9106_v56 }
 0x2a5   : > { %v2200_v9 = vmax.f32 %v2168_v38, 0.0  ;;  %v2709_v4 = vcombine.high %v2197_v25, %v2197_v25  ;;  %v2716_v43 = vrot.slane %v2197_v25, %v10317_v51  ;;  %v6145_v22 = vpack.c.bf16 %v9127_v19, %v9122_v13 }
 0x2a6   : > { %v2726_v53 = vcombine.high %v2198_v45, %v2198_v45  ;;  %v2733_v36 = vrot.slane %v2198_v45, %v10317_v51  ;;  %v2743_v14 = vcombine.high %v2199_v55, %v2199_v55  ;;  %v9131_v32 = vrot.slane %v2199_v55, %v10317_v51  ;;  %6134 = vmatpush3.bf16.msra.mxu0 %v6133_v17  ;;  %v9159_v17 = vpop.permute.xlu0 %6376 }
 0x2a7   : > { %v2723_v54 = vrot.slane %v2709_v4, %v10317_v51  ;;  %v2724_v21 = vcombine.high %v2716_v43, %v2716_v43  ;;  %v2760_v35 = vcombine.high %v2200_v9, %v2200_v9  ;;  %v9135_v15 = vrot.slane %v2200_v9, %v10317_v51  ;;  %6136 = vmatprep.subr.bf16.mxu0 %v6135_v30 }
 0x2a8   : > { %v2740_v58 = vrot.slane %v2726_v53, %v10317_v51  ;;  %v2741_v42 = vcombine.high %v2733_v36, %v2733_v36  ;;  %v9139_v23 = vrot.slane %v2743_v14, %v10317_v51  ;;  %v2758_v7 = vcombine.high %v9131_v32, %v9131_v32  ;;  %v9162_v14 = vpop.permute.xlu1 %6386 }
 0x2a9   : > { %v2725_v37 = vcombine.high %v2723_v54, %v2723_v54  ;;  %v9146_v6 = vrot.slane %v2760_v35, %v10317_v51  ;;  %v3690_v31 = vsel %vm2905_vm0, %v2716_v43, -inf  ;;  %v2775_v10 = vcombine.high %v9135_v15, %v9135_v15 }
 0x2aa   : > { %v2742_v1 = vcombine.high %v2740_v58, %v2740_v58  ;;  %v3691_v11 = vrot.slane %v3690_v31, 4  ;;  %v3697_v60 = vsel %vm2905_vm0, %v2724_v21, -inf  ;;  %v2759_v28 = vcombine.high %v9139_v23, %v9139_v23  ;;  %6138 = vmatpush3.bf16.msra.mxu0 %v6137_v62 }
 0x2ab   : > { %v3698_v34 = vrot.slane %v3697_v60, 4  ;;  %v3704_v48 = vsel %vm2905_vm0, %v2723_v54, -inf  ;;  %v3711_v39 = vsel %vm2905_vm0, %v2725_v37, -inf  ;;  %v3718_v20 = vsel %vm2905_vm0, %v2733_v36, -inf  ;;  %6140 = vmatprep.subr.bf16.mxu0 %v6139_v52 }
 0x2ac   : > { %v3692_v8 = vmax.f32 %v3690_v31, %v3691_v11  ;;  %v3705_v16 = vrot.slane %v3704_v48, 4  ;;  %v3712_v2 = vrot.slane %v3711_v39, 4  ;;  %v3719_v27 = vrot.slane %v3718_v20, 4  ;;  %v9166_v31 = vpop.permute.xlu0 %6381 }
 0x2ad   : > { %v3699_v47 = vmax.f32 %v3697_v60, %v3698_v34  ;;  %v3725_v44 = vsel %vm2905_vm0, %v2741_v42, -inf  ;;  %v3732_v18 = vsel %vm2905_vm0, %v2740_v58, -inf  ;;  %v3739_v25 = vsel %vm2905_vm0, %v2742_v1, -inf }
 0x2ae   : > { %v3693_v63 = vrot.slane %v3692_v8, 2  ;;  %v3706_v3 = vmax.f32 %v3704_v48, %v3705_v16  ;;  %v3713_v5 = vmax.f32 %v3711_v39, %v3712_v2  ;;  %v3726_v24 = vrot.slane %v3725_v44, 4  ;;  %6142 = vmatpush3.bf16.msra.mxu0 %v6141_v57 }
 0x2af   : > { %v3700_v56 = vrot.slane %v3699_v47, 2  ;;  %v3720_v40 = vmax.f32 %v3718_v20, %v3719_v27  ;;  %v3733_v38 = vrot.slane %v3732_v18, 4  ;;  %6144 = vmatprep.subr.bf16.mxu0 %v6143_v46  ;;  %v3740_v43 = vrot.slane %v3739_v25, 4 }
 0x2b0   : > { %v3694_v30 = vmax.f32 %v3692_v8, %v3693_v63  ;;  %v3707_v62 = vrot.slane %v3706_v3, 2  ;;  %v3714_v45 = vrot.slane %v3713_v5, 2  ;;  %v3727_v55 = vmax.f32 %v3725_v44, %v3726_v24 }
 0x2b1   : > { %v3701_v52 = vmax.f32 %v3699_v47, %v3700_v56  ;;  %v3721_v9 = vrot.slane %v3720_v40, 2  ;;  %v3734_v4 = vmax.f32 %v3732_v18, %v3733_v38  ;;  %v3741_v58 = vmax.f32 %v3739_v25, %v3740_v43  ;;  %v9204_v25 = vpop.permute.xlu0 %6396 }
 0x2b2   : > { %v3695_v13 = vrot.slane %v3694_v30, 1  ;;  %v3708_v19 = vmax.f32 %v3706_v3, %v3707_v62  ;;  %v3715_v53 = vmax.f32 %v3713_v5, %v3714_v45  ;;  %v3728_v36 = vrot.slane %v3727_v55, 2  ;;  %6146 = vmatpush3.bf16.msra.mxu0 %v6145_v22  ;;  %v9192_v3 = vpop.permute.xlu1 %6391 }
 0x2b3   : > { %v3702_v54 = vrot.slane %v3701_v52, 1  ;;  %v3722_v21 = vmax.f32 %v3720_v40, %v3721_v9  ;;  %v3735_v35 = vrot.slane %v3734_v4, 2  ;;  %v2776_v57 = vcombine.high %v9146_v6, %v9146_v6 }
 0x2b4   : > { %v3709_v42 = vrot.slane %v3708_v19, 1  ;;  %v3716_v46 = vrot.slane %v3715_v53, 1  ;;  %v3729_v37 = vmax.f32 %v3727_v55, %v3728_v36  ;;  %v9168_v1 = vmax.f32 %v3694_v30, %v3695_v13 }
 0x2b5   : > { %v3723_v11 = vrot.slane %v3722_v21, 1  ;;  %v3736_v60 = vmax.f32 %v3734_v4, %v3735_v35  ;;  %v3742_v34 = vrot.slane %v3741_v58, 2  ;;  %v9170_v48 = vmax.f32 %v3701_v52, %v3702_v54 }
 0x2b6   : > { %v9172_v39 = vmax.f32 %v3708_v19, %v3709_v42  ;;  %v3730_v8 = vrot.slane %v3729_v37, 1  ;;  %v3746_v22 = vsel %vm2905_vm0, %v9131_v32, -inf  ;;  %v9176_v16 = vmax.f32 %v3715_v53, %v3716_v46 }
 0x2b7   : > { %v3737_v2 = vrot.slane %v3736_v60, 1  ;;  %v9178_v20 = vmax.f32 %v3741_v58, %v3742_v34  ;;  %v3747_v47 = vrot.slane %v3746_v22, 4  ;;  %v9180_v27 = vmax.f32 %v3722_v21, %v3723_v11  ;;  %v9210_v21 = vpop.permute.xlu1 %6401 }
 0x2b8   : > { %v3753_v44 = vsel %vm2905_vm0, %v2758_v7, -inf  ;;  %v3760_v18 = vsel %vm2905_vm0, %v9139_v23, -inf  ;;  %v3767_v63 = vsel %vm2905_vm0, %v2759_v28, -inf  ;;  %v9194_v5 = vmax.f32 %v3729_v37, %v3730_v8 }
 0x2b9   : > { %v9196_v24 = vmax.f32 %v3736_v60, %v3737_v2  ;;  %v3748_v56 = vmax.f32 %v3746_v22, %v3747_v47  ;;  %v3754_v40 = vrot.slane %v3753_v44, 4  ;;  %v3761_v38 = vrot.slane %v3760_v18, 4 }
 0x2ba   : > { %v3768_v32 = vrot.slane %v3767_v63, 4  ;;  %v3774_v7 = vsel %vm2905_vm0, %v9135_v15, -inf  ;;  %v3781_v23 = vsel %vm2905_vm0, %v2775_v10, -inf  ;;  %v3744_v28 = vrot.slane %v9178_v20, 1 }
 0x2bb   : > { %v3749_v30 = vrot.slane %v3748_v56, 2  ;;  %v3755_v62 = vmax.f32 %v3753_v44, %v3754_v40  ;;  %v3775_v45 = vrot.slane %v3774_v7, 4  ;;  %v3762_v55 = vmax.f32 %v3760_v18, %v3761_v38  ;;  %v4360_v40 = vld [vmem:[%s10140_s3 + $0xd8] sm:$0xff] }
 0x2bc   : > { %v3769_v52 = vmax.f32 %v3767_v63, %v3768_v32  ;;  %v3782_v9 = vrot.slane %v3781_v23, 4  ;;  %v3788_v4 = vsel %vm2905_vm0, %v9146_v6, -inf  ;;  %v3795_v54 = vsel %vm2905_vm0, %v2776_v57, -inf  ;;  %v9212_v6 = vpop.permute.xlu0 %6406 }
 0x2bd   : > { %v3750_v43 = vmax.f32 %v3748_v56, %v3749_v30  ;;  %v3756_v13 = vrot.slane %v3755_v62, 2  ;;  %v3776_v19 = vmax.f32 %v3774_v7, %v3775_v45  ;;  %v3789_v53 = vrot.slane %v3788_v4, 4  ;;  %v4359_v56 = vld [vmem:[%s10140_s3 + $0xd0] sm:$0xff] }
 0x2be   : > { %v3763_v15 = vrot.slane %v3762_v55, 2  ;;  %v3770_v36 = vrot.slane %v3769_v52, 2  ;;  %v3783_v10 = vmax.f32 %v3781_v23, %v3782_v9  ;;  %v3796_v34 = vrot.slane %v3795_v54, 4  ;;  %v4344_v9 = vld [vmem:[%s10140_s3 + $0x58] sm:$0xff] }
 0x2bf   : > { %v3751_v35 = vrot.slane %v3750_v43, 1  ;;  %v3757_v58 = vmax.f32 %v3755_v62, %v3756_v13  ;;  %v3777_v42 = vrot.slane %v3776_v19, 2  ;;  %v3790_v46 = vmax.f32 %v3788_v4, %v3789_v53  ;;  %v9227_v4 = vpop.permute.xlu1 %6411 }
 0x2c0   : > { %v3764_v37 = vmax.f32 %v3762_v55, %v3763_v15  ;;  %v3771_v11 = vmax.f32 %v3769_v52, %v3770_v36  ;;  %v3784_v60 = vrot.slane %v3783_v10, 2  ;;  %v3797_v57 = vmax.f32 %v3795_v54, %v3796_v34  ;;  %v4343_v52 = vld [vmem:[%s10140_s3 + $0x50] sm:$0xff]  ;;  %v4361_v54 = vld [vmem:[%s10140_s3 + $0xe0] sm:$0xff] }
 0x2c1   : > { %v3752_v8 = vmax.f32 %v3750_v43, %v3751_v35  ;;  %v3758_v22 = vrot.slane %v3757_v58, 1  ;;  %v3778_v2 = vmax.f32 %v3776_v19, %v3777_v42  ;;  %v3791_v47 = vrot.slane %v3790_v46, 2  ;;  %v4362_v35 = vld [vmem:[%s10140_s3 + $0xe8] sm:$0xff]  ;;  %v4345_v34 = vld [vmem:[%s10140_s3 + $0x60] sm:$0xff] }
 0x2c2   : > { %v3765_v44 = vrot.slane %v3764_v37, 1  ;;  %v3772_v18 = vrot.slane %v3771_v11, 1  ;;  %v3785_v63 = vmax.f32 %v3783_v10, %v3784_v60  ;;  %v3798_v55 = vrot.slane %v3797_v57, 2 }
 0x2c3   : > { %v3759_v38 = vmax.f32 %v3757_v58, %v3758_v22  ;;  %v3779_v32 = vrot.slane %v3778_v2, 1  ;;  %v3792_v7 = vmax.f32 %v3790_v46, %v3791_v47  ;;  %v3858_v23 = vmax.f32 %v9168_v1, %v3752_v8  ;;  %v9238_v58 = vpop.permute.xlu0 %6416  ;;  %v4363_v8 = vld [vmem:[%s10140_s3 + $0xf0] sm:$0xff]  ;;  %v4365_v47 = vld [vmem:[%s10140_s3 + $0x100] sm:$0xff] }
 0x2c4   : > { %v3766_v30 = vmax.f32 %v3764_v37, %v3765_v44  ;;  %v3773_v62 = vmax.f32 %v3771_v11, %v3772_v18  ;;  %v3786_v45 = vrot.slane %v3785_v63, 1  ;;  %v6147_v53 = vpack.c.bf16 %v4360_v40, %v4359_v56  ;;  %v9283_v56 = vpop.permute.xlu1 %6421 }
 0x2c5   : > { %v3780_v43 = vmax.f32 %v3778_v2, %v3779_v32  ;;  %v3793_v13 = vrot.slane %v3792_v7, 1  ;;  %v3859_v19 = vmax.f32 %v9170_v48, %v3759_v38  ;;  %v3799_v15 = vmax.f32 %v3797_v57, %v3798_v55  ;;  %v4364_v2 = vld [vmem:[%s10140_s3 + $0xf8] sm:$0xff] }
 0x2c6   : > { %v3787_v1 = vmax.f32 %v3785_v63, %v3786_v45  ;;  %v3860_v36 = vmax.f32 %v9172_v39, %v3766_v30  ;;  %v3861_v10 = vmax.f32 %v9176_v16, %v3773_v62  ;;  %6148 = vmatprep.subr.bf16.mxu0 %v6147_v53  ;;  %v6149_v37 = vpack.c.bf16 %v4344_v9, %v4343_v52  ;;  %v4347_v63 = vld [vmem:[%s10140_s3 + $0x70] sm:$0xff]  ;;  %v4348_v57 = vld [vmem:[%s10140_s3 + $0x78] sm:$0xff] }
 0x2c7   : > { %v3794_v42 = vmax.f32 %v3792_v7, %v3793_v13  ;;  %v3862_v48 = vmax.f32 %v9180_v27, %v3780_v43  ;;  %v4007_v46 = vsel %vm3951_vm4, %v3859_v19, %v3858_v23  ;;  %v3745_v39 = vmax.f32 %v9178_v20, %v3744_v28  ;;  %v4346_v27 = vld [vmem:[%s10140_s3 + $0x68] sm:$0xff]  ;;  %v4367_v45 = vld [vmem:[%s10140_s3 + $0x110] sm:$0xff]  ;;  %v4368_v55 = vld [vmem:[%s10140_s3 + $0x118] sm:$0xff]  ;;  %v9295_v52 = vpop.permute.xlu0 %6426 }
 0x2c8   : > { %v3800_v16 = vrot.slane %v3799_v15, 1  ;;  %v3863_v11 = vmax.f32 %v9194_v5, %v3787_v1  ;;  %v4008_v60 = vsel %vm3953_vm5, %v3860_v36, %v4007_v46  ;;  %v9263_v5 = vsel %vm600_vm2, %v4133_v50, %v4134_v59  ;;  %6150 = vmatpush3.bf16.msra.mxu0 %v6149_v37  ;;  %v9311_v46 = vpop.permute.xlu1 %6431 }
 0x2c9   : > { %v3864_v22 = vmax.f32 %v9196_v24, %v3794_v42  ;;  %v4009_v20 = vsel %vm3955_vm6, %v3861_v10, %v4008_v60  ;;  %v6151_v28 = vpack.c.bf16 %v4362_v35, %v4361_v54  ;;  %v4366_v24 = vld [vmem:[%s10140_s3 + $0x108] sm:$0xff]  ;;  %v6379_v50 = vunpack.i.h.bf16 %v9159_v17 }
 0x2ca   : > { %v3801_v44 = vmax.f32 %v3799_v15, %v3800_v16  ;;  %v4010_v18 = vsel %vm3957_vm7, %v3862_v48, %v4009_v20  ;;  %v6378_v59 = vunpack.i.l.bf16 %v9159_v17  ;;  %v6153_v38 = vpack.c.bf16 %v4346_v27, %v4345_v34  ;;  %v10319_v34 = vld [vmem:[#allocation12_spill] sm:$0xff] }
 0x2cb   : > { %v4011_v40 = vsel %vm3959_vm8, %v3863_v11, %v4010_v18  ;;  %6152 = vmatprep.subr.bf16.mxu0 %v6151_v28  ;;  %v6384_v32 = vunpack.i.h.bf16 %v9166_v31  ;;  %v6383_v7 = vunpack.i.l.bf16 %v9166_v31  ;;  %v6155_v30 = vpack.c.bf16 %v4364_v2, %v4363_v8  ;;  %v9322_v8 = vpop.permute.xlu0 %6436 }
 0x2cc   : > { %v3865_v23 = vmax.f32 %v3745_v39, %v3801_v44  ;;  %v4012_v17 = vsel %vm3961_vm9, %v3864_v22, %v4011_v40  ;;  %v6159_v62 = vpack.c.bf16 %v4366_v24, %v4365_v47  ;;  %v6389_v9 = vunpack.i.h.bf16 %v9162_v14  ;;  %6154 = vmatpush3.bf16.msra.mxu0 %v6153_v38 }
 0x2cd   : > { %v6388_v43 = vunpack.i.l.bf16 %v9162_v14  ;;  %v6394_v31 = vunpack.i.h.bf16 %v9192_v3  ;;  %v6157_v13 = vpack.c.bf16 %v4348_v57, %v4347_v63  ;;  %6156 = vmatprep.subr.bf16.mxu0 %v6155_v30  ;;  %v6393_v53 = vunpack.i.l.bf16 %v9192_v3  ;;  %v10318_v14 = vld [vmem:[#allocation23_spill] sm:$0xff]  ;;  %v6532_v3 = vld [vmem:[#allocation2] sm:$0xff]  ;;  %v6442_v30 = vpop.permute.xlu1 %6441 }
 0x2ce   : > { %v4013_v19 = vsel %vm3963_vm10, %v3865_v23, %v4012_v17  ;;  %6160 = vmatprep.subr.bf16.mxu1 %v6159_v62  ;;  %v6399_v1 = vunpack.i.h.bf16 %v9204_v25  ;;  %v6398_v15 = vunpack.i.l.bf16 %v9204_v25  ;;  %v4309_v36 = vsel %vm3866_vm1, %v10318_v14, %v6383_v7  ;;  %v6534_v63 = vld [vmem:[#allocation2 + $0x20] sm:$0xff] }
 0x2cf   : > { %4030 = vst.msk [vmem:[#allocation2 + $0x81] sm:$0xff] %vm3866_vm1, %v4013_v19  ;;  %6162 = vmatpush3.bf16.msra.mxu1 %v6159_v62  ;;  %v6163_v10 = vpack.c.bf16 %v4368_v55, %v4367_v45  ;;  %v4317_v54 = vsel %vm4291_vm11, %v4309_v36, %v6378_v59  ;;  %v6404_v35 = vunpack.i.h.bf16 %v9210_v21  ;;  %v6403_v42 = vunpack.i.l.bf16 %v9210_v21  ;;  %v10320_v59 = vld [vmem:[#allocation17_spill] sm:$0xff] }
 0x2d0   : > { %v4283_v48 = vsel %vm3866_vm1, %v6532_v3, %v6384_v32  ;;  %6158 = vmatpush3.bf16.msra.mxu0 %v6157_v13  ;;  %v4325_v37 = vsel %vm4300_vm12, %v4317_v54, %v6388_v43  ;;  %v6409_v39 = vunpack.i.h.bf16 %v9212_v6  ;;  %v6408_v16 = vunpack.i.l.bf16 %v9212_v6  ;;  %v6533_v6 = vld [vmem:[#allocation2 + $0x10] sm:$0xff]  ;;  %v10322_v62 = vld [vmem:[#allocation25_spill] sm:$0xff] }
 0x2d1   : > { %6164 = vmatprep.subr.bf16.mxu1 %v6163_v10  ;;  %v4292_v25 = vsel %vm4291_vm11, %v4283_v48, %v6379_v50  ;;  %4456 = vmatprep.mubr.f32.mxu0 %v4325_v37  ;;  %v6414_v21 = vunpack.i.h.bf16 %v9227_v4  ;;  %v6413_v60 = vunpack.i.l.bf16 %v9227_v4  ;;  %v4310_v27 = vsel %vm3866_vm1, %v10319_v34, %v6393_v53  ;;  %v10321_v32 = vld [vmem:[#allocation14_spill] sm:$0xff] }
 0x2d2   : > { %v4301_v11 = vsel %vm4300_vm12, %v4292_v25, %v6389_v9  ;;  %v4318_v22 = vsel %vm4291_vm11, %v4310_v27, %v6398_v15  ;;  %v6419_v20 = vunpack.i.h.bf16 %v9238_v58  ;;  %v6418_v28 = vunpack.i.l.bf16 %v9238_v58  ;;  %v10324_v3 = vld [vmem:[#allocation18_spill] sm:$0xff]  ;;  %v10325_v27 = vld [vmem:[#allocation13_spill] sm:$0xff] }
 0x2d3   : > { %6166 = vmatpush3.bf16.msra.mxu1 %v6163_v10  ;;  %v4284_v2 = vsel %vm3866_vm1, %v6533_v6, %v6394_v31  ;;  %4457 = vmatmul.mubr.f32.vlgmr.msra.gmra.mrb[0].mxu0 %v4301_v11  ;;  %v4326_v47 = vsel %vm4300_vm12, %v4318_v22, %v6403_v42  ;;  %v6424_v24 = vunpack.i.h.bf16 %v9283_v56  ;;  %v6423_v44 = vunpack.i.l.bf16 %v9283_v56  ;;  %v10323_v31 = vld [vmem:[#allocation20_spill] sm:$0xff] }
 0x2d4   : > { %v4293_v4 = vsel %vm4291_vm11, %v4284_v2, %v6399_v1  ;;  %4461 = vmatprep.mubr.f32.mxu0 %v4326_v47  ;;  %v6429_v50 = vunpack.i.h.bf16 %v9295_v52  ;;  %v4311_v58 = vsel %vm3866_vm1, %v10320_v59, %v6408_v16  ;;  %v4285_v57 = vsel %vm3866_vm1, %v6534_v63, %v6409_v39  ;;  %v6447_v1 = vpop.permute.xlu0 %6446  ;;  %v6535_v39 = vld [vmem:[#allocation2 + $0x30] sm:$0xff]  ;;  %v6536_v22 = vld [vmem:[#allocation2 + $0x40] sm:$0xff] }
 0x2d5   : > { %v4302_v18 = vsel %vm4300_vm12, %v4293_v4, %v6404_v35  ;;  %v6428_v7 = vunpack.i.l.bf16 %v9295_v52  ;;  %v4319_v56 = vsel %vm4291_vm11, %v4311_v58, %v6413_v60  ;;  %v4294_v23 = vsel %vm4291_vm11, %v4285_v57, %v6414_v21 }
 0x2d6   : > { %v4047_v40 = vld [vmem:[#allocation2 + $0x80] sm:$0xff]  ;;  %v4048_v38 = vld [vmem:[#allocation2 + $0x88] sm:$0x3]  ;;  %6116 = vmatmul.mubr.msk.f32.vlgmr.msra.gmra.mrb[0].mxu1 %vm3866_vm1, %v10321_v32  ;;  %v6434_v17 = vunpack.i.h.bf16 %v9311_v46  ;;  %v4327_v19 = vsel %vm4300_vm12, %v4319_v56, %v6418_v28  ;;  %v6433_v52 = vunpack.i.l.bf16 %v9311_v46  ;;  %v6439_v53 = vunpack.i.h.bf16 %v9322_v8 }
 0x2d7   : > { %v6470_v45 = vpack.i.bf16 %v10322_v62, %v4047_v40  ;;  %v4117_v55 = vrot.slane %v4047_v40, 1  ;;  %v4118_v9 = vrot.slane %v4048_v38, 1  ;;  %v4128_v43 = vrot.slane %v4047_v40, 2  ;;  %6118 = vmatprep.mubr.msk.f32.mxu1 %vm3866_vm1, %v10323_v31  ;;  %4462 = vmatmul.mubr.f32.gmra.mrb[2].mxu0 %v4302_v18 }
 0x2d8   : > { %v4129_v13 = vrot.slane %v4048_v38, 2  ;;  %4466 = vmatprep.mubr.f32.mxu0 %v4327_v19  ;;  %v4303_v14 = vsel %vm4300_vm12, %v4294_v23, %v6419_v20  ;;  %v6438_v36 = vunpack.i.l.bf16 %v9322_v8  ;;  %v6444_v10 = vunpack.i.h.bf16 %v6442_v30 }
 0x2d9   : > { %6471 = vrot.lane.b32.xlu1 %v6470_v45, %s6646_s28  ;;  %v9351_v15 = vsel %vm600_vm2, %v4117_v55, %v4118_v9  ;;  %v6443_v42 = vunpack.i.l.bf16 %v6442_v30  ;;  %v4312_v48 = vsel %vm3866_vm1, %v10324_v3, %v6423_v44  ;;  %v6448_v25 = vunpack.i.l.bf16 %v6447_v1  ;;  %v6452_v44 = vpop.permute.xlu1 %6451  ;;  %v6538_v45 = vld [vmem:[#allocation2 + $0x60] sm:$0xff] }
 0x2da   : > { %v6475_v54 = vpack.i.bf16 %v8966_v0, %v9351_v15  ;;  %v4130_v35 = vsel %vm849_vm3, %v4128_v43, %v4129_v13  ;;  %6119 = vmatmul.mubr.msk.f32.gmra.mrb[2].mxu1 %vm3866_vm1, %v8411_v41  ;;  %v4320_v37 = vsel %vm4291_vm11, %v4312_v48, %v6428_v7  ;;  %v4286_v16 = vsel %vm3866_vm1, %v6535_v39, %v6424_v24 }
 0x2db   : > { %v6480_v46 = vpack.i.bf16 %v8981_v61, %v4130_v35  ;;  %6121 = vmatprep.mubr.msk.f32.mxu1 %vm3866_vm1, %v10322_v62  ;;  %v6490_v11 = vpack.i.bf16 %v4047_v40, %v9263_v5  ;;  %4467 = vmatmul.mubr.f32.gmra.mrb[4].mxu0 %v4303_v14  ;;  %v4328_v41 = vsel %vm4300_vm12, %v4320_v37, %v6433_v52  ;;  %v6449_v21 = vunpack.i.h.bf16 %v6447_v1 }
 0x2dc   : > { %6476 = vrot.lane.b32.xlu0 %v6475_v54, %s6647_s29  ;;  %v4295_v60 = vsel %vm4291_vm11, %v4286_v16, %v6429_v50  ;;  %4471 = vmatprep.mubr.f32.mxu0 %v4328_v41  ;;  %v4313_v8 = vsel %vm3866_vm1, %v10325_v27, %v6438_v36  ;;  %v4287_v20 = vsel %vm3866_vm1, %v6536_v22, %v6439_v53  ;;  %v4136_v28 = vrot.slane %v9035_v12, 2  ;;  %v6537_v12 = vld [vmem:[#allocation2 + $0x50] sm:$0xff] }
 0x2dd   : > { %6481 = vrot.lane.b32.xlu1 %v6480_v46, %s6648_s10  ;;  %v4304_v34 = vsel %vm4300_vm12, %v4295_v60, %v6434_v17  ;;  %v4321_v5 = vsel %vm4291_vm11, %v4313_v8, %v6443_v42  ;;  %v4296_v6 = vsel %vm4291_vm11, %v4287_v20, %v6444_v10  ;;  %v4137_v47 = vrot.slane %v9044_v26, 2  ;;  %v9414_v60 = vld [vmem:[#allocation6] ss:$0 sm:$0xff] }
 0x2de   : > { %6122 = vmatmul.mubr.msk.f32.gmra.mrb[4].mxu1 %vm3866_vm1, %v8986_v33  ;;  %v4329_v2 = vsel %vm4300_vm12, %v4321_v5, %v6448_v25  ;;  %v4305_v4 = vsel %vm4300_vm12, %v4296_v6, %v6449_v21  ;;  %v6454_v18 = vunpack.i.h.bf16 %v6452_v44  ;;  %v6453_v50 = vunpack.i.l.bf16 %v6452_v44 }
 0x2df   : > { %6124 = vmatprep.mubr.msk.f32.mxu1 %vm3866_vm1, %v4130_v35  ;;  %4472 = vmatmul.mubr.f32.gmra.mrb[6].mxu0 %v4304_v34  ;;  %v4138_v24 = vsel %vm849_vm3, %v4136_v28, %v4137_v47 }
 0x2e0   : > { %6486 = vrot.lane.b32.xlu0 %v6485_v29, %s6646_s28  ;;  %4476 = vmatprep.mubr.f32.mxu0 %v4329_v2  ;;  %v4314_v33 = vsel %vm3866_vm1, %v8697_v49, %v6453_v50  ;;  %v4288_v29 = vsel %vm3866_vm1, %v6537_v12, %v6454_v18 }
 0x2e1   : > { %6491 = vrot.lane.b32.xlu1 %v6490_v11, %s6647_s29 }
 0x2e2   : > { %6125 = vmatmul.mubr.msk.f32.gmra.mrb[6].mxu1 %vm3866_vm1, %v4138_v24 }
 0x2e3   : > { %4477 = vmatmul.mubr.f32.gmra.mrb[8].mxu0 %v4305_v4 }
 0x2ff   : > { %v6457_v26 = vpop.permute.xlu0 %6456 }
 0x300   : > { %v6459_v59 = vunpack.i.h.bf16 %v6457_v26  ;;  %v6458_v58 = vunpack.i.l.bf16 %v6457_v26 }
 0x302   : > { %v6462_v63 = vpop.permute.xlu1 %6461  ;;  %v4322_v38 = vsel %vm4291_vm11, %v4314_v33, %v6458_v58  ;;  %v4297_v32 = vsel %vm4291_vm11, %v4288_v29, %v6459_v59 }
 0x303   : > { %v6464_v57 = vunpack.i.h.bf16 %v6462_v63  ;;  %v6463_v40 = vunpack.i.l.bf16 %v6462_v63  ;;  %v6467_v23 = vpop.permute.xlu0 %6466 }
 0x304   : > { %v6469_v17 = vunpack.i.h.bf16 %v6467_v23  ;;  %v6468_v30 = vunpack.i.l.bf16 %v6467_v23 }
 0x305   : > { %v4330_v7 = vsel %vm4300_vm12, %v4322_v38, %v6463_v40  ;;  %v4306_v56 = vsel %vm4300_vm12, %v4297_v32, %v6464_v57 }
 0x306   : > { %4481 = vmatprep.mubr.f32.mxu0 %v4330_v7  ;;  %v4315_v62 = vsel %vm3866_vm1, %v8981_v61, %v6468_v30  ;;  %v4289_v55 = vsel %vm3866_vm1, %v6538_v45, %v6469_v17 }
 0x307   : > { %4482 = vmatmul.mubr.f32.gmra.mrb[10].mxu0 %v4306_v56  ;;  %v6649_v56 = vmov 1966171168  }
 0x308   : > { %v5034_v23 = vunpack.c.l.s4 %v6649_v56 }
 0x34b   : > { %v6472_v49 = vpop.permute.xlu1 %6471 }
 0x34c   : > { %v6474_v9 = vunpack.i.h.bf16 %v6472_v49  ;;  %v6473_v43 = vunpack.i.l.bf16 %v6472_v49 }
 0x34e   : > { %v6477_v31 = vpop.permute.xlu0 %6476  ;;  %v4323_v13 = vsel %vm4291_vm11, %v4315_v62, %v6473_v43  ;;  %v4298_v19 = vsel %vm4291_vm11, %v4289_v55, %v6474_v9 }
 0x34f   : > { %v6479_v52 = vunpack.i.h.bf16 %v6477_v31  ;;  %v6478_v53 = vunpack.i.l.bf16 %v6477_v31  ;;  %v6482_v1 = vpop.permute.xlu1 %6481 }
 0x350   : > { %v6484_v14 = vunpack.i.h.bf16 %v6482_v1  ;;  %v6483_v36 = vunpack.i.l.bf16 %v6482_v1 }
 0x351   : > { %v4331_v10 = vsel %vm4300_vm12, %v4323_v13, %v6478_v53  ;;  %v4307_v54 = vsel %vm4300_vm12, %v4298_v19, %v6479_v52 }
 0x352   : > { %v6487_v61 = vpop.permute.xlu0 %6486  ;;  %4486 = vmatprep.mubr.f32.mxu0 %v4331_v10  ;;  %v4316_v35 = vsel %vm3866_vm1, %v9351_v15, %v6483_v36  ;;  %v4290_v42 = vsel %vm3866_vm1, %v8966_v0, %v6484_v14 }
 0x353   : > { %v6489_v3 = vunpack.i.h.bf16 %v6487_v61  ;;  %v6488_v48 = vunpack.i.l.bf16 %v6487_v61  ;;  %4487 = vmatmul.mubr.f32.gmra.mrb[12].mxu0 %v4307_v54  ;;  %v6492_v46 = vpop.permute.xlu1 %6491  ;;  %v5035_v61 = vunpack.c.0.s8 %v5034_v23 }
 0x354   : > { %v6494_v37 = vunpack.i.h.bf16 %v6492_v46  ;;  %v6493_v25 = vunpack.i.l.bf16 %v6492_v46 }
 0x355   : > { %v4324_v39 = vsel %vm4291_vm11, %v4316_v35, %v6488_v48  ;;  %v4299_v16 = vsel %vm4291_vm11, %v4290_v42, %v6489_v3 }
 0x356   : > { %v4332_v11 = vsel %vm4300_vm12, %v4324_v39, %v6493_v25  ;;  %v4308_v41 = vsel %vm4300_vm12, %v4299_v16, %v6494_v37 }
 0x357   : > { %4491 = vmatprep.mubr.f32.mxu0 %v4332_v11  ;;  %v10326_v11 = vld [vmem:[#allocation11_spill] sm:$0xff] }
 0x358   : > { %4492 = vmatmul.mubr.f32.gmra.mrb[14].mxu0 %v4308_v41  ;;  %v9440_v41 = vsub.s32 %v5035_v61, %v10326_v11 }
 0x3a6   : > { %v5931_v15 = vpop.f32.mrb[0].mxu0 }
 0x3a7   : > { %v5932_v21 = vpop.f32.mrb[1].mxu0 }
 0x3a8   : > { %v5933_v0 = vadd.f32 %v5932_v21, %v5931_v15 }
 0x3a9   : > { %v6117_v34 = vpop.f32.mrb[0].mxu1 }
 0x3aa   : > { %v4563_v27 = vpop.f32.mrb[1].mxu1  ;;  %v5934_v8 = vpop.f32.mrb[2].mxu0  ;;  %v4459_v22 = vadd.f32 %v5933_v0, %v9414_v60 }
 0x3ab   : > { %v5935_v20 = vpop.f32.mrb[3].mxu0 }
 0x3ac   : > { %v4564_v28 = vadd.f32 %v4563_v27, %v4459_v22  ;;  %v5936_v5 = vadd.f32 %v5935_v20, %v5934_v8 }
 0x3ad   : > { %v9417_v6 = vpop.f32.mrb[2].mxu1 }
 0x3ae   : > { %v4573_v2 = vpop.f32.mrb[3].mxu1  ;;  %v4602_v47 = vmax.f32 %v4564_v28, 0.0  ;;  %v4464_v4 = vadd.f32 %v5936_v5, %v9414_v60  ;;  %v5937_v24 = vpop.f32.mrb[4].mxu0 }
 0x3af   : > { %v5938_v44 = vpop.f32.mrb[5].mxu0 }
 0x3b0   : > { %v4618_v18 = vcombine.high %v4602_v47, %v4602_v47  ;;  %v4625_v50 = vrot.slane %v4602_v47, %v10317_v51  ;;  %v4569_v26 = vadd.f32 %v6117_v34, %v4464_v4  ;;  %v5939_v59 = vadd.f32 %v5938_v44, %v5937_v24 }
 0x3b1   : > { %v9421_v58 = vpop.f32.mrb[4].mxu1 }
 0x3b2   : > { %v9423_v33 = vpop.f32.mrb[5].mxu1  ;;  %v4632_v12 = vrot.slane %v4618_v18, %v10317_v51  ;;  %v4633_v29 = vcombine.high %v4625_v50, %v4625_v50  ;;  %v4787_v63 = vsel %vm4786_vm13, %v4625_v50, -inf  ;;  %v4603_v57 = vmax.f32 %v4569_v26, 0.0  ;;  %v5940_v40 = vpop.f32.mrb[6].mxu0 }
 0x3b3   : > { %v4788_v38 = vrot.slane %v4787_v63, 4  ;;  %v4469_v32 = vadd.f32 %v5939_v59, %v9414_v60  ;;  %v5941_v7 = vpop.f32.mrb[7].mxu0 }
 0x3b4   : > { %v4634_v17 = vcombine.high %v4632_v12, %v4632_v12  ;;  %v4794_v30 = vsel %vm4786_vm13, %v4633_v29, -inf  ;;  %v4801_v49 = vsel %vm4786_vm13, %v4632_v12, -inf  ;;  %v4635_v62 = vcombine.high %v4603_v57, %v4603_v57 }
 0x3b5   : > { %v9430_v45 = vpop.f32.mrb[6].mxu1  ;;  %v4789_v55 = vmax.f32 %v4787_v63, %v4788_v38  ;;  %v4802_v9 = vrot.slane %v4801_v49, 4  ;;  %v4642_v43 = vrot.slane %v4603_v57, %v10317_v51  ;;  %v4795_v13 = vrot.slane %v4794_v30, 4 }
 0x3b6   : > { %v9433_v31 = vpop.f32.mrb[7].mxu1  ;;  %v4649_v19 = vrot.slane %v4635_v62, %v10317_v51  ;;  %v4574_v52 = vadd.f32 %v4573_v2, %v4469_v32  ;;  %v5942_v53 = vadd.f32 %v5941_v7, %v5940_v40  ;;  %v5943_v1 = vpop.f32.mrb[8].mxu0  ;;  %v4808_v14 = vsel %vm4786_vm13, %v4634_v17, -inf }
 0x3b7   : > { %v5944_v36 = vpop.f32.mrb[9].mxu0  ;;  %v4803_v10 = vmax.f32 %v4801_v49, %v4802_v9  ;;  %v4815_v54 = vsel %vm4786_vm13, %v4642_v43, -inf  ;;  %v4790_v35 = vrot.slane %v4789_v55, 2  ;;  %v4650_v42 = vcombine.high %v4642_v43, %v4642_v43 }
 0x3b8   : > { %v4829_v3 = vsel %vm4786_vm13, %v4649_v19, -inf  ;;  %v4796_v48 = vmax.f32 %v4794_v30, %v4795_v13  ;;  %v4809_v46 = vrot.slane %v4808_v14, 4  ;;  %v4816_v37 = vrot.slane %v4815_v54, 4 }
 0x3b9   : > { %v4651_v25 = vcombine.high %v4649_v19, %v4649_v19  ;;  %v4804_v39 = vrot.slane %v4803_v10, 2  ;;  %v4830_v16 = vrot.slane %v4829_v3, 4  ;;  %v4791_v15 = vmax.f32 %v4789_v55, %v4790_v35 }
 0x3ba   : > { %v4822_v21 = vsel %vm4786_vm13, %v4650_v42, -inf  ;;  %v4604_v0 = vmax.f32 %v4574_v52, 0.0  ;;  %v4474_v34 = vadd.f32 %v5942_v53, %v9414_v60  ;;  %v4797_v27 = vrot.slane %v4796_v48, 2 }
 0x3bb   : > { %v9444_v8 = vmax.f32 %v4808_v14, %v4809_v46  ;;  %v4817_v22 = vmax.f32 %v4815_v54, %v4816_v37  ;;  %v5945_v20 = vadd.f32 %v5944_v36, %v5943_v1  ;;  %v9447_v28 = vsel %vm4786_vm13, %v4651_v25, -inf }
 0x3bc   : > { %v4652_v5 = vcombine.high %v4604_v0, %v4604_v0  ;;  %v4659_v2 = vrot.slane %v4604_v0, %v10317_v51  ;;  %v4579_v47 = vadd.f32 %v9417_v6, %v4474_v34  ;;  %v4805_v4 = vmax.f32 %v4803_v10, %v4804_v39 }
 0x3bd   : > { %v4823_v24 = vrot.slane %v4822_v21, 4  ;;  %v4831_v44 = vmax.f32 %v4829_v3, %v4830_v16  ;;  %v4479_v18 = vadd.f32 %v5945_v20, %v9414_v60  ;;  %v4798_v29 = vmax.f32 %v4796_v48, %v4797_v27 }
 0x3be   : > { %v4666_v50 = vrot.slane %v4652_v5, %v10317_v51  ;;  %v4667_v26 = vcombine.high %v4659_v2, %v4659_v2  ;;  %v4843_v59 = vsel %vm4786_vm13, %v4659_v2, -inf  ;;  %v4605_v12 = vmax.f32 %v4579_v47, 0.0 }
 0x3bf   : > { %v4818_v63 = vrot.slane %v4817_v22, 2  ;;  %v4844_v57 = vrot.slane %v4843_v59, 4  ;;  %v4584_v40 = vadd.f32 %v9423_v33, %v4479_v18  ;;  %v4792_v49 = vrot.slane %v4791_v15, 1 }
 0x3c0   : > { %v4668_v38 = vcombine.high %v4666_v50, %v4666_v50  ;;  %v4850_v32 = vsel %vm4786_vm13, %v4667_v26, -inf  ;;  %v4857_v6 = vsel %vm4786_vm13, %v4666_v50, -inf  ;;  %v4669_v7 = vcombine.high %v4605_v12, %v4605_v12 }
 0x3c1   : > { %v4845_v56 = vmax.f32 %v4843_v59, %v4844_v57  ;;  %v4851_v23 = vrot.slane %v4850_v32, 4  ;;  %v4858_v17 = vrot.slane %v4857_v6, 4  ;;  %v4676_v30 = vrot.slane %v4605_v12, %v10317_v51 }
 0x3c2   : > { %v4806_v62 = vrot.slane %v4805_v4, 1  ;;  %v4824_v55 = vmax.f32 %v4822_v21, %v4823_v24  ;;  %v4832_v9 = vrot.slane %v4831_v44, 2  ;;  %v9458_v43 = vmax.f32 %v4817_v22, %v4818_v63 }
 0x3c3   : > { %v4859_v13 = vmax.f32 %v4857_v6, %v4858_v17  ;;  %v4864_v33 = vsel %vm4786_vm13, %v4668_v38, -inf  ;;  %v4683_v19 = vrot.slane %v4669_v7, %v10317_v51  ;;  %v4811_v52 = vrot.slane %v9444_v8, 2 }
 0x3c4   : > { %v4837_v53 = vrot.slane %v9447_v28, 4  ;;  %v4684_v1 = vcombine.high %v4676_v30, %v4676_v30  ;;  %v4799_v14 = vrot.slane %v4798_v29, 1  ;;  %v4846_v36 = vrot.slane %v4845_v56, 2 }
 0x3c5   : > { %v4852_v10 = vmax.f32 %v4850_v32, %v4851_v23  ;;  %v4871_v54 = vsel %vm4786_vm13, %v4676_v30, -inf  ;;  %v4606_v61 = vmax.f32 %v4584_v40, 0.0  ;;  %v9465_v35 = vmax.f32 %v4791_v15, %v4792_v49 }
 0x3c6   : > { %v4860_v42 = vrot.slane %v4859_v13, 2  ;;  %v4865_v3 = vrot.slane %v4864_v33, 4  ;;  %v4825_v48 = vrot.slane %v4824_v55, 2  ;;  %v9467_v46 = vmax.f32 %v4805_v4, %v4806_v62 }
 0x3c7   : > { %v4820_v37 = vrot.slane %v9458_v43, 1  ;;  %v9470_v25 = vmax.f32 %v4831_v44, %v4832_v9  ;;  %v4885_v39 = vsel %vm4786_vm13, %v4683_v19, -inf  ;;  %v4685_v16 = vcombine.high %v4683_v19, %v4683_v19 }
 0x3c8   : > { %v4872_v21 = vrot.slane %v4871_v54, 4  ;;  %v4878_v0 = vsel %vm4786_vm13, %v4684_v1, -inf  ;;  %v4800_v34 = vmax.f32 %v4798_v29, %v4799_v14  ;;  %v4847_v27 = vmax.f32 %v4845_v56, %v4846_v36 }
 0x3c9   : > { %v4853_v22 = vrot.slane %v4852_v10, 2  ;;  %v4686_v15 = vcombine.high %v4606_v61, %v4606_v61  ;;  %v4693_v20 = vrot.slane %v4606_v61, %v10317_v51  ;;  %v4861_v5 = vmax.f32 %v4859_v13, %v4860_v42 }
 0x3ca   : > { %v4866_v2 = vmax.f32 %v4864_v33, %v4865_v3  ;;  %v4886_v47 = vrot.slane %v4885_v39, 4  ;;  %v4826_v4 = vmax.f32 %v4824_v55, %v4825_v48  ;;  %v4879_v24 = vrot.slane %v4878_v0, 4 }
 0x3cb   : > { %v4700_v44 = vrot.slane %v4686_v15, %v10317_v51  ;;  %v4701_v18 = vcombine.high %v4693_v20, %v4693_v20  ;;  %v4899_v50 = vsel %vm4786_vm13, %v4693_v20, -inf  ;;  %v4873_v26 = vmax.f32 %v4871_v54, %v4872_v21 }
 0x3cc   : > { %v4892_v59 = vsel %vm4786_vm13, %v4685_v16, -inf  ;;  %v4900_v12 = vrot.slane %v4899_v50, 4  ;;  %v4827_v29 = vrot.slane %v4826_v4, 1  ;;  %v4848_v63 = vrot.slane %v4847_v27, 1 }
 0x3cd   : > { %v4854_v57 = vmax.f32 %v4852_v10, %v4853_v22  ;;  %v4906_v40 = vsel %vm4786_vm13, %v4701_v18, -inf  ;;  %v4913_v38 = vsel %vm4786_vm13, %v4700_v44, -inf  ;;  %v4862_v32 = vrot.slane %v4861_v5, 1 }
 0x3ce   : > { %v4887_v6 = vmax.f32 %v4885_v39, %v4886_v47  ;;  %v4702_v7 = vcombine.high %v4700_v44, %v4700_v44  ;;  %v4812_v56 = vmax.f32 %v9444_v8, %v4811_v52  ;;  %v4880_v23 = vmax.f32 %v4878_v0, %v4879_v24 }
 0x3cf   : > { %v4914_v17 = vrot.slane %v4913_v38, 4  ;;  %v4828_v30 = vmax.f32 %v4826_v4, %v4827_v29  ;;  %v4838_v49 = vmax.f32 %v9447_v28, %v4837_v53  ;;  %v4867_v62 = vrot.slane %v4866_v2, 2 }
 0x3d0   : > { %v4874_v55 = vrot.slane %v4873_v26, 2  ;;  %v4901_v9 = vmax.f32 %v4899_v50, %v4900_v12  ;;  %v4907_v13 = vrot.slane %v4906_v40, 4  ;;  %v9482_v33 = vmax.f32 %v4847_v27, %v4848_v63 }
 0x3d1   : > { %v4893_v19 = vrot.slane %v4892_v59, 4  ;;  %v5012_v1 = vmax.f32 %v4800_v34, %v4828_v30  ;;  %v4839_v14 = vrot.slane %v4838_v49, 2  ;;  %v9484_v36 = vmax.f32 %v4861_v5, %v4862_v32 }
 0x3d2   : > { %v4888_v10 = vrot.slane %v4887_v6, 2  ;;  %v4920_v54 = vsel %vm4786_vm13, %v4702_v7, -inf  ;;  %v4813_v8 = vrot.slane %v4812_v56, 1  ;;  %v4915_v52 = vmax.f32 %v4913_v38, %v4914_v17 }
 0x3d3   : > { %v5039_v61 = vrot.slane %v5012_v1, %v9440_v41  ;;  %v4840_v42 = vmax.f32 %v4838_v49, %v4839_v14  ;;  %v4881_v28 = vrot.slane %v4880_v23, 2  ;;  %v10327_v53 = vlaneseq  ;;  %v5244_v1 = vld [vmem:[%s10142_s5 + $0x188] sm:$0xff] }
 0x3d4   : > { %v4875_v48 = vmax.f32 %v4873_v26, %v4874_v55  ;;  %v4902_v39 = vrot.slane %v4901_v9, 2  ;;  %v9493_v16 = vmax.f32 %v4906_v40, %v4907_v13  ;;  %v4855_v21 = vrot.slane %v4854_v57, 1  ;;  %v5212_v55 = vld [vmem:[%s10142_s5 + $0x88] sm:$0xff] }
 0x3d5   : > { %vm9489_vm14 = vcmp.lt.s32.totalorder %v10327_v53, 64  ;;  %v5046_v0 = vrot.slane %v5039_v61, %v9440_v41  ;;  %v4841_v34 = vrot.slane %v4840_v42, 1  ;;  %v4882_v27 = vmax.f32 %v4880_v23, %v4881_v28  ;;  %v5196_v28 = vld [vmem:[%s10142_s5 + $0x8] sm:$0xff] }
 0x3d6   : > { %v4868_v22 = vmax.f32 %v4866_v2, %v4867_v62  ;;  %v4889_v15 = vmax.f32 %v4887_v6, %v4888_v10  ;;  %v4921_v20 = vrot.slane %v4920_v54, 4  ;;  %v4814_v47 = vmax.f32 %v4812_v56, %v4813_v8 }
 0x3d7   : > { %v4894_v4 = vmax.f32 %v4892_v59, %v4893_v19  ;;  %v4916_v24 = vrot.slane %v4915_v52, 2  ;;  %5047 = vrot.lane.b32.xlu0 %v5046_v0, %s6646_s28  ;;  %v4842_v18 = vmax.f32 %v4840_v42, %v4841_v34  ;;  %v4883_v50 = vrot.slane %v4882_v27, 1 }
 0x3d8   : > { %v4869_v26 = vrot.slane %v4868_v22, 1  ;;  %v4876_v12 = vrot.slane %v4875_v48, 1  ;;  %v9497_v29 = vmax.f32 %v4901_v9, %v4902_v39  ;;  %v4909_v38 = vrot.slane %v9493_v16, 2  ;;  %v5228_v39 = vld [vmem:[%s10142_s5 + $0x108] sm:$0xff] }
 0x3d9   : > { %v4895_v40 = vrot.slane %v4894_v4, 2  ;;  %v5014_v2 = vmax.f32 %v4814_v47, %v4842_v18  ;;  %v4856_v32 = vmax.f32 %v4854_v57, %v4855_v21  ;;  %v4884_v6 = vmax.f32 %v4882_v27, %v4883_v50  ;;  %v5211_v57 = vld [vmem:[%s10142_s5 + $0x80] sm:$0xff]  ;;  %v5213_v27 = vld [vmem:[%s10142_s5 + $0x90] sm:$0xff] }
 0x3da   : > { %v5946_v5 = vpop.f32.mrb[10].mxu0  ;;  %v9500_v7 = vmax.f32 %v4920_v54, %v4921_v20  ;;  %v4821_v23 = vmax.f32 %v9458_v43, %v4820_v37  ;;  %v9506_v17 = vmax.f32 %v4915_v52, %v4916_v24  ;;  %v4870_v62 = vmax.f32 %v4868_v22, %v4869_v26  ;;  %v5243_v37 = vld [vmem:[%s10142_s5 + $0x180] sm:$0xff]  ;;  %v5214_v22 = vld [vmem:[%s10142_s5 + $0x98] sm:$0xff]  ;;  %v5245_v20 = vld [vmem:[%s10142_s5 + $0x190] sm:$0xff] }
 0x3db   : > { %v5947_v44 = vpop.f32.mrb[11].mxu0  ;;  %v4896_v56 = vmax.f32 %v4894_v4, %v4895_v40  ;;  %v5062_v30 = vrot.slane %v5014_v2, %v9440_v41  ;;  %v5016_v49 = vmax.f32 %v4856_v32, %v4884_v6  ;;  %v4834_v43 = vrot.slane %v9470_v25, 1  ;;  %v5197_v24 = vld [vmem:[%s10142_s5 + $0x10] sm:$0xff] }
 0x3dc   : > { %v5948_v63 = vadd.f32 %v5947_v44, %v5946_v5  ;;  %v5011_v19 = vmax.f32 %v9465_v35, %v4821_v23  ;;  %v4877_v54 = vmax.f32 %v4875_v48, %v4876_v12  ;;  %v4890_v8 = vrot.slane %v4889_v15, 1  ;;  %v5227_v48 = vld [vmem:[%s10142_s5 + $0x100] sm:$0xff]  ;;  %v5198_v44 = vld [vmem:[%s10142_s5 + $0x18] sm:$0xff]  ;;  %v5229_v32 = vld [vmem:[%s10142_s5 + $0x110] sm:$0xff] }
 0x3dd   : > { %v4897_v13 = vrot.slane %v4896_v56, 1  ;;  %v5069_v14 = vrot.slane %v5062_v30, %v9440_v41  ;;  %v5082_v10 = vrot.slane %v5016_v49, %v9440_v41  ;;  %v4835_v61 = vmax.f32 %v9470_v25, %v4834_v43 }
 0x3de   : > { %v4484_v59 = vadd.f32 %v5948_v63, %v9414_v60  ;;  %5031 = vst.msk [vmem:[#allocation3] sm:$0x1] %vm9489_vm14, %v5011_v19  ;;  %v6167_v42 = vpack.c.bf16 %v5212_v55, %v5211_v57  ;;  %v5015_v0 = vmax.f32 %v9482_v33, %v4877_v54  ;;  %v4891_v25 = vmax.f32 %v4889_v15, %v4890_v8  ;;  %v5246_v15 = vld [vmem:[%s10142_s5 + $0x198] sm:$0xff] }
 0x3df   : > { %v4898_v52 = vmax.f32 %v4896_v56, %v4897_v13  ;;  %5070 = vrot.lane.b32.xlu1 %v5069_v14, %s6646_s28  ;;  %v5089_v21 = vrot.slane %v5082_v10, %v9440_v41  ;;  %v6199_v34 = vpack.c.bf16 %v5244_v1, %v5243_v37  ;;  %v5013_v33 = vmax.f32 %v9467_v46, %v4835_v61 }
 0x3e0   : > { %v4589_v9 = vadd.f32 %v9421_v58, %v4484_v59  ;;  %v5195_v58 = vld [vmem:[%s10142_s5] sm:$0xff]  ;;  %6168 = vmatprep.subr.bf16.mxu1 %v6167_v42  ;;  %v4923_v18 = vrot.slane %v9500_v7, 2  ;;  %5074 = vst.msk [vmem:[#allocation3 + $0x2] sm:$0x1] %vm9489_vm14, %v5015_v0  ;;  %v5017_v46 = vmax.f32 %v9484_v36, %v4891_v25  ;;  %v6201_v26 = vpack.c.bf16 %v5228_v39, %v5227_v48  ;;  %v5230_v36 = vld [vmem:[%s10142_s5 + $0x118] sm:$0xff] }
 0x3e1   : > { %v5018_v4 = vmax.f32 %v4870_v62, %v4898_v52  ;;  %5090 = vrot.lane.b32.xlu0 %v5089_v21, %s6646_s28  ;;  %6200 = vmatprep.subr.bf16.mxu0 %v6199_v34  ;;  %v6169_v50 = vpack.c.bf16 %v5196_v28, %v5195_v58  ;;  %5054 = vst.msk [vmem:[#allocation3 + $0x1] sm:$0x1] %vm9489_vm14, %v5013_v33  ;;  %v4904_v43 = vrot.slane %v9497_v29, 1  ;;  %v4918_v1 = vrot.slane %v9506_v17, 1  ;;  %v5215_v39 = vld [vmem:[%s10142_s5 + $0xa0] sm:$0xff]  ;;  %v5216_v21 = vld [vmem:[%s10142_s5 + $0xa8] sm:$0xff] }
 0x3e2   : > { %v4607_v35 = vmax.f32 %v4589_v9, 0.0  ;;  %5094 = vst.msk [vmem:[#allocation3 + $0x3] sm:$0x1] %vm9489_vm14, %v5017_v46  ;;  %6202 = vmatpush3.bf16.msra.mxu0 %v6201_v26  ;;  %v6171_v59 = vpack.c.bf16 %v5214_v22, %v5213_v27  ;;  %v6203_v56 = vpack.c.bf16 %v5246_v15, %v5245_v20  ;;  %v6173_v23 = vpack.c.bf16 %v5198_v44, %v5197_v24  ;;  %v5199_v27 = vld [vmem:[%s10142_s5 + $0x20] sm:$0xff]  ;;  %v5200_v22 = vld [vmem:[%s10142_s5 + $0x28] sm:$0xff]  ;;  %v5217_v24 = vld [vmem:[%s10142_s5 + $0xb0] sm:$0xff] }
 0x3e3   : > { %v5102_v2 = vrot.slane %v5018_v4, %v9440_v41  ;;  %6170 = vmatpush3.bf16.msra.mxu1 %v6169_v50  ;;  %v6205_v19 = vpack.c.bf16 %v5230_v36, %v5229_v32  ;;  %v4910_v37 = vmax.f32 %v9493_v16, %v4909_v38  ;;  %v4905_v16 = vmax.f32 %v9497_v29, %v4904_v43  ;;  %v5231_v33 = vld [vmem:[%s10142_s5 + $0x120] sm:$0xff]  ;;  %v5232_v15 = vld [vmem:[%s10142_s5 + $0x128] sm:$0xff]  ;;  %v5218_v26 = vld [vmem:[%s10142_s5 + $0xb8] sm:$0xff] }
 0x3e4   : > { %v4703_v5 = vcombine.high %v4607_v35, %v4607_v35  ;;  %v4710_v47 = vrot.slane %v4607_v35, %v10317_v51  ;;  %6172 = vmatprep.subr.bf16.mxu1 %v6171_v59  ;;  %6204 = vmatprep.subr.bf16.mxu0 %v6203_v56  ;;  %v4924_v35 = vmax.f32 %v9500_v7, %v4923_v18  ;;  %v5247_v7 = vld [vmem:[%s10142_s5 + $0x1a0] sm:$0xff]  ;;  %v5202_v59 = vld [vmem:[%s10142_s5 + $0x38] sm:$0xff]  ;;  %v5233_v56 = vld [vmem:[%s10142_s5 + $0x130] sm:$0xff]  ;;  %vm9699_vm15 = vcmp.ge.s32.totalorder %v10327_v53, 64 }
 0x3e5   : > { %v5109_v57 = vrot.slane %v5102_v2, %v9440_v41  ;;  %v9595_v38 = vmax.f32 %v9506_v17, %v4918_v1  ;;  %v4911_v48 = vrot.slane %v4910_v37, 1  ;;  %v5248_v17 = vld [vmem:[%s10142_s5 + $0x1a8] sm:$0xff]  ;;  %v6177_v4 = vpack.c.bf16 %v5200_v22, %v5199_v27 }
 0x3e6   : > { %v4717_v12 = vrot.slane %v4703_v5, %v10317_v51  ;;  %v4718_v63 = vcombine.high %v4710_v47, %v4710_v47  ;;  %v4927_v40 = vsel %vm4786_vm13, %v4710_v47, -inf  ;;  %6206 = vmatpush3.bf16.msra.mxu0 %v6205_v19  ;;  %v4925_v20 = vrot.slane %v4924_v35, 1  ;;  %v5252_v1 = vld [vmem:[%s10142_s5 + $0x1c8] sm:$0xff] }
 0x3e7   : > { %v4928_v6 = vrot.slane %v4927_v40, 4  ;;  %5110 = vrot.lane.b32.xlu1 %v5109_v57, %s6646_s28  ;;  %6174 = vmatpush3.bf16.msra.mxu1 %v6173_v23  ;;  %v6175_v5 = vpack.c.bf16 %v5216_v21, %v5215_v39  ;;  %v6207_v47 = vpack.c.bf16 %v5248_v17, %v5247_v7  ;;  %v6209_v50 = vpack.c.bf16 %v5232_v15, %v5231_v33  ;;  %v5234_v57 = vld [vmem:[%s10142_s5 + $0x138] sm:$0xff] }
 0x3e8   : > { %v4719_v30 = vcombine.high %v4717_v12, %v4717_v12  ;;  %v4934_v49 = vsel %vm4786_vm13, %v4718_v63, -inf  ;;  %v4941_v62 = vsel %vm4786_vm13, %v4717_v12, -inf  ;;  %v5249_v12 = vld [vmem:[%s10142_s5 + $0x1b0] sm:$0xff]  ;;  %v5250_v63 = vld [vmem:[%s10142_s5 + $0x1b8] sm:$0xff]  ;;  %v6179_v32 = vpack.c.bf16 %v5218_v26, %v5217_v24 }
 0x3e9   : > { %v4929_v55 = vmax.f32 %v4927_v40, %v4928_v6  ;;  %v4935_v9 = vrot.slane %v4934_v49, 4  ;;  %v4942_v13 = vrot.slane %v4941_v62, 4  ;;  %v4912_v40 = vmax.f32 %v4910_v37, %v4911_v48  ;;  %6176 = vmatprep.subr.bf16.mxu1 %v6175_v5  ;;  %6208 = vmatprep.subr.bf16.mxu0 %v6207_v47  ;;  %v5201_v6 = vld [vmem:[%s10142_s5 + $0x30] sm:$0xff]  ;;  %v5251_v37 = vld [vmem:[%s10142_s5 + $0x1c0] sm:$0xff] }
 0x3ea   : > { %v4948_v14 = vsel %vm4786_vm13, %v4719_v30, -inf  ;;  %v6211_v36 = vpack.c.bf16 %v5250_v63, %v5249_v12  ;;  %6210 = vmatpush3.bf16.msra.mxu0 %v6209_v50  ;;  %v6213_v19 = vpack.c.bf16 %v5234_v57, %v5233_v56  ;;  %vm5051_vm0 = vcmp.lt.s32.totalorder %v10327_v53, 128 }
 0x3eb   : > { %v4930_v10 = vrot.slane %v4929_v55, 2  ;;  %v4936_v54 = vmax.f32 %v4934_v49, %v4935_v9  ;;  %v4943_v8 = vmax.f32 %v4941_v62, %v4942_v13  ;;  %v4949_v58 = vrot.slane %v4948_v14, 4  ;;  %6178 = vmatpush3.bf16.msra.mxu1 %v6177_v4  ;;  %v5220_v9 = vld [vmem:[%s10142_s5 + $0xc8] sm:$0xff]  ;;  %vm9782_vm1 = vmand %vm9699_vm15, %vm5051_vm0 }
 0x3ec   : > { %v6181_v62 = vpack.c.bf16 %v5202_v59, %v5201_v6  ;;  %6180 = vmatprep.subr.bf16.mxu1 %v6179_v32  ;;  %6212 = vmatprep.subr.bf16.mxu0 %v6211_v36  ;;  %vm5778_vm2 = vcmp.lt.s32.totalorder %v10327_v53, 256 }
 0x3ed   : > { %v4931_v52 = vmax.f32 %v4929_v55, %v4930_v10  ;;  %v4944_v61 = vrot.slane %v4943_v8, 2  ;;  %v4937_v42 = vrot.slane %v4936_v54, 2  ;;  %v4950_v28 = vmax.f32 %v4948_v14, %v4949_v58  ;;  %v5219_v55 = vld [vmem:[%s10142_s5 + $0xc0] sm:$0xff] }
 0x3ee   : > { %v6183_v43 = vpack.c.bf16 %v5220_v9, %v5219_v55  ;;  %v5203_v14 = vld [vmem:[%s10142_s5 + $0x40] sm:$0xff]  ;;  %v6215_v58 = vpack.c.bf16 %v5252_v1, %v5251_v37  ;;  %6214 = vmatpush3.bf16.msra.mxu0 %v6213_v19 }
 0x3ef   : > { %v4932_v0 = vrot.slane %v4931_v52, 1  ;;  %v4945_v25 = vmax.f32 %v4943_v8, %v4944_v61  ;;  %v4938_v34 = vmax.f32 %v4936_v54, %v4937_v42  ;;  %v4951_v29 = vrot.slane %v4950_v28, 2  ;;  %v5235_v61 = vld [vmem:[%s10142_s5 + $0x140] sm:$0xff]  ;;  %v5236_v42 = vld [vmem:[%s10142_s5 + $0x148] sm:$0xff]  ;;  %6182 = vmatpush3.bf16.msra.mxu1 %v6181_v62 }
 0x3f0   : > { %v4926_v54 = vmax.f32 %v4924_v35, %v4925_v20  ;;  %6184 = vmatprep.subr.bf16.mxu1 %v6183_v43  ;;  %6216 = vmatprep.subr.bf16.mxu0 %v6215_v58  ;;  %v6217_v39 = vpack.c.bf16 %v5236_v42, %v5235_v61 }
 0x3f1   : > { %v4939_v44 = vrot.slane %v4938_v34, 1  ;;  %v4952_v18 = vmax.f32 %v4950_v28, %v4951_v29  ;;  %v4933_v46 = vmax.f32 %v4931_v52, %v4932_v0  ;;  %v4946_v2 = vrot.slane %v4945_v25, 1  ;;  %v5204_v52 = vld [vmem:[%s10142_s5 + $0x48] sm:$0xff] }
 0x3f2   : > { %v6185_v48 = vpack.c.bf16 %v5204_v52, %v5203_v14  ;;  %6218 = vmatpush3.bf16.msra.mxu0 %v6217_v39 }
 0x3f3   : > { %v4940_v23 = vmax.f32 %v4938_v34, %v4939_v44  ;;  %v4953_v30 = vrot.slane %v4952_v18, 1  ;;  %v5019_v49 = vmax.f32 %v4905_v16, %v4933_v46  ;;  %v4947_v13 = vmax.f32 %v4945_v25, %v4946_v2 }
 0x3f4   : > { %6186 = vmatpush3.bf16.msra.mxu1 %v6185_v48 }
 0x3f5   : > { %v5020_v10 = vmax.f32 %v4912_v40, %v4940_v23  ;;  %v4954_v8 = vmax.f32 %v4952_v18, %v4953_v30  ;;  %5114 = vst.msk [vmem:[#allocation3 + $0x4] sm:$0x1] %vm9489_vm14, %v5019_v49  ;;  %v5021_v28 = vmax.f32 %v9595_v38, %v4947_v13 }
 0x3f7   : > { %v5122_v35 = vrot.slane %v5020_v10, %v9440_v41  ;;  %v5022_v16 = vmax.f32 %v4926_v54, %v4954_v8  ;;  %5134 = vst.msk [vmem:[#allocation3 + $0x5] sm:$0x1] %vm9489_vm14, %v5021_v28 }
 0x3f9   : > { %v5129_v21 = vrot.slane %v5122_v35, %v9440_v41  ;;  %v5142_v7 = vrot.slane %v5022_v16, %v9440_v41 }
 0x3fb   : > { %5130 = vrot.lane.b32.xlu0 %v5129_v21, %s6646_s28  ;;  %v5149_v38 = vrot.slane %v5142_v7, %v9440_v41  ;;  %v5307_v7 = vld [vmem:[%s10142_s5 + $0x380] sm:$0xff] }
 0x3fd   : > { %5150 = vrot.lane.b32.xlu1 %v5149_v38, %s6646_s28  ;;  %v5221_v38 = vld [vmem:[%s10142_s5 + $0xd0] sm:$0xff] }
 0x426   : > { %v5949_v0 = vpop.f32.mrb[12].mxu0 }
 0x427   : > { %v5950_v25 = vpop.f32.mrb[13].mxu0 }
 0x428   : > { %v5951_v34 = vadd.f32 %v5950_v25, %v5949_v0  ;;  %v5222_v0 = vld [vmem:[%s10142_s5 + $0xd8] sm:$0xff]  ;;  %v5253_v25 = vld [vmem:[%s10142_s5 + $0x1d0] sm:$0xff] }
 0x42a   : > { %v4489_v29 = vadd.f32 %v5951_v34, %v9414_v60 }
 0x42b   : > { %v5952_v17 = vpop.f32.mrb[14].mxu0 }
 0x42c   : > { %v4594_v27 = vadd.f32 %v9433_v31, %v4489_v29  ;;  %v5953_v22 = vpop.f32.mrb[15].mxu0 }
 0x42d   : > { %v5954_v20 = vadd.f32 %v5953_v22, %v5952_v17  ;;  %v5254_v22 = vld [vmem:[%s10142_s5 + $0x1d8] sm:$0xff] }
 0x42e   : > { %v4608_v5 = vmax.f32 %v4594_v27, 0.0 }
 0x42f   : > { %v4494_v47 = vadd.f32 %v5954_v20, %v9414_v60  ;;  %v5205_v20 = vld [vmem:[%s10142_s5 + $0x50] sm:$0xff] }
 0x430   : > { %v4720_v4 = vcombine.high %v4608_v5, %v4608_v5  ;;  %v4727_v33 = vrot.slane %v4608_v5, %v10317_v51  ;;  %v5206_v5 = vld [vmem:[%s10142_s5 + $0x58] sm:$0xff] }
 0x431   : > { %v4599_v15 = vadd.f32 %v9430_v45, %v4494_v47 }
 0x432   : > { %v4734_v24 = vrot.slane %v4720_v4, %v10317_v51  ;;  %v4735_v44 = vcombine.high %v4727_v33, %v4727_v33  ;;  %v4955_v18 = vsel %vm4786_vm13, %v4727_v33, -inf  ;;  %v6187_v4 = vpack.c.bf16 %v5222_v0, %v5221_v38 }
 0x433   : > { %v4956_v46 = vrot.slane %v4955_v18, 4  ;;  %v4609_v50 = vmax.f32 %v4599_v15, 0.0  ;;  %v6219_v33 = vpack.c.bf16 %v5254_v22, %v5253_v25  ;;  %v6189_v15 = vpack.c.bf16 %v5206_v5, %v5205_v20  ;;  %v5308_v22 = vld [vmem:[%s10142_s5 + $0x388] sm:$0xff]  ;;  %v5313_v25 = vld [vmem:[%s10142_s5 + $0x3b0] sm:$0xff] }
 0x434   : > { %v4736_v26 = vcombine.high %v4734_v24, %v4734_v24  ;;  %v4962_v31 = vsel %vm4786_vm13, %v4735_v44, -inf  ;;  %v4969_v12 = vsel %vm4786_vm13, %v4734_v24, -inf  ;;  %v5237_v24 = vld [vmem:[%s10142_s5 + $0x150] sm:$0xff]  ;;  %v5238_v44 = vld [vmem:[%s10142_s5 + $0x158] sm:$0xff]  ;;  %6188 = vmatprep.subr.bf16.mxu1 %v6187_v4 }
 0x435   : > { %v4957_v63 = vmax.f32 %v4955_v18, %v4956_v46  ;;  %v4963_v40 = vrot.slane %v4962_v31, 4  ;;  %v4970_v60 = vrot.slane %v4969_v12, 4  ;;  %v4737_v2 = vcombine.high %v4609_v50, %v4609_v50  ;;  %6220 = vmatprep.subr.bf16.mxu0 %v6219_v33  ;;  %6190 = vmatpush3.bf16.msra.mxu1 %v6189_v15 }
 0x436   : > { %v4976_v32 = vsel %vm4786_vm13, %v4736_v26, -inf  ;;  %v4744_v45 = vrot.slane %v4609_v50, %v10317_v51 }
 0x437   : > { %v4958_v36 = vrot.slane %v4957_v63, 2  ;;  %v4964_v6 = vmax.f32 %v4962_v31, %v4963_v40  ;;  %v4971_v59 = vmax.f32 %v4969_v12, %v4970_v60  ;;  %v4977_v56 = vrot.slane %v4976_v32, 4  ;;  %v5223_v31 = vld [vmem:[%s10142_s5 + $0xe0] sm:$0xff]  ;;  %v5224_v12 = vld [vmem:[%s10142_s5 + $0xe8] sm:$0xff] }
 0x438   : > { %v4751_v23 = vrot.slane %v4737_v2, %v10317_v51  ;;  %v4752_v30 = vcombine.high %v4744_v45, %v4744_v45  ;;  %v4983_v49 = vsel %vm4786_vm13, %v4744_v45, -inf  ;;  %v6221_v2 = vpack.c.bf16 %v5238_v44, %v5237_v24  ;;  %v5256_v45 = vld [vmem:[%s10142_s5 + $0x1e8] sm:$0xff] }
 0x439   : > { %v4959_v62 = vmax.f32 %v4957_v63, %v4958_v36  ;;  %v4965_v57 = vrot.slane %v4964_v6, 2  ;;  %v4972_v55 = vrot.slane %v4971_v59, 2  ;;  %v4978_v9 = vmax.f32 %v4976_v32, %v4977_v56  ;;  %v5255_v63 = vld [vmem:[%s10142_s5 + $0x1e0] sm:$0xff] }
 0x43a   : > { %v4753_v13 = vcombine.high %v4751_v23, %v4751_v23  ;;  %v4984_v19 = vrot.slane %v4983_v49, 4  ;;  %v4990_v43 = vsel %vm4786_vm13, %v4752_v30, -inf  ;;  %v4997_v37 = vsel %vm4786_vm13, %v4751_v23, -inf  ;;  %v5207_v36 = vld [vmem:[%s10142_s5 + $0x60] sm:$0xff]  ;;  %6222 = vmatpush3.bf16.msra.mxu0 %v6221_v2  ;;  %v5292_v2 = vld [vmem:[%s10142_s5 + $0x308] sm:$0xff] }
 0x43b   : > { %v4960_v1 = vrot.slane %v4959_v62, 1  ;;  %v4966_v14 = vmax.f32 %v4964_v6, %v4965_v57  ;;  %v4973_v10 = vmax.f32 %v4971_v59, %v4972_v55  ;;  %v4979_v54 = vrot.slane %v4978_v9, 2  ;;  %v5208_v6 = vld [vmem:[%s10142_s5 + $0x68] sm:$0xff]  ;;  %v5225_v57 = vld [vmem:[%s10142_s5 + $0xf0] sm:$0xff] }
 0x43c   : > { %v4985_v8 = vmax.f32 %v4983_v49, %v4984_v19  ;;  %v4991_v58 = vrot.slane %v4990_v43, 4  ;;  %v4998_v51 = vrot.slane %v4997_v37, 4  ;;  %v5004_v52 = vsel %vm4786_vm13, %v4753_v13, -inf  ;;  %v5239_v49 = vld [vmem:[%s10142_s5 + $0x160] sm:$0xff] }
 0x43d   : > { %v5005_v61 = vrot.slane %v5004_v52, 4  ;;  %v4974_v42 = vrot.slane %v4973_v10, 1  ;;  %v9696_v48 = vmax.f32 %v4959_v62, %v4960_v1  ;;  %v4980_v39 = vmax.f32 %v4978_v9, %v4979_v54  ;;  %v5240_v62 = vld [vmem:[%s10142_s5 + $0x168] sm:$0xff]  ;;  %v5258_v1 = vld [vmem:[%s10142_s5 + $0x1f8] sm:$0xff] }
 0x43e   : > { %v4986_v28 = vrot.slane %v4985_v8, 2  ;;  %v4992_v35 = vmax.f32 %v4990_v43, %v4991_v58  ;;  %v4999_v16 = vmax.f32 %v4997_v37, %v4998_v51  ;;  %v4967_v17 = vrot.slane %v4966_v14, 1  ;;  %v5226_v43 = vld [vmem:[%s10142_s5 + $0xf8] sm:$0xff]  ;;  %v5257_v37 = vld [vmem:[%s10142_s5 + $0x1f0] sm:$0xff] }
 0x43f   : > { %v5006_v21 = vmax.f32 %v5004_v52, %v5005_v61  ;;  %v4975_v18 = vmax.f32 %v4973_v10, %v4974_v42  ;;  %v4981_v40 = vrot.slane %v4980_v39, 1  ;;  %v6191_v32 = vpack.c.bf16 %v5224_v12, %v5223_v31  ;;  %v5209_v58 = vld [vmem:[%s10142_s5 + $0x70] sm:$0xff]  ;;  %v5210_v51 = vld [vmem:[%s10142_s5 + $0x78] sm:$0xff] }
 0x440   : > { %v4987_v34 = vmax.f32 %v4985_v8, %v4986_v28  ;;  %v5000_v29 = vrot.slane %v4999_v16, 2  ;;  %v4993_v27 = vrot.slane %v4992_v35, 2  ;;  %v6223_v30 = vpack.c.bf16 %v5256_v45, %v5255_v63  ;;  %v5241_v52 = vld [vmem:[%s10142_s5 + $0x170] sm:$0xff]  ;;  %v5278_v45 = vld [vmem:[%s10142_s5 + $0x298] sm:$0xff] }
 0x441   : > { %v5007_v47 = vrot.slane %v5006_v21, 2  ;;  %v4968_v55 = vmax.f32 %v4966_v14, %v4967_v17  ;;  %6192 = vmatprep.subr.bf16.mxu1 %v6191_v32  ;;  %v6193_v13 = vpack.c.bf16 %v5208_v6, %v5207_v36  ;;  %v6225_v19 = vpack.c.bf16 %v5240_v62, %v5239_v49  ;;  %v5276_v17 = vld [vmem:[%s10142_s5 + $0x288] sm:$0xff]  ;;  %v5277_v32 = vld [vmem:[%s10142_s5 + $0x290] sm:$0xff]  ;;  %v5310_v49 = vld [vmem:[%s10142_s5 + $0x398] sm:$0xff] }
 0x442   : > { %v4988_v46 = vrot.slane %v4987_v34, 1  ;;  %v5001_v50 = vmax.f32 %v4999_v16, %v5000_v29  ;;  %v4994_v26 = vmax.f32 %v4992_v35, %v4993_v27  ;;  %6224 = vmatprep.subr.bf16.mxu0 %v6223_v30  ;;  %v6195_v8 = vpack.c.bf16 %v5226_v43, %v5225_v57  ;;  %v5242_v35 = vld [vmem:[%s10142_s5 + $0x178] sm:$0xff]  ;;  %v5275_v29 = vld [vmem:[%s10142_s5 + $0x280] sm:$0xff]  ;;  %v5309_v30 = vld [vmem:[%s10142_s5 + $0x390] sm:$0xff] }
 0x443   : > { %v5008_v60 = vmax.f32 %v5006_v21, %v5007_v47  ;;  %v4982_v61 = vmax.f32 %v4980_v39, %v4981_v40  ;;  %v6227_v28 = vpack.c.bf16 %v5258_v1, %v5257_v37  ;;  %6194 = vmatpush3.bf16.msra.mxu1 %v6193_v13  ;;  %v6197_v21 = vpack.c.bf16 %v5210_v51, %v5209_v58  ;;  %v5260_v40 = vld [vmem:[%s10142_s5 + $0x208] sm:$0xff]  ;;  %v5261_v13 = vld [vmem:[%s10142_s5 + $0x210] sm:$0xff]  ;;  %v5294_v37 = vld [vmem:[%s10142_s5 + $0x318] sm:$0xff] }
 0x444   : > { %v4995_v59 = vrot.slane %v4994_v26, 1  ;;  %v4989_v56 = vmax.f32 %v4987_v34, %v4988_v46  ;;  %v5002_v23 = vrot.slane %v5001_v50, 1  ;;  %6226 = vmatpush3.bf16.msra.mxu0 %v6225_v19  ;;  %6196 = vmatprep.subr.bf16.mxu1 %v6195_v8  ;;  %v6229_v0 = vpack.c.bf16 %v5242_v35, %v5241_v52  ;;  %v5262_v19 = vld [vmem:[%s10142_s5 + $0x218] sm:$0xff]  ;;  %v5293_v43 = vld [vmem:[%s10142_s5 + $0x310] sm:$0xff]  ;;  %v5279_v1 = vld [vmem:[%s10142_s5 + $0x2a0] sm:$0xff] }
 0x445   : > { %v5009_v9 = vrot.slane %v5008_v60, 1  ;;  %6228 = vmatprep.subr.bf16.mxu0 %v6227_v28  ;;  %v6231_v3 = vpack.c.bf16 %v5276_v17, %v5275_v29  ;;  %v6263_v47 = vpack.c.bf16 %v5308_v22, %v5307_v7  ;;  %v5339_v31 = vsub.s32 3, %v10326_v11  ;;  %v5311_v8 = vld [vmem:[%s10142_s5 + $0x3a0] sm:$0xff]  ;;  %v5312_v58 = vld [vmem:[%s10142_s5 + $0x3a8] sm:$0xff]  ;;  %v5265_v7 = vld [vmem:[%s10142_s5 + $0x230] sm:$0xff] }
 0x446   : > { %v4996_v10 = vmax.f32 %v4994_v26, %v4995_v59  ;;  %v5023_v14 = vmax.f32 %v9696_v48, %v4989_v56  ;;  %v5003_v54 = vmax.f32 %v5001_v50, %v5002_v23  ;;  %v5331_v50 = vsub.s32 1, %v10326_v11  ;;  %v5259_v26 = vld [vmem:[%s10142_s5 + $0x200] sm:$0xff]  ;;  %v5264_v35 = vld [vmem:[%s10142_s5 + $0x228] sm:$0xff] }
 0x447   : > { %v5010_v42 = vmax.f32 %v5008_v60, %v5009_v9  ;;  %6198 = vmatpush3.bf16.msra.mxu1 %v6197_v21  ;;  %v5327_v12 = vsub.s32 0, %v10326_v11  ;;  %v5335_v63 = vsub.s32 2, %v10326_v11  ;;  %v5291_v60 = vld [vmem:[%s10142_s5 + $0x300] sm:$0xff]  ;;  %v6233_v6 = vpack.c.bf16 %v5260_v40, %v5259_v26  ;;  %v5300_v40 = vld [vmem:[%s10142_s5 + $0x348] sm:$0xff] }
 0x448   : > { %v5024_v16 = vmax.f32 %v4968_v55, %v4996_v10  ;;  %5154 = vst.msk [vmem:[#allocation3 + $0x6] sm:$0x1] %vm9489_vm14, %v5023_v14  ;;  %v5025_v48 = vmax.f32 %v4975_v18, %v5003_v54  ;;  %6230 = vmatpush3.bf16.msra.mxu0 %v6229_v0  ;;  %6232 = vmatprep.subr.bf16.mxu1 %v6231_v3  ;;  %v5347_v56 = vsub.s32 5, %v10326_v11  ;;  %v5355_v23 = vsub.s32 7, %v10326_v11  ;;  %v5280_v54 = vld [vmem:[%s10142_s5 + $0x2a8] sm:$0xff]  ;;  %v5263_v28 = vld [vmem:[%s10142_s5 + $0x220] sm:$0xff] }
 0x449   : > { %v5026_v38 = vmax.f32 %v4982_v61, %v5010_v42  ;;  %v5048_v5 = vpop.permute.xlu0 %5047  ;;  %6264 = vmatprep.subr.bf16.mxu0 %v6263_v47  ;;  %v6265_v59 = vpack.c.bf16 %v5292_v2, %v5291_v60  ;;  %v6235_v10 = vpack.c.bf16 %v5278_v45, %v5277_v32  ;;  %v6267_v14 = vpack.c.bf16 %v5310_v49, %v5309_v30  ;;  %v5295_v21 = vld [vmem:[%s10142_s5 + $0x320] sm:$0xff]  ;;  %v5281_v0 = vld [vmem:[%s10142_s5 + $0x2b0] sm:$0xff]  ;;  %v5286_v2 = vld [vmem:[%s10142_s5 + $0x2d8] sm:$0xff] }
 0x44a   : > { %v5162_v39 = vrot.slane %v5024_v16, %v9440_v41  ;;  %5174 = vst.msk [vmem:[#allocation3 + $0x7] sm:$0x1] %vm9489_vm14, %v5025_v48  ;;  %v6237_v61 = vpack.c.bf16 %v5262_v19, %v5261_v13  ;;  %v6269_v42 = vpack.c.bf16 %v5294_v37, %v5293_v43  ;;  %v6239_v16 = vpack.c.bf16 %v5280_v54, %v5279_v1  ;;  %v5283_v47 = vld [vmem:[%s10142_s5 + $0x2c0] sm:$0xff]  ;;  %v5285_v60 = vld [vmem:[%s10142_s5 + $0x2d0] sm:$0xff]  ;;  %v5318_v45 = vld [vmem:[%s10142_s5 + $0x3d8] sm:$0xff] }
 0x44b   : > { %v5182_v34 = vrot.slane %v5026_v38, %v9440_v41  ;;  %5053 = vst.msk [vmem:[#allocation3] sm:$0x1] %vm9782_vm1, %v5048_v5  ;;  %v6271_v48 = vpack.c.bf16 %v5312_v58, %v5311_v8  ;;  %v5296_v38 = vld [vmem:[%s10142_s5 + $0x328] sm:$0xff]  ;;  %v6241_v29 = vpack.c.bf16 %v5264_v35, %v5263_v28  ;;  %v5298_v5 = vld [vmem:[%s10142_s5 + $0x338] sm:$0xff]  ;;  %v5317_v32 = vld [vmem:[%s10142_s5 + $0x3d0] sm:$0xff]  ;;  %v6251_v30 = vpack.c.bf16 %v5286_v2, %v5285_v60 }
 0x44c   : > { %v5169_v27 = vrot.slane %v5162_v39, %v9440_v41  ;;  %v5282_v39 = vld [vmem:[%s10142_s5 + $0x2b8] sm:$0xff]  ;;  %v6273_v17 = vpack.c.bf16 %v5296_v38, %v5295_v21  ;;  %v6283_v49 = vpack.c.bf16 %v5318_v45, %v5317_v32  ;;  %v5319_v13 = vld [vmem:[%s10142_s5 + $0x3e0] sm:$0xff]  ;;  %v5320_v19 = vld [vmem:[%s10142_s5 + $0x3e8] sm:$0xff] }
 0x44d   : > { %v5189_v20 = vrot.slane %v5182_v34, %v9440_v41  ;;  %v5314_v34 = vld [vmem:[%s10142_s5 + $0x3b8] sm:$0xff]  ;;  %v6243_v3 = vpack.c.bf16 %v5282_v39, %v5281_v0  ;;  %v5271_v1 = vld [vmem:[%s10142_s5 + $0x260] sm:$0xff]  ;;  %v6287_v54 = vpack.c.bf16 %v5320_v19, %v5319_v13  ;;  %v5304_v58 = vld [vmem:[%s10142_s5 + $0x368] sm:$0xff] }
 0x44e   : > { %5170 = vrot.lane.b32.xlu0 %v5169_v27, %s6646_s28  ;;  %v5266_v27 = vld [vmem:[%s10142_s5 + $0x238] sm:$0xff]  ;;  %v6275_v22 = vpack.c.bf16 %v5314_v34, %v5313_v25  ;;  %v5303_v8 = vld [vmem:[%s10142_s5 + $0x360] sm:$0xff]  ;;  %v5305_v0 = vld [vmem:[%s10142_s5 + $0x370] sm:$0xff] }
 0x44f   : > { %5190 = vrot.lane.b32.xlu1 %v5189_v20, %s6646_s28  ;;  %v5297_v20 = vld [vmem:[%s10142_s5 + $0x330] sm:$0xff]  ;;  %v6289_v35 = vpack.c.bf16 %v5304_v58, %v5303_v8  ;;  %v5274_v38 = vld [vmem:[%s10142_s5 + $0x278] sm:$0xff]  ;;  %v5658_v2 = vld [vmem:[%s10144_s7 + $0x68] sm:$0xff] }
 0x450   : > { %v5306_v39 = vld [vmem:[%s10142_s5 + $0x378] sm:$0xff]  ;;  %v5655_v60 = vld [vmem:[%s10144_s7 + $0x50] sm:$0xff]  ;;  %v5669_v58 = vld [vmem:[%s10144_s7 + $0xc0] sm:$0xff] }
 0x451   : > { %v5071_v4 = vpop.permute.xlu1 %5070  ;;  %v6293_v34 = vpack.c.bf16 %v5306_v39, %v5305_v0  ;;  %v5660_v32 = vld [vmem:[%s10144_s7 + $0x78] sm:$0xff]  ;;  %v5323_v0 = vld [vmem:[#allocation8] sm:$0x1] }
 0x452   : > { %5073 = vst.msk [vmem:[#allocation3 + $0x1] sm:$0x1] %vm9782_vm1, %v5071_v4  ;;  %v5284_v4 = vld [vmem:[%s10142_s5 + $0x2c8] sm:$0xff]  ;;  %v5668_v13 = vld [vmem:[%s10144_s7 + $0xb8] sm:$0xff] }
 0x453   : > { %v5091_v33 = vpop.permute.xlu0 %5090  ;;  %v6247_v26 = vpack.c.bf16 %v5284_v4, %v5283_v47  ;;  %v5650_v4 = vld [vmem:[%s10144_s7 + $0x28] sm:$0xff] }
 0x454   : > { %5093 = vst.msk [vmem:[#allocation3 + $0x2] sm:$0x1] %vm9782_vm1, %v5091_v33  ;;  %v5315_v33 = vld [vmem:[%s10142_s5 + $0x3c0] sm:$0xff] }
 0x459   : > { %v5111_v15 = vpop.permute.xlu1 %5110 }
 0x45a   : > { %5113 = vst.msk [vmem:[#allocation3 + $0x3] sm:$0x1] %vm9782_vm1, %v5111_v15  ;;  %v5316_v15 = vld [vmem:[%s10142_s5 + $0x3c8] sm:$0xff] }
 0x46d   : > { %v5131_v24 = vpop.permute.xlu0 %5130 }
 0x46e   : > { %5133 = vst.msk [vmem:[#allocation3 + $0x4] sm:$0x1] %vm9782_vm1, %v5131_v24  ;;  %v6245_v24 = vpack.c.bf16 %v5266_v27, %v5265_v7 }
 0x46f   : > { %v5151_v44 = vpop.permute.xlu1 %5150 }
 0x470   : > { %5153 = vst.msk [vmem:[#allocation3 + $0x5] sm:$0x1] %vm9782_vm1, %v5151_v44  ;;  %v6277_v44 = vpack.c.bf16 %v5298_v5, %v5297_v20  ;;  %v5648_v20 = vld [vmem:[%s10144_s7 + $0x18] sm:$0xff]  ;;  %v5645_v5 = vld [vmem:[%s10144_s7] sm:$0xff] }
 0x4c0   : > { %v5171_v18 = vpop.permute.xlu0 %5170 }
 0x4c1   : > { %5173 = vst.msk [vmem:[#allocation3 + $0x6] sm:$0x1] %vm9782_vm1, %v5171_v18  ;;  %v5191_v46 = vpop.permute.xlu1 %5190  ;;  %v5267_v18 = vld [vmem:[%s10142_s5 + $0x240] sm:$0xff] }
 0x4c2   : > { %5193 = vst.msk [vmem:[#allocation3 + $0x7] sm:$0x1] %vm9782_vm1, %v5191_v46  ;;  %v5268_v46 = vld [vmem:[%s10142_s5 + $0x248] sm:$0xff] }
 0x4c9   : > { %v9843_v36 = vld [vmem:[#allocation3] sm:$0xff] }
 0x4ca   : > { %v5332_v62 = vrot.slane %v9843_v36, %v5331_v50  ;;  %v5340_v57 = vrot.slane %v9843_v36, %v5339_v31  ;;  %v5328_v55 = vrot.slane %v9843_v36, %v5327_v12  ;;  %v5336_v9 = vrot.slane %v9843_v36, %v5335_v63  ;;  %v5299_v63 = vld [vmem:[%s10142_s5 + $0x340] sm:$0xff] }
 0x4cb   : > { %v5348_v51 = vrot.slane %v9843_v36, %v5347_v56  ;;  %v5356_v52 = vrot.slane %v9843_v36, %v5355_v23  ;;  %v6279_v31 = vpack.c.bf16 %v5316_v15, %v5315_v33  ;;  %v5269_v56 = vld [vmem:[%s10142_s5 + $0x250] sm:$0xff]  ;;  %v5270_v23 = vld [vmem:[%s10142_s5 + $0x258] sm:$0xff] }
 0x4cc   : > { %5429 = vmatprep.mubr.f32.mxu1 %v5332_v62  ;;  %5499 = vmatprep.mubr.f32.mxu0 %v5340_v57  ;;  %v5301_v62 = vld [vmem:[%s10142_s5 + $0x350] sm:$0xff]  ;;  %v5302_v57 = vld [vmem:[%s10142_s5 + $0x358] sm:$0xff]  ;;  %v6253_v43 = vpack.c.bf16 %v5270_v23, %v5269_v56  ;;  %v5662_v23 = vld [vmem:[%s10144_s7 + $0x88] sm:$0xff] }
 0x4cd   : > { %5430 = vmatmul.mubr.f32.vlgmr.msra.gmra.mrb[8].mxu1 %v5328_v55  ;;  %5500 = vmatmul.mubr.f32.vlgmr.msra.gmra.mrb[16].mxu0 %v5336_v9  ;;  %v5287_v55 = vld [vmem:[%s10142_s5 + $0x2e0] sm:$0xff]  ;;  %v5288_v9 = vld [vmem:[%s10142_s5 + $0x2e8] sm:$0xff]  ;;  %v6285_v37 = vpack.c.bf16 %v5302_v57, %v5301_v62  ;;  %v5652_v33 = vld [vmem:[%s10144_s7 + $0x38] sm:$0xff] }
 0x4ce   : > { %6234 = vmatpush3.bf16.msra.mxu1 %v6233_v6  ;;  %6266 = vmatpush3.bf16.msra.mxu0 %v6265_v59  ;;  %v6249_v6 = vpack.c.bf16 %v5268_v46, %v5267_v18  ;;  %v6281_v59 = vpack.c.bf16 %v5300_v40, %v5299_v63  ;;  %v5651_v18 = vld [vmem:[%s10144_s7 + $0x30] sm:$0xff]  ;;  %v5654_v46 = vld [vmem:[%s10144_s7 + $0x48] sm:$0xff]  ;;  %v5653_v40 = vld [vmem:[%s10144_s7 + $0x40] sm:$0xff] }
 0x4cf   : > { %5569 = vmatprep.mubr.f32.mxu1 %v5348_v51  ;;  %5639 = vmatprep.mubr.f32.mxu0 %v5356_v52  ;;  %v5289_v51 = vld [vmem:[%s10142_s5 + $0x2f0] sm:$0xff]  ;;  %v5290_v52 = vld [vmem:[%s10142_s5 + $0x2f8] sm:$0xff]  ;;  %v6305_v45 = vpack.c.bf16 %v5655_v60, %v5653_v40  ;;  %v5661_v57 = vld [vmem:[%s10144_s7 + $0x80] sm:$0xff] }
 0x4d0   : > { %6236 = vmatprep.subr.bf16.mxu1 %v6235_v10  ;;  %6268 = vmatprep.subr.bf16.mxu0 %v6267_v14  ;;  %v5272_v10 = vld [vmem:[%s10142_s5 + $0x268] sm:$0xff]  ;;  %v6255_v14 = vpack.c.bf16 %v5288_v9, %v5287_v55  ;;  %v5659_v56 = vld [vmem:[%s10144_s7 + $0x70] sm:$0xff] }
 0x4d1   : > { %v6257_v28 = vpack.c.bf16 %v5272_v10, %v5271_v1  ;;  %v5663_v55 = vld [vmem:[%s10144_s7 + $0x90] sm:$0xff]  ;;  %v5666_v9 = vld [vmem:[%s10144_s7 + $0xa8] sm:$0xff] }
 0x4d2   : > { %6238 = vmatpush3.bf16.msra.mxu1 %v6237_v61  ;;  %6270 = vmatpush3.bf16.msra.mxu0 %v6269_v42  ;;  %v5321_v61 = vld [vmem:[%s10142_s5 + $0x3f0] sm:$0xff]  ;;  %v5322_v42 = vld [vmem:[%s10142_s5 + $0x3f8] sm:$0xff]  ;;  %v6313_v19 = vpack.c.bf16 %v5663_v55, %v5661_v57 }
 0x4d3   : > { %6240 = vmatprep.subr.bf16.mxu1 %v6239_v16  ;;  %6272 = vmatprep.subr.bf16.mxu0 %v6271_v48  ;;  %v5273_v16 = vld [vmem:[%s10142_s5 + $0x270] sm:$0xff]  ;;  %v6259_v48 = vpack.c.bf16 %v5290_v52, %v5289_v51  ;;  %v6291_v21 = vpack.c.bf16 %v5322_v42, %v5321_v61  ;;  %v5674_v61 = vld [vmem:[%s10144_s7 + $0xe8] sm:$0xff]  ;;  %v5676_v42 = vld [vmem:[%s10144_s7 + $0xf8] sm:$0xff] }
 0x4d4   : > { %v6261_v25 = vpack.c.bf16 %v5274_v38, %v5273_v16  ;;  %v5667_v1 = vld [vmem:[%s10144_s7 + $0xb0] sm:$0xff] }
 0x4d5   : > { %v5671_v51 = vld [vmem:[%s10144_s7 + $0xd0] sm:$0xff] }
 0x4d6   : > { %6242 = vmatpush3.bf16.msra.mxu1 %v6241_v29  ;;  %6274 = vmatpush3.bf16.msra.mxu0 %v6273_v17  ;;  %v5343_v29 = vsub.s32 4, %v10326_v11  ;;  %v5351_v17 = vsub.s32 6, %v10326_v11  ;;  %v6321_v52 = vpack.c.bf16 %v5671_v51, %v5669_v58  ;;  %v5675_v16 = vld [vmem:[%s10144_s7 + $0xf0] sm:$0xff] }
 0x4d7   : > { %6244 = vmatprep.subr.bf16.mxu1 %v6243_v3  ;;  %6276 = vmatprep.subr.bf16.mxu0 %v6275_v22  ;;  %v10334_v3 = vmov 0.0   ;;  %v5646_v22 = vld [vmem:[%s10144_s7 + $0x8] sm:$0xff] }
 0x4d8   : > { %v5344_v7 = vrot.slane %v9843_v36, %v5343_v29  ;;  %v5352_v27 = vrot.slane %v9843_v36, %v5351_v17  ;;  %v6295_v47 = vpack.c.bf16 %v5648_v20, %v5646_v22  ;;  %v5647_v36 = vld [vmem:[%s10144_s7 + $0x10] sm:$0xff] }
 0x4d9   : > { %v6297_v15 = vpack.c.bf16 %v5647_v36, %v5645_v5 }
 0x4da   : > { %6246 = vmatpush3.bf16.msra.mxu1 %v6245_v24  ;;  %6278 = vmatpush3.bf16.msra.mxu0 %v6277_v44  ;;  %v6299_v24 = vpack.c.bf16 %v5652_v33, %v5650_v4  ;;  %v5649_v44 = vld [vmem:[%s10144_s7 + $0x20] sm:$0xff] }
 0x4db   : > { %6248 = vmatprep.subr.bf16.mxu1 %v6247_v26  ;;  %6280 = vmatprep.subr.bf16.mxu0 %v6279_v31  ;;  %v5656_v26 = vld [vmem:[%s10144_s7 + $0x58] sm:$0xff]  ;;  %v6301_v31 = vpack.c.bf16 %v5651_v18, %v5649_v44  ;;  %v5677_v33 = vld [vmem:[%s10145_s8] sm:$0x3] }
 0x4dc   : > { %v6303_v63 = vpack.c.bf16 %v5656_v26, %v5654_v46 }
 0x4de   : > { %6250 = vmatpush3.bf16.msra.mxu1 %v6249_v6  ;;  %6282 = vmatpush3.bf16.msra.mxu0 %v6281_v59  ;;  %v6307_v6 = vpack.c.bf16 %v5660_v32, %v5658_v2  ;;  %v5657_v59 = vld [vmem:[%s10144_s7 + $0x60] sm:$0xff] }
 0x4df   : > { %6252 = vmatprep.subr.bf16.mxu1 %v6251_v30  ;;  %6284 = vmatprep.subr.bf16.mxu0 %v6283_v49  ;;  %v5664_v30 = vld [vmem:[%s10144_s7 + $0x98] sm:$0xff]  ;;  %v6309_v49 = vpack.c.bf16 %v5659_v56, %v5657_v59 }
 0x4e0   : > { %v6311_v62 = vpack.c.bf16 %v5664_v30, %v5662_v23 }
 0x4e2   : > { %6254 = vmatpush3.bf16.msra.mxu1 %v6253_v43  ;;  %6286 = vmatpush3.bf16.msra.mxu0 %v6285_v37  ;;  %v6315_v43 = vpack.c.bf16 %v5668_v13, %v5666_v9  ;;  %v5665_v37 = vld [vmem:[%s10144_s7 + $0xa0] sm:$0xff] }
 0x4e3   : > { %6256 = vmatprep.subr.bf16.mxu1 %v6255_v14  ;;  %6288 = vmatprep.subr.bf16.mxu0 %v6287_v54  ;;  %v6317_v10 = vpack.c.bf16 %v5667_v1, %v5665_v37  ;;  %v5670_v14 = vld [vmem:[%s10144_s7 + $0xc8] sm:$0xff]  ;;  %v5672_v54 = vld [vmem:[%s10144_s7 + $0xd8] sm:$0xff] }
 0x4e4   : > { %v6319_v8 = vpack.c.bf16 %v5672_v54, %v5670_v14 }
 0x4e6   : > { %6258 = vmatpush3.bf16.msra.mxu1 %v6257_v28  ;;  %6290 = vmatpush3.bf16.msra.mxu0 %v6289_v35  ;;  %v6323_v28 = vpack.c.bf16 %v5676_v42, %v5674_v61  ;;  %v5673_v35 = vld [vmem:[%s10144_s7 + $0xe0] sm:$0xff] }
 0x4e7   : > { %6260 = vmatprep.subr.bf16.mxu1 %v6259_v48  ;;  %6292 = vmatprep.subr.bf16.mxu0 %v6291_v21  ;;  %v6325_v48 = vpack.c.bf16 %v5675_v16, %v5673_v35 }
 0x4ea   : > { %6262 = vmatpush3.bf16.msra.mxu1 %v6261_v25  ;;  %6294 = vmatpush3.bf16.msra.mxu0 %v6293_v34 }
 0x4eb   : > { %6296 = vmatprep.subr.bf16.mxu1 %v6295_v47 }
 0x4ed   : > { %5570 = vmatmul.mubr.f32.vlgmr.msra.gmra.mrb[10].mxu1 %v5344_v7  ;;  %5640 = vmatmul.mubr.f32.vlgmr.msra.gmra.mrb[18].mxu0 %v5352_v27 }
 0x4ee   : > { %5753 = vmatprep.mubr.f32.mxu1 %v10334_v3  ;;  %6298 = vmatpush1.bf16.msra.mxu1 %v6297_v15  ;;  %v5682_v15 = vrot.slane %v5677_v33, %v5327_v12 }
 0x4ef   : > { %6300 = vmatprep.subr.bf16.mxu1 %v6299_v24  ;;  %v5686_v24 = vrot.slane %v5677_v33, %v5331_v50 }
 0x4f2   : > { %6302 = vmatpush1.bf16.msra.mxu1 %v6301_v31 }
 0x4f3   : > { %6304 = vmatprep.subr.bf16.mxu1 %v6303_v63 }
 0x4f6   : > { %6306 = vmatpush1.bf16.msra.mxu1 %v6305_v45 }
 0x4f7   : > { %6308 = vmatprep.subr.bf16.mxu1 %v6307_v6 }
 0x4fa   : > { %6310 = vmatpush1.bf16.msra.mxu1 %v6309_v49 }
 0x4fb   : > { %6312 = vmatprep.subr.bf16.mxu1 %v6311_v62 }
 0x4fe   : > { %6314 = vmatpush1.bf16.msra.mxu1 %v6313_v19 }
 0x4ff   : > { %6316 = vmatprep.subr.bf16.mxu1 %v6315_v43 }
 0x502   : > { %6318 = vmatpush1.bf16.msra.mxu1 %v6317_v10 }
 0x503   : > { %6320 = vmatprep.subr.bf16.mxu1 %v6319_v8 }
 0x506   : > { %6322 = vmatpush1.bf16.msra.mxu1 %v6321_v52 }
 0x507   : > { %6324 = vmatprep.subr.bf16.mxu1 %v6323_v28 }
 0x50a   : > { %6326 = vmatpush1.bf16.msra.mxu1 %v6325_v48 }
 0x5a0   : > { %v5999_v21 = vpop.f32.mrb[8].mxu1  ;;  %v6034_v38 = vpop.f32.mrb[16].mxu0 }
 0x5a1   : > { %v6000_v39 = vpop.f32.mrb[9].mxu1  ;;  %v6035_v25 = vpop.f32.mrb[17].mxu0 }
 0x5a2   : > { %v6001_v34 = vadd.f32 %v6000_v39, %v5999_v21  ;;  %v6036_v29 = vadd.f32 %v6035_v25, %v6034_v38 }
 0x5a4   : > { %v5432_v17 = vadd.f32 %v6001_v34, %v5323_v0 }
 0x5a6   : > { %v5502_v7 = vadd.f32 %v6036_v29, %v5432_v17 }
 0x5c0   : > { %v6069_v27 = vpop.f32.mrb[10].mxu1  ;;  %v6104_v3 = vpop.f32.mrb[18].mxu0 }
 0x5c1   : > { %v6070_v22 = vpop.f32.mrb[11].mxu1  ;;  %v6105_v20 = vpop.f32.mrb[19].mxu0 }
 0x5c2   : > { %v6071_v5 = vadd.f32 %v6070_v22, %v6069_v27  ;;  %v6106_v47 = vadd.f32 %v6105_v20, %v6104_v3 }
 0x5c4   : > { %v5572_v36 = vadd.f32 %v6071_v5, %v5502_v7 }
 0x5c6   : > { %v5642_v4 = vadd.f32 %v6106_v47, %v5572_v36 }
 0x5c8   : > { %5754 = vmatmul.mubr.f32.vlgmr.msra.gmra.mrb[12].mxu1 %v5642_v4 }
 0x69b   : > { %v5755_v44 = vpop.f32.mrb[12].mxu1 }
 0x69c   : > { %v5756_v18 = vadd.f32 %v5755_v44, %v5682_v15  ;;  %v5757_v46 = vpop.f32.mrb[13].mxu1 }
 0x69d   : > { %v5758_v26 = vadd.f32 %v5757_v46, %v5686_v24 }
 0x69f   : > { %v5762_v31 = vcombine.low %v5756_v18, %v5758_v26 }
 0x6a1   : > { %v5769_v63 = vrot.slane %v5762_v31, %v9440_v41 }
 0x6a3   : > { %v5776_v40 = vrot.slane %v5769_v63, %v9440_v41 }
 0x6a5   : > { %5780 = vst.msk [vmem:[%s370_s22] sm:$0x3] %vm5778_vm2, %v5776_v40 }
 0x6a6 PF: > { %s21_s30 = sadd.s32 1, %s6637_s30  }
 0x6a7   : > { %p18_p5 = scmp.ge.s32.totalorder %s21_s30, 4  }
 0x6a9   :  { %20 = sbr.rel (!%p18_p5) target bundleno = 2 (0x2), region = 108 }
 0x6b0   :  { %5800 = vsyncpa [#allocation5], 1 }
 0x6b1   :  { %5802 = vsyncpa [#allocation5 + $0x1], 1 }
 0x6b2   :  { %5803 = vsyncpa [#allocation7], 1 }

</bundles_post_ra>
